<compile_context>
chip_gen: v6e
topology: v6e:2x2x1
jax: 0.10.0
libtpu: 0.0.40
codegen_flags: <defaults>
</compile_context>

<pallas_src>
import jax
import jax.numpy as jnp
from jax import lax
from jax.experimental import pallas as pl
from jax.experimental.pallas import tpu as pltpu

BN_EPS = 1e-5
K = 3
LANE = 128
_VMEM_LIMIT = 48 * 1024 * 1024      # < 64 MiB physical on v7x, fine on v5e/v6e
_VMEM_BUDGET = 20 * 1024 * 1024     # per-step working-set guard for tile picking


def _round_up(v, m):
    return ((v + m - 1) // m) * m


def _pick_row_tile(Ho, Wo, Cp_in, Cp_out):
    """Largest row-band TH (divisor of Ho) whose pass-1 working set fits VMEM."""
    for th in (64, 32, 16, 8, 4, 2, 1):
        if th > Ho or Ho % th:
            continue
        in_tile = (th + 2) * (Wo + 2) * Cp_in * 2      # bf16 haloed input tile
        y_tile = th * Wo * Cp_out * 4                  # f32 conv output tile
        patch = th * Wo * K * K * Cp_in * 2            # bf16 im2col patch (temp)
        w_mat = K * K * Cp_in * Cp_out * 2             # resident bf16 weights
        acc = th * Wo * Cp_out * 4                     # f32 accumulator (temp)
        if 2 * (in_tile + y_tile) + patch + w_mat + acc <= _VMEM_BUDGET:
            return th
    return 1


def _pick_m_tile(Mtot, Cp_out, out_bytes):
    for tm in (2048, 1024, 512, 256, 128, 64, 32, 16, 8):
        if tm > Mtot or Mtot % tm:
            continue
        if 2 * tm * Cp_out * (4 + out_bytes) <= _VMEM_BUDGET:
            return tm
    return Mtot


# --------------------------------------------------------------------------- #
# Pass 1: 3x3 stride-1 conv + bias over a haloed (TH+2 x Wpad) row band,
#         plus per-tile BatchNorm partial statistics.
# --------------------------------------------------------------------------- #
def _conv_pass1_kernel(x_ref, w_ref, b_ref, y_ref, stats_ref):
    # x_ref     : (1, 1, TH+2, Wo+2, Cin) bf16 -- overlapping row band (halo=1)
    # w_ref     : (9*Cin, Cout)           bf16 -- taps ordered (kh, kw, cin)
    # b_ref     : (1, Cout)               f32
    # y_ref     : (1, TH, Wo, Cout)       f32  -- conv + bias (pre-BN)
    # stats_ref : (1, 1, 2, Cout)         f32  -- [sum ; sum-of-squares] per tile
    _, _, THp2, Wpad, Cin = x_ref.shape
    TH = THp2 - 2
    Wo = Wpad - 2
    Cout = y_ref.shape[-1]

    tile = x_ref[...].reshape(THp2, Wpad, Cin)          # drop leading 1-dims
    taps = []
    for kh in range(K):                                  # static unroll
        rows = tile[kh:kh + TH]                          # (TH, Wpad, Cin)
        for kw in range(K):
            taps.append(rows[:, kw:kw + Wo, :].reshape(TH * Wo, Cin))
    patch = jnp.concatenate(taps, axis=-1)               # (TH*Wo, 9*Cin) bf16

    acc = jnp.dot(patch, w_ref[...], preferred_element_type=jnp.float32)
    acc = acc + b_ref[...]                               # (TH*Wo, Cout) f32

    y_ref[...] = acc.reshape(1, TH, Wo, Cout)

    s = jnp.sum(acc, axis=0, keepdims=True)              # (1, Cout)
    ss = jnp.sum(acc * acc, axis=0, keepdims=True)       # (1, Cout)
    stats_ref[...] = jnp.concatenate([s, ss], axis=0).reshape(1, 1, 2, Cout)


# --------------------------------------------------------------------------- #
# Pass 2: BatchNorm (precomputed per-channel scale/shift) + ReLU.
# --------------------------------------------------------------------------- #
def _bn_relu_kernel(y_ref, scale_ref, shift_ref, o_ref):
    y = y_ref[...]                                       # (TM, Cout) f32
    out = jnp.maximum(y * scale_ref[...] + shift_ref[...], 0.0)
    o_ref[...] = out.astype(o_ref.dtype)


# --------------------------------------------------------------------------- #
# One conv -> BN -> ReLU block, NHWC with channel padding to a 128 multiple.
# --------------------------------------------------------------------------- #
def _conv_bn_relu_block(x_nhwc_cp, weight, bias, gamma, beta, out_dtype):
    # x_nhwc_cp : (N, H, W, Cp_in)  channel-padded activation
    # weight    : (Cout, Cin, 3, 3), bias/gamma/beta: (Cout,)
    N, H, W, Cp_in = x_nhwc_cp.shape
    Cout, Cin = weight.shape[0], weight.shape[1]
    Cp_out = _round_up(Cout, LANE)
    Ho, Wo = H, W                                        # stride 1, pad 1, k 3
    Wpad = W + 2

    TH = _pick_row_tile(Ho, Wo, Cp_in, Cp_out)
    nH = Ho // TH

    # bf16 activations; spatial zero pad; overlapping row bands with 1-row halo.
    xb = x_nhwc_cp.astype(jnp.bfloat16)
    x_sp = jnp.pad(xb, ((0, 0), (1, 1), (1, 1), (0, 0)))      # (N, H+2, W+2, Cp_in)
    x_tiles = jnp.stack(
        [lax.slice_in_dim(x_sp, i * TH, i * TH + TH + 2, axis=1) for i in range(nH)],
        axis=1)                                               # (N, nH, TH+2, Wpad, Cp_in)

    # Weights -> (9*Cp_in, Cp_out), taps ordered (kh, kw, cin); bf16.
    w_p = jnp.zeros((Cp_out, Cp_in, K, K), jnp.float32).at[:Cout, :Cin].set(weight)
    w_mat = jnp.transpose(w_p, (2, 3, 1, 0)).reshape(K * K * Cp_in, Cp_out)
    w_mat = w_mat.astype(jnp.bfloat16)
    b_row = jnp.zeros((1, Cp_out), jnp.float32).at[0, :Cout].set(bias)

    grid = (N, nH)
    y, partial = pl.pallas_call(
        _conv_pass1_kernel,
        grid=grid,
        in_specs=[
            pl.BlockSpec((1, 1, TH + 2, Wpad, Cp_in), lambda n, i: (n, i, 0, 0, 0)),
            pl.BlockSpec((K * K * Cp_in, Cp_out), lambda n, i: (0, 0)),   # resident
            pl.BlockSpec((1, Cp_out), lambda n, i: (0, 0)),               # resident
        ],
        out_specs=[
            pl.BlockSpec((1, TH, Wo, Cp_out), lambda n, i: (n, i, 0, 0)),
            pl.BlockSpec((1, 1, 2, Cp_out), lambda n, i: (n, i, 0, 0)),
        ],
        out_shape=[
            jax.ShapeDtypeStruct((N, Ho, Wo, Cp_out), jnp.float32),
            jax.ShapeDtypeStruct((N, nH, 2, Cp_out), jnp.float32),
        ],
        compiler_params=pltpu.CompilerParams(
            dimension_semantics=("parallel", "parallel"),
            vmem_limit_bytes=_VMEM_LIMIT),
    )(x_tiles, w_mat, b_row)

    # Tiny per-channel reduction + BN scale/shift in plain JAX (O(C) work).
    Mtot = N * Ho * Wo
    sums = jnp.sum(partial[:, :, 0, :], axis=(0, 1))
    sumsq = jnp.sum(partial[:, :, 1, :], axis=(0, 1))
    mean = sums / Mtot
    var = jnp.maximum(sumsq / Mtot - mean * mean, 0.0)    # biased (training-mode)
    g_p = jnp.zeros((Cp_out,), jnp.float32).at[:Cout].set(gamma)
    be_p = jnp.zeros((Cp_out,), jnp.float32).at[:Cout].set(beta)
    inv_std = lax.rsqrt(var + BN_EPS)
    scale = (g_p * inv_std).reshape(1, Cp_out)
    shift = (be_p - mean * g_p * inv_std).reshape(1, Cp_out)

    # Pass 2: normalize + ReLU over lane-dense (M, Cp_out) tiles.
    y_flat = y.reshape(Mtot, Cp_out)
    out_bytes = jnp.dtype(out_dtype).itemsize
    TM = _pick_m_tile(Mtot, Cp_out, out_bytes)
    out_flat = pl.pallas_call(
        _bn_relu_kernel,
        grid=(Mtot // TM,),
        in_specs=[
            pl.BlockSpec((TM, Cp_out), lambda i: (i, 0)),
            pl.BlockSpec((1, Cp_out), lambda i: (0, 0)),
            pl.BlockSpec((1, Cp_out), lambda i: (0, 0)),
        ],
        out_specs=pl.BlockSpec((TM, Cp_out), lambda i: (i, 0)),
        out_shape=jax.ShapeDtypeStruct((Mtot, Cp_out), out_dtype),
        compiler_params=pltpu.CompilerParams(
            dimension_semantics=("parallel",),
            vmem_limit_bytes=_VMEM_LIMIT),
    )(y_flat, scale, shift)

    # TODO(synk): nn.Dropout omitted (identity) — config.dropout_ratio unknown.
    return out_flat.reshape(N, Ho, Wo, Cp_out)


def double_conv(x_nchw, w1, b1, g1, be1, w2, b2, g2, be2):
    """DoubleConv forward.  x_nchw: (N, C_in, H, W) f32 -> (N, C_out, H, W) f32."""
    N, Cin, H, W = x_nchw.shape
    Cout = w1.shape[0]
    Cp_in = _round_up(Cin, LANE)

    x_nhwc = jnp.transpose(x_nchw, (0, 2, 3, 1))
    x_cp = jnp.pad(x_nhwc, ((0, 0), (0, 0), (0, 0), (0, Cp_in - Cin)))

    h1 = _conv_bn_relu_block(x_cp, w1, b1, g1, be1, out_dtype=jnp.bfloat16)
    h2 = _conv_bn_relu_block(h1, w2, b2, g2, be2, out_dtype=jnp.float32)

    out_nhwc = h2[..., :Cout]
    return jnp.transpose(out_nhwc, (0, 3, 1, 2))


# --------------------------------------------------------------------------- #
# Pure-JAX reference (conv inputs rounded through bf16 like the kernel does).
# --------------------------------------------------------------------------- #
def _bf16_round(v):
    return v.astype(jnp.bfloat16).astype(jnp.float32)


def reference(x, w1, b1, g1, be1, w2, b2, g2, be2):
    def block(inp, w, b, g, be):
        y = lax.conv_general_dilated(
            _bf16_round(inp), _bf16_round(w), (1, 1), ((1, 1), (1, 1)),
            dimension_numbers=("NCHW", "OIHW", "NCHW"),
            preferred_element_type=jnp.float32) + b.reshape(1, -1, 1, 1)
        mean = jnp.mean(y, axis=(0, 2, 3), keepdims=True)
        var = jnp.mean((y - mean) ** 2, axis=(0, 2, 3), keepdims=True)
        yh = (y - mean) * lax.rsqrt(var + BN_EPS)
        yh = yh * g.reshape(1, -1, 1, 1) + be.reshape(1, -1, 1, 1)
        return jnp.maximum(yh, 0.0)

    return block(block(x, w1, b1, g1, be1), w2, b2, g2, be2)


if __name__ == "__main__":
    key = jax.random.PRNGKey(0)
    ks = jax.random.split(key, 9)

    N, Cin, H, W = 2, 4, 16, 16
    Cout = 4
    x = jax.random.normal(ks[0], (N, Cin, H, W), jnp.float32)

    # Conv1 / BN1 / Conv2 / BN2 parameters (deterministic, synthetic).
    w1 = jax.random.normal(ks[1], (Cout, Cin, K, K), jnp.float32) * 0.1
    b1 = jax.random.normal(ks[2], (Cout,), jnp.float32) * 0.1
    g1 = 1.0 + 0.1 * jax.random.normal(ks[3], (Cout,), jnp.float32)
    be1 = 0.1 * jax.random.normal(ks[4], (Cout,), jnp.float32)
    w2 = jax.random.normal(ks[5], (Cout, Cout, K, K), jnp.float32) * 0.1
    b2 = jax.random.normal(ks[6], (Cout,), jnp.float32) * 0.1
    g2 = 1.0 + 0.1 * jax.random.normal(ks[7], (Cout,), jnp.float32)
    be2 = 0.1 * jax.random.normal(ks[8], (Cout,), jnp.float32)

    fwd = jax.jit(double_conv)
    out = jax.block_until_ready(fwd(x, w1, b1, g1, be1, w2, b2, g2, be2))
    assert out.shape == (N, Cout, H, W), out.shape

    ref = reference(x, w1, b1, g1, be1, w2, b2, g2, be2)
    err = float(jnp.max(jnp.abs(out - ref)))
    assert jnp.allclose(out, ref, atol=2e-2, rtol=2e-2), f"max abs err {err}"

    print("KERNEL_OK")
</pallas_src>

<mosaic_0001>
module attributes {stable_mosaic.version = 11 : i64} {
  func.func @_conv_pass1_kernel(%arg0: i32, %arg1: i32, %arg2: memref<1x1x18x18x128xbf16, #tpu.memory_space<vmem>>, %arg3: memref<1152x128xbf16, #tpu.memory_space<vmem>>, %arg4: memref<1x128xf32, #tpu.memory_space<vmem>>, %arg5: memref<1x16x16x128xf32, #tpu.memory_space<vmem>>, %arg6: memref<1x1x2x128xf32, #tpu.memory_space<vmem>>) attributes {dimension_semantics = [#tpu.dimension_semantics<parallel>, #tpu.dimension_semantics<parallel>], iteration_bounds = array<i64: 2, 1>, scalar_prefetch = 0 : i64, scratch_operands = 0 : i64, tpu.core_type = #tpu.core_type<tc>, window_params = [{transform_indices = @transform_0, window_bounds = array<i64: 1, 1, 18, 18, 128>}, {pipeline_mode = #tpu.pipeline_mode<synchronous>, transform_indices = @transform_1, window_bounds = array<i64: 1152, 128>}, {pipeline_mode = #tpu.pipeline_mode<synchronous>, transform_indices = @transform_2, window_bounds = array<i64: 1, 128>}, {transform_indices = @transform_3, window_bounds = array<i64: 1, 16, 16, 128>}, {transform_indices = @transform_4, window_bounds = array<i64: 1, 1, 2, 128>}]} {
    %c0 = arith.constant 0 : index
    %c0_0 = arith.constant 0 : index
    %c0_1 = arith.constant 0 : index
    %c0_2 = arith.constant 0 : index
    %c0_3 = arith.constant 0 : index
    %0 = vector.load %arg2[%c0, %c0_0, %c0_1, %c0_2, %c0_3] : memref<1x1x18x18x128xbf16, #tpu.memory_space<vmem>>, vector<1x1x18x18x128xbf16>
    %1 = vector.shape_cast %0 : vector<1x1x18x18x128xbf16> to vector<18x18x128xbf16>
    %2 = vector.extract_strided_slice %1 {offsets = [0, 0, 0], sizes = [16, 18, 128], strides = [1, 1, 1]} : vector<18x18x128xbf16> to vector<16x18x128xbf16>
    %3 = vector.extract_strided_slice %2 {offsets = [0, 0, 0], sizes = [16, 16, 128], strides = [1, 1, 1]} : vector<16x18x128xbf16> to vector<16x16x128xbf16>
    %4 = vector.shape_cast %3 : vector<16x16x128xbf16> to vector<256x128xbf16>
    %5 = vector.extract_strided_slice %2 {offsets = [0, 1, 0], sizes = [16, 16, 128], strides = [1, 1, 1]} : vector<16x18x128xbf16> to vector<16x16x128xbf16>
    %6 = vector.shape_cast %5 : vector<16x16x128xbf16> to vector<256x128xbf16>
    %7 = vector.extract_strided_slice %2 {offsets = [0, 2, 0], sizes = [16, 16, 128], strides = [1, 1, 1]} : vector<16x18x128xbf16> to vector<16x16x128xbf16>
    %8 = vector.shape_cast %7 : vector<16x16x128xbf16> to vector<256x128xbf16>
    %9 = vector.extract_strided_slice %1 {offsets = [1, 0, 0], sizes = [16, 18, 128], strides = [1, 1, 1]} : vector<18x18x128xbf16> to vector<16x18x128xbf16>
    %10 = vector.extract_strided_slice %9 {offsets = [0, 0, 0], sizes = [16, 16, 128], strides = [1, 1, 1]} : vector<16x18x128xbf16> to vector<16x16x128xbf16>
    %11 = vector.shape_cast %10 : vector<16x16x128xbf16> to vector<256x128xbf16>
    %12 = vector.extract_strided_slice %9 {offsets = [0, 1, 0], sizes = [16, 16, 128], strides = [1, 1, 1]} : vector<16x18x128xbf16> to vector<16x16x128xbf16>
    %13 = vector.shape_cast %12 : vector<16x16x128xbf16> to vector<256x128xbf16>
    %14 = vector.extract_strided_slice %9 {offsets = [0, 2, 0], sizes = [16, 16, 128], strides = [1, 1, 1]} : vector<16x18x128xbf16> to vector<16x16x128xbf16>
    %15 = vector.shape_cast %14 : vector<16x16x128xbf16> to vector<256x128xbf16>
    %16 = vector.extract_strided_slice %1 {offsets = [2, 0, 0], sizes = [16, 18, 128], strides = [1, 1, 1]} : vector<18x18x128xbf16> to vector<16x18x128xbf16>
    %17 = vector.extract_strided_slice %16 {offsets = [0, 0, 0], sizes = [16, 16, 128], strides = [1, 1, 1]} : vector<16x18x128xbf16> to vector<16x16x128xbf16>
    %18 = vector.shape_cast %17 : vector<16x16x128xbf16> to vector<256x128xbf16>
    %19 = vector.extract_strided_slice %16 {offsets = [0, 1, 0], sizes = [16, 16, 128], strides = [1, 1, 1]} : vector<16x18x128xbf16> to vector<16x16x128xbf16>
    %20 = vector.shape_cast %19 : vector<16x16x128xbf16> to vector<256x128xbf16>
    %21 = vector.extract_strided_slice %16 {offsets = [0, 2, 0], sizes = [16, 16, 128], strides = [1, 1, 1]} : vector<16x18x128xbf16> to vector<16x16x128xbf16>
    %22 = vector.shape_cast %21 : vector<16x16x128xbf16> to vector<256x128xbf16>
    %23 = tpu.concatenate %4, %6, %8, %11, %13, %15, %18, %20, %22 in 1 : vector<256x128xbf16>, vector<256x128xbf16>, vector<256x128xbf16>, vector<256x128xbf16>, vector<256x128xbf16>, vector<256x128xbf16>, vector<256x128xbf16>, vector<256x128xbf16>, vector<256x128xbf16> -> vector<256x1152xbf16>
    %c0_4 = arith.constant 0 : index
    %c0_5 = arith.constant 0 : index
    %24 = vector.load %arg3[%c0_4, %c0_5] : memref<1152x128xbf16, #tpu.memory_space<vmem>>, vector<1152x128xbf16>
    %cst = arith.constant dense<0.000000e+00> : vector<256x128xf32>
    %25 = tpu.matmul %23, %24, %cst {dimension_numbers = #tpu.dot_dimension_numbers<[1], [0], [0], [1], [0, 0, 1, 1], [], []>} : vector<256x1152xbf16>, vector<1152x128xbf16>, vector<256x128xf32> -> vector<256x128xf32>
    %c0_6 = arith.constant 0 : index
    %c0_7 = arith.constant 0 : index
    %26 = vector.load %arg4[%c0_6, %c0_7] : memref<1x128xf32, #tpu.memory_space<vmem>>, vector<1x128xf32>
    %27 = vector.broadcast %26 : vector<1x128xf32> to vector<256x128xf32>
    %28 = arith.addf %25, %27 : vector<256x128xf32>
    %29 = vector.shape_cast %28 : vector<256x128xf32> to vector<1x16x16x128xf32>
    %c0_8 = arith.constant 0 : index
    %c0_9 = arith.constant 0 : index
    %c0_10 = arith.constant 0 : index
    %c0_11 = arith.constant 0 : index
    %30 = vector.load %arg5[%c0_8, %c0_9, %c0_10, %c0_11] : memref<1x16x16x128xf32, #tpu.memory_space<vmem>>, vector<1x16x16x128xf32>
    tpu.vector_store %arg5[%c0_8, %c0_9, %c0_10, %c0_11], %29 {strides = array<i32>} : memref<1x16x16x128xf32, #tpu.memory_space<vmem>>, vector<1x16x16x128xf32>,
    %cst_12 = arith.constant dense<0.000000e+00> : vector<128xf32>
    %31 = vector.multi_reduction <add>, %28, %cst_12 [0] : vector<256x128xf32> to vector<128xf32>
    %32 = vector.shape_cast %31 : vector<128xf32> to vector<1x128xf32>
    %33 = arith.mulf %28, %28 : vector<256x128xf32>
    %cst_13 = arith.constant dense<0.000000e+00> : vector<128xf32>
    %34 = vector.multi_reduction <add>, %33, %cst_13 [0] : vector<256x128xf32> to vector<128xf32>
    %35 = vector.shape_cast %34 : vector<128xf32> to vector<1x128xf32>
    %36 = tpu.concatenate %32, %35 in 0 : vector<1x128xf32>, vector<1x128xf32> -> vector<2x128xf32>
    %37 = vector.shape_cast %36 : vector<2x128xf32> to vector<1x1x2x128xf32>
    %c0_14 = arith.constant 0 : index
    %c0_15 = arith.constant 0 : index
    %c0_16 = arith.constant 0 : index
    %c0_17 = arith.constant 0 : index
    %38 = vector.load %arg6[%c0_14, %c0_15, %c0_16, %c0_17] : memref<1x1x2x128xf32, #tpu.memory_space<vmem>>, vector<1x1x2x128xf32>
    tpu.vector_store %arg6[%c0_14, %c0_15, %c0_16, %c0_17], %37 {strides = array<i32>} : memref<1x1x2x128xf32, #tpu.memory_space<vmem>>, vector<1x1x2x128xf32>,
    return
  }
  func.func @transform_0(%arg0: i32, %arg1: i32) -> (i32, i32, i32, i32, i32) {
    %c0_i32 = arith.constant 0 : i32
    %c0_i32_0 = arith.constant 0 : i32
    %c0_i32_1 = arith.constant 0 : i32
    %c0_i32_2 = arith.constant 0 : i32
    return %arg0, %arg1, %c0_i32, %c0_i32_0, %c0_i32_1 : i32, i32, i32, i32, i32
  }
  func.func @transform_1(%arg0: i32, %arg1: i32) -> (i32, i32) {
    %c0_i32 = arith.constant 0 : i32
    %c0_i32_0 = arith.constant 0 : i32
    %c0_i32_1 = arith.constant 0 : i32
    return %c0_i32, %c0_i32_0 : i32, i32
  }
  func.func @transform_2(%arg0: i32, %arg1: i32) -> (i32, i32) {
    %c0_i32 = arith.constant 0 : i32
    %c0_i32_0 = arith.constant 0 : i32
    %c0_i32_1 = arith.constant 0 : i32
    return %c0_i32, %c0_i32_0 : i32, i32
  }
  func.func @transform_3(%arg0: i32, %arg1: i32) -> (i32, i32, i32, i32) {
    %c0_i32 = arith.constant 0 : i32
    %c0_i32_0 = arith.constant 0 : i32
    %c0_i32_1 = arith.constant 0 : i32
    return %arg0, %arg1, %c0_i32, %c0_i32_0 : i32, i32, i32, i32
  }
  func.func @transform_4(%arg0: i32, %arg1: i32) -> (i32, i32, i32, i32) {
    %c0_i32 = arith.constant 0 : i32
    %c0_i32_0 = arith.constant 0 : i32
    %c0_i32_1 = arith.constant 0 : i32
    return %arg0, %arg1, %c0_i32, %c0_i32_0 : i32, i32, i32, i32
  }
}

module attributes {stable_mosaic.version = 11 : i64} {
  func.func @_bn_relu_kernel(%arg0: i32, %arg1: memref<512x128xf32, #tpu.memory_space<vmem>>, %arg2: memref<1x128xf32, #tpu.memory_space<vmem>>, %arg3: memref<1x128xf32, #tpu.memory_space<vmem>>, %arg4: memref<512x128xbf16, #tpu.memory_space<vmem>>) attributes {dimension_semantics = [#tpu.dimension_semantics<parallel>], iteration_bounds = array<i64: 1>, scalar_prefetch = 0 : i64, scratch_operands = 0 : i64, tpu.core_type = #tpu.core_type<tc>, window_params = [{transform_indices = @transform_0, window_bounds = array<i64: 512, 128>}, {pipeline_mode = #tpu.pipeline_mode<synchronous>, transform_indices = @transform_1, window_bounds = array<i64: 1, 128>}, {pipeline_mode = #tpu.pipeline_mode<synchronous>, transform_indices = @transform_2, window_bounds = array<i64: 1, 128>}, {transform_indices = @transform_3, window_bounds = array<i64: 512, 128>}]} {
    %c0 = arith.constant 0 : index
    %c0_0 = arith.constant 0 : index
    %0 = vector.load %arg1[%c0, %c0_0] : memref<512x128xf32, #tpu.memory_space<vmem>>, vector<512x128xf32>
    %c0_1 = arith.constant 0 : index
    %c0_2 = arith.constant 0 : index
    %1 = vector.load %arg2[%c0_1, %c0_2] : memref<1x128xf32, #tpu.memory_space<vmem>>, vector<1x128xf32>
    %2 = vector.broadcast %1 : vector<1x128xf32> to vector<512x128xf32>
    %3 = arith.mulf %0, %2 : vector<512x128xf32>
    %c0_3 = arith.constant 0 : index
    %c0_4 = arith.constant 0 : index
    %4 = vector.load %arg3[%c0_3, %c0_4] : memref<1x128xf32, #tpu.memory_space<vmem>>, vector<1x128xf32>
    %5 = vector.broadcast %4 : vector<1x128xf32> to vector<512x128xf32>
    %6 = arith.addf %3, %5 : vector<512x128xf32>
    %cst = arith.constant 0.000000e+00 : f32
    %7 = vector.broadcast %cst : f32 to vector<512x128xf32>
    %8 = arith.maximumf %6, %7 : vector<512x128xf32>
    %9 = arith.truncf %8 : vector<512x128xf32> to vector<512x128xbf16>
    %c0_5 = arith.constant 0 : index
    %c0_6 = arith.constant 0 : index
    %10 = vector.load %arg4[%c0_5, %c0_6] : memref<512x128xbf16, #tpu.memory_space<vmem>>, vector<512x128xbf16>
    tpu.vector_store %arg4[%c0_5, %c0_6], %9 {strides = array<i32>} : memref<512x128xbf16, #tpu.memory_space<vmem>>, vector<512x128xbf16>,
    return
  }
  func.func @transform_0(%arg0: i32) -> (i32, i32) {
    %c0_i32 = arith.constant 0 : i32
    %c0_i32_0 = arith.constant 0 : i32
    return %arg0, %c0_i32 : i32, i32
  }
  func.func @transform_1(%arg0: i32) -> (i32, i32) {
    %c0_i32 = arith.constant 0 : i32
    %c0_i32_0 = arith.constant 0 : i32
    %c0_i32_1 = arith.constant 0 : i32
    return %c0_i32, %c0_i32_0 : i32, i32
  }
  func.func @transform_2(%arg0: i32) -> (i32, i32) {
    %c0_i32 = arith.constant 0 : i32
    %c0_i32_0 = arith.constant 0 : i32
    %c0_i32_1 = arith.constant 0 : i32
    return %c0_i32, %c0_i32_0 : i32, i32
  }
  func.func @transform_3(%arg0: i32) -> (i32, i32) {
    %c0_i32 = arith.constant 0 : i32
    %c0_i32_0 = arith.constant 0 : i32
    return %arg0, %c0_i32 : i32, i32
  }
}

module attributes {stable_mosaic.version = 11 : i64} {
  func.func @_bn_relu_kernel(%arg0: i32, %arg1: memref<512x128xf32, #tpu.memory_space<vmem>>, %arg2: memref<1x128xf32, #tpu.memory_space<vmem>>, %arg3: memref<1x128xf32, #tpu.memory_space<vmem>>, %arg4: memref<512x128xf32, #tpu.memory_space<vmem>>) attributes {dimension_semantics = [#tpu.dimension_semantics<parallel>], iteration_bounds = array<i64: 1>, scalar_prefetch = 0 : i64, scratch_operands = 0 : i64, tpu.core_type = #tpu.core_type<tc>, window_params = [{transform_indices = @transform_0, window_bounds = array<i64: 512, 128>}, {pipeline_mode = #tpu.pipeline_mode<synchronous>, transform_indices = @transform_1, window_bounds = array<i64: 1, 128>}, {pipeline_mode = #tpu.pipeline_mode<synchronous>, transform_indices = @transform_2, window_bounds = array<i64: 1, 128>}, {transform_indices = @transform_3, window_bounds = array<i64: 512, 128>}]} {
    %c0 = arith.constant 0 : index
    %c0_0 = arith.constant 0 : index
    %0 = vector.load %arg1[%c0, %c0_0] : memref<512x128xf32, #tpu.memory_space<vmem>>, vector<512x128xf32>
    %c0_1 = arith.constant 0 : index
    %c0_2 = arith.constant 0 : index
    %1 = vector.load %arg2[%c0_1, %c0_2] : memref<1x128xf32, #tpu.memory_space<vmem>>, vector<1x128xf32>
    %2 = vector.broadcast %1 : vector<1x128xf32> to vector<512x128xf32>
    %3 = arith.mulf %0, %2 : vector<512x128xf32>
    %c0_3 = arith.constant 0 : index
    %c0_4 = arith.constant 0 : index
    %4 = vector.load %arg3[%c0_3, %c0_4] : memref<1x128xf32, #tpu.memory_space<vmem>>, vector<1x128xf32>
    %5 = vector.broadcast %4 : vector<1x128xf32> to vector<512x128xf32>
    %6 = arith.addf %3, %5 : vector<512x128xf32>
    %cst = arith.constant 0.000000e+00 : f32
    %7 = vector.broadcast %cst : f32 to vector<512x128xf32>
    %8 = arith.maximumf %6, %7 : vector<512x128xf32>
    %c0_5 = arith.constant 0 : index
    %c0_6 = arith.constant 0 : index
    %9 = vector.load %arg4[%c0_5, %c0_6] : memref<512x128xf32, #tpu.memory_space<vmem>>, vector<512x128xf32>
    tpu.vector_store %arg4[%c0_5, %c0_6], %8 {strides = array<i32>} : memref<512x128xf32, #tpu.memory_space<vmem>>, vector<512x128xf32>,
    return
  }
  func.func @transform_0(%arg0: i32) -> (i32, i32) {
    %c0_i32 = arith.constant 0 : i32
    %c0_i32_0 = arith.constant 0 : i32
    return %arg0, %c0_i32 : i32, i32
  }
  func.func @transform_1(%arg0: i32) -> (i32, i32) {
    %c0_i32 = arith.constant 0 : i32
    %c0_i32_0 = arith.constant 0 : i32
    %c0_i32_1 = arith.constant 0 : i32
    return %c0_i32, %c0_i32_0 : i32, i32
  }
  func.func @transform_2(%arg0: i32) -> (i32, i32) {
    %c0_i32 = arith.constant 0 : i32
    %c0_i32_0 = arith.constant 0 : i32
    %c0_i32_1 = arith.constant 0 : i32
    return %c0_i32, %c0_i32_0 : i32, i32
  }
  func.func @transform_3(%arg0: i32) -> (i32, i32) {
    %c0_i32 = arith.constant 0 : i32
    %c0_i32_0 = arith.constant 0 : i32
    return %arg0, %c0_i32 : i32, i32
  }
}

</mosaic_0001>

<bundles_post_ra>
// kernel: double_conv.7
= control target key start
LH: loop header
LB: loop body
LE: loop exit
PB: predicated region body
PF: predicated region fallthrough
CT: control target
= control target key end

     0   :  { %s896_s0 = inlined_call_operand.vmem [shape: f32[512,128], index: 0, kind: input, shape index: {}]   ;;  %s897_s1 = inlined_call_operand.vmem [shape: f32[1,128], index: 1, kind: input, shape index: {}]   ;;  %s898_s2 = inlined_call_operand.vmem [shape: f32[1,128], index: 2, kind: input, shape index: {}]   ;;  %s899_s3 = inlined_call_operand.vmem [shape: f32[512,128], index: 3, kind: output, shape index: {}]  }
   0x1   :  { %v14_v0 = vld [vmem:[%s896_s0] sm:$0xff]  ;;  %v15_v4 = vld [vmem:[%s896_s0 + $0x8] sm:$0xff]  ;;  %v16_v5 = vld [vmem:[%s896_s0 + $0x10] sm:$0xff] }
   0x2   :  { %v380_v1 = vld [vmem:[%s897_s1] ss:$0 sm:$0xff]  ;;  %v17_v6 = vld [vmem:[%s896_s0 + $0x18] sm:$0xff]  ;;  %v19_v11 = vld [vmem:[%s896_s0 + $0x28] sm:$0xff] }
   0x3   :  { %v385_v2 = vld [vmem:[%s898_s2] ss:$0 sm:$0xff]  ;;  %v85_v3 = vmul.f32 %v380_v1, %v14_v0  ;;  %v86_v7 = vmul.f32 %v380_v1, %v15_v4  ;;  %v87_v8 = vmul.f32 %v380_v1, %v16_v5  ;;  %v88_v9 = vmul.f32 %v380_v1, %v17_v6  ;;  %v20_v12 = vld [vmem:[%s896_s0 + $0x30] sm:$0xff]  ;;  %v21_v17 = vld [vmem:[%s896_s0 + $0x38] sm:$0xff] }
   0x4   :  { %v18_v10 = vld [vmem:[%s896_s0 + $0x20] sm:$0xff]  ;;  %v90_v15 = vmul.f32 %v380_v1, %v19_v11  ;;  %v91_v16 = vmul.f32 %v380_v1, %v20_v12  ;;  %v92_v21 = vmul.f32 %v380_v1, %v21_v17  ;;  %v23_v27 = vld [vmem:[%s896_s0 + $0x48] sm:$0xff]  ;;  %v24_v28 = vld [vmem:[%s896_s0 + $0x50] sm:$0xff] }
   0x5   :  { %v156_v13 = vadd.f32 %v385_v2, %v85_v3  ;;  %v89_v14 = vmul.f32 %v380_v1, %v18_v10  ;;  %v157_v18 = vadd.f32 %v385_v2, %v86_v7  ;;  %v158_v19 = vadd.f32 %v385_v2, %v87_v8  ;;  %v22_v22 = vld [vmem:[%s896_s0 + $0x40] sm:$0xff]  ;;  %v25_v29 = vld [vmem:[%s896_s0 + $0x58] sm:$0xff]  ;;  %v27_v35 = vld [vmem:[%s896_s0 + $0x68] sm:$0xff] }
   0x6   :  { %v159_v20 = vadd.f32 %v385_v2, %v88_v9  ;;  %v161_v25 = vadd.f32 %v385_v2, %v90_v15  ;;  %v162_v26 = vadd.f32 %v385_v2, %v91_v16  ;;  %v163_v33 = vadd.f32 %v385_v2, %v92_v21  ;;  %v26_v34 = vld [vmem:[%s896_s0 + $0x60] sm:$0xff]  ;;  %v28_v36 = vld [vmem:[%s896_s0 + $0x70] sm:$0xff]  ;;  %v29_v41 = vld [vmem:[%s896_s0 + $0x78] sm:$0xff] }
   0x7   :  { %v220_v23 = vmax.f32 %v156_v13, 0.0  ;;  %v160_v24 = vadd.f32 %v385_v2, %v89_v14  ;;  %v221_v30 = vmax.f32 %v157_v18, 0.0  ;;  %v222_v31 = vmax.f32 %v158_v19, 0.0  ;;  %v30_v54 = vld [vmem:[%s896_s0 + $0x80] sm:$0xff]  ;;  %v31_v59 = vld [vmem:[%s896_s0 + $0x88] sm:$0xff]  ;;  %v32_v60 = vld [vmem:[%s896_s0 + $0x90] sm:$0xff] }
   0x8   :  { %v223_v32 = vmax.f32 %v159_v20, 0.0  ;;  %v225_v38 = vmax.f32 %v161_v25, 0.0  ;;  %v226_v39 = vmax.f32 %v162_v26, 0.0  ;;  %v93_v40 = vmul.f32 %v380_v1, %v22_v22  ;;  %v33_v61 = vld [vmem:[%s896_s0 + $0x98] sm:$0xff]  ;;  %v34_v4 = vld [vmem:[%s896_s0 + $0xa0] sm:$0xff]  ;;  %v35_v5 = vld [vmem:[%s896_s0 + $0xa8] sm:$0xff] }
   0x9   :  { %284 = vst [vmem:[%s899_s3] sm:$0xff] %v220_v23  ;;  %v224_v37 = vmax.f32 %v160_v24, 0.0  ;;  %285 = vst [vmem:[%s899_s3 + $0x8] sm:$0xff] %v221_v30  ;;  %v227_v42 = vmax.f32 %v163_v33, 0.0  ;;  %v94_v43 = vmul.f32 %v380_v1, %v23_v27  ;;  %v95_v44 = vmul.f32 %v380_v1, %v24_v28  ;;  %v36_v6 = vld [vmem:[%s896_s0 + $0xb0] sm:$0xff]  ;;  %v37_v11 = vld [vmem:[%s896_s0 + $0xb8] sm:$0xff] }
   0xa   :  { %286 = vst [vmem:[%s899_s3 + $0x10] sm:$0xff] %v222_v31  ;;  %287 = vst [vmem:[%s899_s3 + $0x18] sm:$0xff] %v223_v32  ;;  %v96_v45 = vmul.f32 %v380_v1, %v25_v29  ;;  %v164_v46 = vadd.f32 %v385_v2, %v93_v40  ;;  %v97_v47 = vmul.f32 %v380_v1, %v26_v34  ;;  %v38_v24 = vld [vmem:[%s896_s0 + $0xc0] sm:$0xff]  ;;  %v39_v29 = vld [vmem:[%s896_s0 + $0xc8] sm:$0xff] }
   0xb   :  { %288 = vst [vmem:[%s899_s3 + $0x20] sm:$0xff] %v224_v37  ;;  %289 = vst [vmem:[%s899_s3 + $0x28] sm:$0xff] %v225_v38  ;;  %v98_v48 = vmul.f32 %v380_v1, %v27_v35  ;;  %v99_v49 = vmul.f32 %v380_v1, %v28_v36  ;;  %v165_v50 = vadd.f32 %v385_v2, %v94_v43  ;;  %v40_v30 = vld [vmem:[%s896_s0 + $0xd0] sm:$0xff]  ;;  %v41_v31 = vld [vmem:[%s896_s0 + $0xd8] sm:$0xff] }
   0xc   :  { %290 = vst [vmem:[%s899_s3 + $0x30] sm:$0xff] %v226_v39  ;;  %291 = vst [vmem:[%s899_s3 + $0x38] sm:$0xff] %v227_v42  ;;  %v166_v51 = vadd.f32 %v385_v2, %v95_v44  ;;  %v167_v52 = vadd.f32 %v385_v2, %v96_v45  ;;  %v100_v53 = vmul.f32 %v380_v1, %v29_v41  ;;  %v228_v55 = vmax.f32 %v164_v46, 0.0  ;;  %v42_v36 = vld [vmem:[%s896_s0 + $0xe0] sm:$0xff]  ;;  %v43_v37 = vld [vmem:[%s896_s0 + $0xe8] sm:$0xff] }
   0xd   :  { %v168_v56 = vadd.f32 %v385_v2, %v97_v47  ;;  %v169_v57 = vadd.f32 %v385_v2, %v98_v48  ;;  %v170_v58 = vadd.f32 %v385_v2, %v99_v49  ;;  %v229_v62 = vmax.f32 %v165_v50, 0.0  ;;  %v44_v38 = vld [vmem:[%s896_s0 + $0xf0] sm:$0xff]  ;;  %v45_v43 = vld [vmem:[%s896_s0 + $0xf8] sm:$0xff] }
   0xe   :  { %v230_v63 = vmax.f32 %v166_v51, 0.0  ;;  %v231_v0 = vmax.f32 %v167_v52, 0.0  ;;  %v171_v3 = vadd.f32 %v385_v2, %v100_v53  ;;  %292 = vst [vmem:[%s899_s3 + $0x40] sm:$0xff] %v228_v55  ;;  %v101_v10 = vmul.f32 %v380_v1, %v30_v54 }
   0xf   :  { %v232_v7 = vmax.f32 %v168_v56, 0.0  ;;  %v233_v8 = vmax.f32 %v169_v57, 0.0  ;;  %v234_v9 = vmax.f32 %v170_v58, 0.0  ;;  %293 = vst [vmem:[%s899_s3 + $0x48] sm:$0xff] %v229_v62  ;;  %v102_v13 = vmul.f32 %v380_v1, %v31_v59  ;;  %v46_v56 = vld [vmem:[%s896_s0 + $0x100] sm:$0xff]  ;;  %v48_v62 = vld [vmem:[%s896_s0 + $0x110] sm:$0xff] }
  0x10   :  { %294 = vst [vmem:[%s899_s3 + $0x50] sm:$0xff] %v230_v63  ;;  %295 = vst [vmem:[%s899_s3 + $0x58] sm:$0xff] %v231_v0  ;;  %v235_v12 = vmax.f32 %v171_v3, 0.0  ;;  %v103_v14 = vmul.f32 %v380_v1, %v32_v60  ;;  %v104_v15 = vmul.f32 %v380_v1, %v33_v61  ;;  %v172_v16 = vadd.f32 %v385_v2, %v101_v10  ;;  %v47_v61 = vld [vmem:[%s896_s0 + $0x108] sm:$0xff]  ;;  %v49_v63 = vld [vmem:[%s896_s0 + $0x118] sm:$0xff] }
  0x11   :  { %296 = vst [vmem:[%s899_s3 + $0x60] sm:$0xff] %v232_v7  ;;  %297 = vst [vmem:[%s899_s3 + $0x68] sm:$0xff] %v233_v8  ;;  %v105_v17 = vmul.f32 %v380_v1, %v34_v4  ;;  %v106_v18 = vmul.f32 %v380_v1, %v35_v5  ;;  %v107_v19 = vmul.f32 %v380_v1, %v36_v6  ;;  %v50_v6 = vld [vmem:[%s896_s0 + $0x120] sm:$0xff]  ;;  %v51_v7 = vld [vmem:[%s896_s0 + $0x128] sm:$0xff] }
  0x12   :  { %298 = vst [vmem:[%s899_s3 + $0x70] sm:$0xff] %v234_v9  ;;  %299 = vst [vmem:[%s899_s3 + $0x78] sm:$0xff] %v235_v12  ;;  %v173_v20 = vadd.f32 %v385_v2, %v102_v13  ;;  %v174_v21 = vadd.f32 %v385_v2, %v103_v14  ;;  %v175_v22 = vadd.f32 %v385_v2, %v104_v15  ;;  %v236_v25 = vmax.f32 %v172_v16, 0.0  ;;  %v52_v8 = vld [vmem:[%s896_s0 + $0x130] sm:$0xff]  ;;  %v53_v13 = vld [vmem:[%s896_s0 + $0x138] sm:$0xff] }
  0x13   :  { %v108_v23 = vmul.f32 %v380_v1, %v37_v11  ;;  %v176_v26 = vadd.f32 %v385_v2, %v105_v17  ;;  %v177_v27 = vadd.f32 %v385_v2, %v106_v18  ;;  %v178_v28 = vadd.f32 %v385_v2, %v107_v19 }
  0x14   :  { %v237_v32 = vmax.f32 %v173_v20, 0.0  ;;  %v238_v33 = vmax.f32 %v174_v21, 0.0  ;;  %v239_v34 = vmax.f32 %v175_v22, 0.0  ;;  %300 = vst [vmem:[%s899_s3 + $0x80] sm:$0xff] %v236_v25  ;;  %v109_v42 = vmul.f32 %v380_v1, %v38_v24 }
  0x15   :  { %v179_v35 = vadd.f32 %v385_v2, %v108_v23  ;;  %v240_v39 = vmax.f32 %v176_v26, 0.0  ;;  %v241_v40 = vmax.f32 %v177_v27, 0.0  ;;  %v242_v41 = vmax.f32 %v178_v28, 0.0  ;;  %v54_v26 = vld [vmem:[%s896_s0 + $0x140] sm:$0xff] }
  0x16   :  { %301 = vst [vmem:[%s899_s3 + $0x88] sm:$0xff] %v237_v32  ;;  %302 = vst [vmem:[%s899_s3 + $0x90] sm:$0xff] %v238_v33  ;;  %v110_v45 = vmul.f32 %v380_v1, %v39_v29  ;;  %v111_v46 = vmul.f32 %v380_v1, %v40_v30  ;;  %v112_v47 = vmul.f32 %v380_v1, %v41_v31  ;;  %v55_v31 = vld [vmem:[%s896_s0 + $0x148] sm:$0xff]  ;;  %v56_v32 = vld [vmem:[%s896_s0 + $0x150] sm:$0xff] }
  0x17   :  { %303 = vst [vmem:[%s899_s3 + $0x98] sm:$0xff] %v239_v34  ;;  %v243_v44 = vmax.f32 %v179_v35, 0.0  ;;  %304 = vst [vmem:[%s899_s3 + $0xa0] sm:$0xff] %v240_v39  ;;  %v180_v48 = vadd.f32 %v385_v2, %v109_v42  ;;  %v113_v49 = vmul.f32 %v380_v1, %v42_v36  ;;  %v114_v50 = vmul.f32 %v380_v1, %v43_v37  ;;  %v57_v33 = vld [vmem:[%s896_s0 + $0x158] sm:$0xff]  ;;  %v59_v39 = vld [vmem:[%s896_s0 + $0x168] sm:$0xff] }
  0x18   :  { %305 = vst [vmem:[%s899_s3 + $0xa8] sm:$0xff] %v241_v40  ;;  %306 = vst [vmem:[%s899_s3 + $0xb0] sm:$0xff] %v242_v41  ;;  %v115_v51 = vmul.f32 %v380_v1, %v44_v38  ;;  %v181_v52 = vadd.f32 %v385_v2, %v110_v45  ;;  %v182_v53 = vadd.f32 %v385_v2, %v111_v46  ;;  %v58_v38 = vld [vmem:[%s896_s0 + $0x160] sm:$0xff]  ;;  %v60_v40 = vld [vmem:[%s896_s0 + $0x170] sm:$0xff] }
  0x19   :  { %307 = vst [vmem:[%s899_s3 + $0xb8] sm:$0xff] %v243_v44  ;;  %v183_v54 = vadd.f32 %v385_v2, %v112_v47  ;;  %v116_v55 = vmul.f32 %v380_v1, %v45_v43  ;;  %v244_v57 = vmax.f32 %v180_v48, 0.0  ;;  %v184_v58 = vadd.f32 %v385_v2, %v113_v49  ;;  %v61_v45 = vld [vmem:[%s896_s0 + $0x178] sm:$0xff] }
  0x1a   :  { %v185_v59 = vadd.f32 %v385_v2, %v114_v50  ;;  %v186_v60 = vadd.f32 %v385_v2, %v115_v51  ;;  %v245_v0 = vmax.f32 %v181_v52, 0.0  ;;  %v246_v3 = vmax.f32 %v182_v53, 0.0 }
  0x1b   :  { %v247_v4 = vmax.f32 %v183_v54, 0.0  ;;  %v187_v5 = vadd.f32 %v385_v2, %v116_v55  ;;  %308 = vst [vmem:[%s899_s3 + $0xc0] sm:$0xff] %v244_v57  ;;  %v248_v9 = vmax.f32 %v184_v58, 0.0  ;;  %v117_v12 = vmul.f32 %v380_v1, %v46_v56  ;;  %v62_v58 = vld [vmem:[%s896_s0 + $0x180] sm:$0xff] }
  0x1c   :  { %v249_v10 = vmax.f32 %v185_v59, 0.0  ;;  %v250_v11 = vmax.f32 %v186_v60, 0.0  ;;  %309 = vst [vmem:[%s899_s3 + $0xc8] sm:$0xff] %v245_v0  ;;  %310 = vst [vmem:[%s899_s3 + $0xd0] sm:$0xff] %v246_v3  ;;  %v118_v15 = vmul.f32 %v380_v1, %v47_v61  ;;  %v119_v16 = vmul.f32 %v380_v1, %v48_v62  ;;  %v64_v0 = vld [vmem:[%s896_s0 + $0x190] sm:$0xff]  ;;  %v65_v3 = vld [vmem:[%s896_s0 + $0x198] sm:$0xff] }
  0x1d   :  { %311 = vst [vmem:[%s899_s3 + $0xd8] sm:$0xff] %v247_v4  ;;  %v251_v14 = vmax.f32 %v187_v5, 0.0  ;;  %v120_v17 = vmul.f32 %v380_v1, %v49_v63  ;;  %312 = vst [vmem:[%s899_s3 + $0xe0] sm:$0xff] %v248_v9  ;;  %v188_v18 = vadd.f32 %v385_v2, %v117_v12  ;;  %v121_v19 = vmul.f32 %v380_v1, %v50_v6  ;;  %v63_v63 = vld [vmem:[%s896_s0 + $0x188] sm:$0xff] }
  0x1e   :  { %313 = vst [vmem:[%s899_s3 + $0xe8] sm:$0xff] %v249_v10  ;;  %314 = vst [vmem:[%s899_s3 + $0xf0] sm:$0xff] %v250_v11  ;;  %v122_v20 = vmul.f32 %v380_v1, %v51_v7  ;;  %v123_v21 = vmul.f32 %v380_v1, %v52_v8  ;;  %v189_v22 = vadd.f32 %v385_v2, %v118_v15  ;;  %v66_v8 = vld [vmem:[%s896_s0 + $0x1a0] sm:$0xff]  ;;  %v67_v9 = vld [vmem:[%s896_s0 + $0x1a8] sm:$0xff] }
  0x1f   :  { %315 = vst [vmem:[%s899_s3 + $0xf8] sm:$0xff] %v251_v14  ;;  %v190_v23 = vadd.f32 %v385_v2, %v119_v16  ;;  %v191_v24 = vadd.f32 %v385_v2, %v120_v17  ;;  %v124_v25 = vmul.f32 %v380_v1, %v53_v13  ;;  %v252_v27 = vmax.f32 %v188_v18, 0.0  ;;  %v68_v10 = vld [vmem:[%s896_s0 + $0x1b0] sm:$0xff]  ;;  %v69_v15 = vld [vmem:[%s896_s0 + $0x1b8] sm:$0xff] }
  0x20   :  { %v192_v28 = vadd.f32 %v385_v2, %v121_v19  ;;  %v193_v29 = vadd.f32 %v385_v2, %v122_v20  ;;  %v194_v30 = vadd.f32 %v385_v2, %v123_v21  ;;  %v253_v34 = vmax.f32 %v189_v22, 0.0 }
  0x21   :  { %v254_v35 = vmax.f32 %v190_v23, 0.0  ;;  %v255_v36 = vmax.f32 %v191_v24, 0.0  ;;  %v195_v37 = vadd.f32 %v385_v2, %v124_v25  ;;  %316 = vst [vmem:[%s899_s3 + $0x100] sm:$0xff] %v252_v27  ;;  %v125_v44 = vmul.f32 %v380_v1, %v54_v26 }
  0x22   :  { %v256_v41 = vmax.f32 %v192_v28, 0.0  ;;  %v257_v42 = vmax.f32 %v193_v29, 0.0  ;;  %v258_v43 = vmax.f32 %v194_v30, 0.0  ;;  %317 = vst [vmem:[%s899_s3 + $0x108] sm:$0xff] %v253_v34  ;;  %v126_v47 = vmul.f32 %v380_v1, %v55_v31  ;;  %v70_v28 = vld [vmem:[%s896_s0 + $0x1c0] sm:$0xff]  ;;  %v72_v34 = vld [vmem:[%s896_s0 + $0x1d0] sm:$0xff] }
  0x23   :  { %318 = vst [vmem:[%s899_s3 + $0x110] sm:$0xff] %v254_v35  ;;  %319 = vst [vmem:[%s899_s3 + $0x118] sm:$0xff] %v255_v36  ;;  %v259_v46 = vmax.f32 %v195_v37, 0.0  ;;  %v127_v48 = vmul.f32 %v380_v1, %v56_v32  ;;  %v128_v49 = vmul.f32 %v380_v1, %v57_v33  ;;  %v196_v50 = vadd.f32 %v385_v2, %v125_v44  ;;  %v71_v33 = vld [vmem:[%s896_s0 + $0x1c8] sm:$0xff]  ;;  %v73_v35 = vld [vmem:[%s896_s0 + $0x1d8] sm:$0xff] }
  0x24   :  { %320 = vst [vmem:[%s899_s3 + $0x120] sm:$0xff] %v256_v41  ;;  %321 = vst [vmem:[%s899_s3 + $0x128] sm:$0xff] %v257_v42  ;;  %v129_v51 = vmul.f32 %v380_v1, %v58_v38  ;;  %v130_v52 = vmul.f32 %v380_v1, %v59_v39  ;;  %v131_v53 = vmul.f32 %v380_v1, %v60_v40  ;;  %v74_v40 = vld [vmem:[%s896_s0 + $0x1e0] sm:$0xff]  ;;  %v75_v41 = vld [vmem:[%s896_s0 + $0x1e8] sm:$0xff] }
  0x25   :  { %322 = vst [vmem:[%s899_s3 + $0x130] sm:$0xff] %v258_v43  ;;  %323 = vst [vmem:[%s899_s3 + $0x138] sm:$0xff] %v259_v46  ;;  %v197_v54 = vadd.f32 %v385_v2, %v126_v47  ;;  %v198_v55 = vadd.f32 %v385_v2, %v127_v48  ;;  %v199_v56 = vadd.f32 %v385_v2, %v128_v49  ;;  %v260_v59 = vmax.f32 %v196_v50, 0.0  ;;  %v76_v42 = vld [vmem:[%s896_s0 + $0x1f0] sm:$0xff]  ;;  %v77_v47 = vld [vmem:[%s896_s0 + $0x1f8] sm:$0xff] }
  0x26   :  { %v132_v57 = vmul.f32 %v380_v1, %v61_v45  ;;  %v200_v60 = vadd.f32 %v385_v2, %v129_v51  ;;  %v201_v61 = vadd.f32 %v385_v2, %v130_v52  ;;  %v202_v62 = vadd.f32 %v385_v2, %v131_v53 }
  0x27   :  { %v261_v4 = vmax.f32 %v197_v54, 0.0  ;;  %v262_v5 = vmax.f32 %v198_v55, 0.0  ;;  %v263_v6 = vmax.f32 %v199_v56, 0.0  ;;  %324 = vst [vmem:[%s899_s3 + $0x140] sm:$0xff] %v260_v59  ;;  %v133_v14 = vmul.f32 %v380_v1, %v62_v58 }
  0x28   :  { %v203_v7 = vadd.f32 %v385_v2, %v132_v57  ;;  %v264_v11 = vmax.f32 %v200_v60, 0.0  ;;  %v265_v12 = vmax.f32 %v201_v61, 0.0  ;;  %v266_v13 = vmax.f32 %v202_v62, 0.0 }
  0x29   :  { %325 = vst [vmem:[%s899_s3 + $0x148] sm:$0xff] %v261_v4  ;;  %326 = vst [vmem:[%s899_s3 + $0x150] sm:$0xff] %v262_v5  ;;  %v134_v17 = vmul.f32 %v380_v1, %v63_v63  ;;  %v135_v18 = vmul.f32 %v380_v1, %v64_v0  ;;  %v136_v19 = vmul.f32 %v380_v1, %v65_v3 }
  0x2a   :  { %327 = vst [vmem:[%s899_s3 + $0x158] sm:$0xff] %v263_v6  ;;  %v267_v16 = vmax.f32 %v203_v7, 0.0  ;;  %328 = vst [vmem:[%s899_s3 + $0x160] sm:$0xff] %v264_v11  ;;  %v204_v20 = vadd.f32 %v385_v2, %v133_v14  ;;  %v137_v21 = vmul.f32 %v380_v1, %v66_v8  ;;  %v138_v22 = vmul.f32 %v380_v1, %v67_v9 }
  0x2b   :  { %329 = vst [vmem:[%s899_s3 + $0x168] sm:$0xff] %v265_v12  ;;  %330 = vst [vmem:[%s899_s3 + $0x170] sm:$0xff] %v266_v13  ;;  %v139_v23 = vmul.f32 %v380_v1, %v68_v10  ;;  %v205_v24 = vadd.f32 %v385_v2, %v134_v17  ;;  %v206_v25 = vadd.f32 %v385_v2, %v135_v18 }
  0x2c   :  { %331 = vst [vmem:[%s899_s3 + $0x178] sm:$0xff] %v267_v16  ;;  %v207_v26 = vadd.f32 %v385_v2, %v136_v19  ;;  %v140_v27 = vmul.f32 %v380_v1, %v69_v15  ;;  %v268_v29 = vmax.f32 %v204_v20, 0.0  ;;  %v208_v30 = vadd.f32 %v385_v2, %v137_v21 }
  0x2d   :  { %v209_v31 = vadd.f32 %v385_v2, %v138_v22  ;;  %v210_v32 = vadd.f32 %v385_v2, %v139_v23  ;;  %v269_v36 = vmax.f32 %v205_v24, 0.0  ;;  %v270_v37 = vmax.f32 %v206_v25, 0.0 }
  0x2e   :  { %v271_v38 = vmax.f32 %v207_v26, 0.0  ;;  %v211_v39 = vadd.f32 %v385_v2, %v140_v27  ;;  %332 = vst [vmem:[%s899_s3 + $0x180] sm:$0xff] %v268_v29  ;;  %v272_v43 = vmax.f32 %v208_v30, 0.0  ;;  %v141_v46 = vmul.f32 %v380_v1, %v70_v28 }
  0x2f   :  { %v273_v44 = vmax.f32 %v209_v31, 0.0  ;;  %v274_v45 = vmax.f32 %v210_v32, 0.0  ;;  %333 = vst [vmem:[%s899_s3 + $0x188] sm:$0xff] %v269_v36  ;;  %334 = vst [vmem:[%s899_s3 + $0x190] sm:$0xff] %v270_v37  ;;  %v142_v49 = vmul.f32 %v380_v1, %v71_v33  ;;  %v143_v50 = vmul.f32 %v380_v1, %v72_v34 }
  0x30   :  { %335 = vst [vmem:[%s899_s3 + $0x198] sm:$0xff] %v271_v38  ;;  %v275_v48 = vmax.f32 %v211_v39, 0.0  ;;  %v144_v51 = vmul.f32 %v380_v1, %v73_v35  ;;  %336 = vst [vmem:[%s899_s3 + $0x1a0] sm:$0xff] %v272_v43  ;;  %v212_v52 = vadd.f32 %v385_v2, %v141_v46  ;;  %v145_v53 = vmul.f32 %v380_v1, %v74_v40 }
  0x31   :  { %337 = vst [vmem:[%s899_s3 + $0x1a8] sm:$0xff] %v273_v44  ;;  %338 = vst [vmem:[%s899_s3 + $0x1b0] sm:$0xff] %v274_v45  ;;  %v146_v54 = vmul.f32 %v380_v1, %v75_v41  ;;  %v147_v55 = vmul.f32 %v380_v1, %v76_v42  ;;  %v213_v56 = vadd.f32 %v385_v2, %v142_v49 }
  0x32   :  { %339 = vst [vmem:[%s899_s3 + $0x1b8] sm:$0xff] %v275_v48  ;;  %v214_v57 = vadd.f32 %v385_v2, %v143_v50  ;;  %v215_v58 = vadd.f32 %v385_v2, %v144_v51  ;;  %v148_v59 = vmul.f32 %v380_v1, %v77_v47  ;;  %v276_v60 = vmax.f32 %v212_v52, 0.0 }
  0x33   :  { %v216_v61 = vadd.f32 %v385_v2, %v145_v53  ;;  %v217_v62 = vadd.f32 %v385_v2, %v146_v54  ;;  %v218_v63 = vadd.f32 %v385_v2, %v147_v55  ;;  %v277_v0 = vmax.f32 %v213_v56, 0.0 }
  0x34   :  { %v278_v3 = vmax.f32 %v214_v57, 0.0  ;;  %v279_v4 = vmax.f32 %v215_v58, 0.0  ;;  %v219_v5 = vadd.f32 %v385_v2, %v148_v59  ;;  %340 = vst [vmem:[%s899_s3 + $0x1c0] sm:$0xff] %v276_v60 }
  0x35   :  { %v280_v6 = vmax.f32 %v216_v61, 0.0  ;;  %v281_v7 = vmax.f32 %v217_v62, 0.0  ;;  %v282_v8 = vmax.f32 %v218_v63, 0.0  ;;  %341 = vst [vmem:[%s899_s3 + $0x1c8] sm:$0xff] %v277_v0 }
  0x36   :  { %342 = vst [vmem:[%s899_s3 + $0x1d0] sm:$0xff] %v278_v3  ;;  %343 = vst [vmem:[%s899_s3 + $0x1d8] sm:$0xff] %v279_v4  ;;  %v283_v1 = vmax.f32 %v219_v5, 0.0 }
  0x37   :  { %344 = vst [vmem:[%s899_s3 + $0x1e0] sm:$0xff] %v280_v6  ;;  %345 = vst [vmem:[%s899_s3 + $0x1e8] sm:$0xff] %v281_v7 }
  0x38   :  { %346 = vst [vmem:[%s899_s3 + $0x1f0] sm:$0xff] %v282_v8  ;;  %347 = vst [vmem:[%s899_s3 + $0x1f8] sm:$0xff] %v283_v1 }

// kernel: double_conv.5
= control target key start
LH: loop header
LB: loop body
LE: loop exit
PB: predicated region body
PF: predicated region fallthrough
CT: control target
= control target key end

     0   :  { %s1375_s0 = inlined_call_operand.vmem [shape: f32[512,128], index: 0, kind: input, shape index: {}]   ;;  %s1376_s1 = inlined_call_operand.vmem [shape: f32[1,128], index: 1, kind: input, shape index: {}]   ;;  %s1377_s2 = inlined_call_operand.vmem [shape: f32[1,128], index: 2, kind: input, shape index: {}]   ;;  %s1378_s3 = inlined_call_operand.vmem [shape: bf16[512,128], index: 3, kind: output, shape index: {}]  }
   0x1   :  { %v14_v0 = vld [vmem:[%s1375_s0] sm:$0xff]  ;;  %v15_v1 = vld [vmem:[%s1375_s0 + $0x8] sm:$0xff]  ;;  %v16_v6 = vld [vmem:[%s1375_s0 + $0x10] sm:$0xff] }
   0x2   :  { %v958_v2 = vld [vmem:[%s1376_s1] ss:$0 sm:$0xff]  ;;  %v17_v7 = vld [vmem:[%s1375_s0 + $0x18] sm:$0xff]  ;;  %v19_v11 = vld [vmem:[%s1375_s0 + $0x28] sm:$0xff] }
   0x3   :  { %v85_v3 = vmul.f32 %v958_v2, %v14_v0  ;;  %v86_v4 = vmul.f32 %v958_v2, %v15_v1  ;;  %v965_v5 = vld [vmem:[%s1377_s2] ss:$0 sm:$0xff]  ;;  %v87_v8 = vmul.f32 %v958_v2, %v16_v6  ;;  %v88_v9 = vmul.f32 %v958_v2, %v17_v7  ;;  %v20_v12 = vld [vmem:[%s1375_s0 + $0x30] sm:$0xff]  ;;  %v21_v17 = vld [vmem:[%s1375_s0 + $0x38] sm:$0xff] }
   0x4   :  { %v18_v10 = vld [vmem:[%s1375_s0 + $0x20] sm:$0xff]  ;;  %v90_v16 = vmul.f32 %v958_v2, %v19_v11  ;;  %v91_v20 = vmul.f32 %v958_v2, %v20_v12  ;;  %v92_v21 = vmul.f32 %v958_v2, %v21_v17  ;;  %v23_v27 = vld [vmem:[%s1375_s0 + $0x48] sm:$0xff]  ;;  %v24_v32 = vld [vmem:[%s1375_s0 + $0x50] sm:$0xff] }
   0x5   :  { %v156_v13 = vadd.f32 %v965_v5, %v85_v3  ;;  %v157_v14 = vadd.f32 %v965_v5, %v86_v4  ;;  %v89_v15 = vmul.f32 %v958_v2, %v18_v10  ;;  %v158_v18 = vadd.f32 %v965_v5, %v87_v8  ;;  %v22_v22 = vld [vmem:[%s1375_s0 + $0x40] sm:$0xff]  ;;  %v25_v33 = vld [vmem:[%s1375_s0 + $0x58] sm:$0xff]  ;;  %v27_v39 = vld [vmem:[%s1375_s0 + $0x68] sm:$0xff] }
   0x6   :  { %v159_v19 = vadd.f32 %v965_v5, %v88_v9  ;;  %v161_v26 = vadd.f32 %v965_v5, %v90_v16  ;;  %v162_v30 = vadd.f32 %v965_v5, %v91_v20  ;;  %v163_v31 = vadd.f32 %v965_v5, %v92_v21  ;;  %v26_v38 = vld [vmem:[%s1375_s0 + $0x60] sm:$0xff]  ;;  %v28_v44 = vld [vmem:[%s1375_s0 + $0x70] sm:$0xff]  ;;  %v29_v49 = vld [vmem:[%s1375_s0 + $0x78] sm:$0xff] }
   0x7   :  { %v220_v23 = vmax.f32 %v156_v13, 0.0  ;;  %v221_v24 = vmax.f32 %v157_v14, 0.0  ;;  %v160_v25 = vadd.f32 %v965_v5, %v89_v15  ;;  %v222_v28 = vmax.f32 %v158_v18, 0.0  ;;  %v30_v54 = vld [vmem:[%s1375_s0 + $0x80] sm:$0xff]  ;;  %v31_v63 = vld [vmem:[%s1375_s0 + $0x88] sm:$0xff]  ;;  %v32_v6 = vld [vmem:[%s1375_s0 + $0x90] sm:$0xff] }
   0x8   :  { %v223_v29 = vmax.f32 %v159_v19, 0.0  ;;  %v225_v36 = vmax.f32 %v161_v26, 0.0  ;;  %v93_v37 = vmul.f32 %v958_v2, %v22_v22  ;;  %v226_v41 = vmax.f32 %v162_v30, 0.0  ;;  %v33_v7 = vld [vmem:[%s1375_s0 + $0x98] sm:$0xff]  ;;  %v34_v12 = vld [vmem:[%s1375_s0 + $0xa0] sm:$0xff]  ;;  %v35_v13 = vld [vmem:[%s1375_s0 + $0xa8] sm:$0xff] }
   0x9   :  { %v741_v34 = vpack.c.bf16 %v221_v24, %v220_v23  ;;  %v224_v35 = vmax.f32 %v160_v25, 0.0  ;;  %v227_v42 = vmax.f32 %v163_v31, 0.0  ;;  %v94_v43 = vmul.f32 %v958_v2, %v23_v27  ;;  %v36_v18 = vld [vmem:[%s1375_s0 + $0xb0] sm:$0xff]  ;;  %v37_v23 = vld [vmem:[%s1375_s0 + $0xb8] sm:$0xff] }
   0xa   :  { %v746_v40 = vpack.c.bf16 %v223_v29, %v222_v28  ;;  %v164_v46 = vadd.f32 %v965_v5, %v93_v37  ;;  %v95_v47 = vmul.f32 %v958_v2, %v24_v32  ;;  %v96_v48 = vmul.f32 %v958_v2, %v25_v33  ;;  %v38_v28 = vld [vmem:[%s1375_s0 + $0xc0] sm:$0xff]  ;;  %v39_v37 = vld [vmem:[%s1375_s0 + $0xc8] sm:$0xff] }
   0xb   :  { %742 = vst [vmem:[%s1378_s3] sm:$0xff] %v741_v34   ;;  %v751_v45 = vpack.c.bf16 %v225_v36, %v224_v35  ;;  %v756_v50 = vpack.c.bf16 %v227_v42, %v226_v41  ;;  %v165_v51 = vadd.f32 %v965_v5, %v94_v43  ;;  %v97_v52 = vmul.f32 %v958_v2, %v26_v38  ;;  %v40_v42 = vld [vmem:[%s1375_s0 + $0xd0] sm:$0xff]  ;;  %v41_v43 = vld [vmem:[%s1375_s0 + $0xd8] sm:$0xff] }
   0xc   :  { %898 = vst [vmem:[%s1378_s3 + $0x8] sm:$0xff] %v746_v40   ;;  %v98_v53 = vmul.f32 %v958_v2, %v27_v39  ;;  %v228_v55 = vmax.f32 %v164_v46, 0.0  ;;  %v166_v56 = vadd.f32 %v965_v5, %v95_v47  ;;  %v167_v57 = vadd.f32 %v965_v5, %v96_v48  ;;  %v42_v48 = vld [vmem:[%s1375_s0 + $0xe0] sm:$0xff] }
   0xd   :  { %899 = vst [vmem:[%s1378_s3 + $0x10] sm:$0xff] %v751_v45   ;;  %v99_v58 = vmul.f32 %v958_v2, %v28_v44  ;;  %900 = vst [vmem:[%s1378_s3 + $0x18] sm:$0xff] %v756_v50   ;;  %v229_v59 = vmax.f32 %v165_v51, 0.0  ;;  %v168_v60 = vadd.f32 %v965_v5, %v97_v52  ;;  %v100_v62 = vmul.f32 %v958_v2, %v29_v49  ;;  %v43_v49 = vld [vmem:[%s1375_s0 + $0xe8] sm:$0xff] }
   0xe   :  { %v169_v61 = vadd.f32 %v965_v5, %v98_v53  ;;  %v230_v0 = vmax.f32 %v166_v56, 0.0  ;;  %v231_v1 = vmax.f32 %v167_v57, 0.0  ;;  %v101_v4 = vmul.f32 %v958_v2, %v30_v54  ;;  %v44_v54 = vld [vmem:[%s1375_s0 + $0xf0] sm:$0xff] }
   0xf   :  { %v170_v3 = vadd.f32 %v965_v5, %v99_v58  ;;  %v761_v8 = vpack.c.bf16 %v229_v59, %v228_v55  ;;  %v232_v9 = vmax.f32 %v168_v60, 0.0  ;;  %v171_v11 = vadd.f32 %v965_v5, %v100_v62  ;;  %v45_v59 = vld [vmem:[%s1375_s0 + $0xf8] sm:$0xff] }
  0x10   :  { %v233_v10 = vmax.f32 %v169_v61, 0.0  ;;  %v766_v14 = vpack.c.bf16 %v231_v1, %v230_v0  ;;  %v102_v16 = vmul.f32 %v958_v2, %v31_v63  ;;  %v172_v17 = vadd.f32 %v965_v5, %v101_v4  ;;  %v46_v0 = vld [vmem:[%s1375_s0 + $0x100] sm:$0xff] }
  0x11   :  { %v234_v15 = vmax.f32 %v170_v3, 0.0  ;;  %901 = vst [vmem:[%s1378_s3 + $0x20] sm:$0xff] %v761_v8   ;;  %v235_v20 = vmax.f32 %v171_v11, 0.0  ;;  %v103_v21 = vmul.f32 %v958_v2, %v32_v6  ;;  %v104_v22 = vmul.f32 %v958_v2, %v33_v7  ;;  %v47_v11 = vld [vmem:[%s1375_s0 + $0x108] sm:$0xff] }
  0x12   :  { %v771_v19 = vpack.c.bf16 %v233_v10, %v232_v9  ;;  %902 = vst [vmem:[%s1378_s3 + $0x28] sm:$0xff] %v766_v14   ;;  %v173_v24 = vadd.f32 %v965_v5, %v102_v16  ;;  %v236_v25 = vmax.f32 %v172_v17, 0.0  ;;  %v105_v26 = vmul.f32 %v958_v2, %v34_v12  ;;  %v48_v16 = vld [vmem:[%s1375_s0 + $0x110] sm:$0xff]  ;;  %v49_v17 = vld [vmem:[%s1375_s0 + $0x118] sm:$0xff] }
  0x13   :  { %v106_v27 = vmul.f32 %v958_v2, %v35_v13  ;;  %v776_v29 = vpack.c.bf16 %v235_v20, %v234_v15  ;;  %v174_v30 = vadd.f32 %v965_v5, %v103_v21  ;;  %v175_v31 = vadd.f32 %v965_v5, %v104_v22  ;;  %v50_v22 = vld [vmem:[%s1375_s0 + $0x120] sm:$0xff] }
  0x14   :  { %903 = vst [vmem:[%s1378_s3 + $0x30] sm:$0xff] %v771_v19   ;;  %v107_v32 = vmul.f32 %v958_v2, %v36_v18  ;;  %v237_v33 = vmax.f32 %v173_v24, 0.0  ;;  %v176_v34 = vadd.f32 %v965_v5, %v105_v26  ;;  %v108_v36 = vmul.f32 %v958_v2, %v37_v23  ;;  %v51_v23 = vld [vmem:[%s1375_s0 + $0x128] sm:$0xff] }
  0x15   :  { %v177_v35 = vadd.f32 %v965_v5, %v106_v27  ;;  %904 = vst [vmem:[%s1378_s3 + $0x38] sm:$0xff] %v776_v29   ;;  %v238_v38 = vmax.f32 %v174_v30, 0.0  ;;  %v239_v39 = vmax.f32 %v175_v31, 0.0  ;;  %v109_v41 = vmul.f32 %v958_v2, %v38_v28  ;;  %v52_v28 = vld [vmem:[%s1375_s0 + $0x130] sm:$0xff] }
  0x16   :  { %v178_v40 = vadd.f32 %v965_v5, %v107_v32  ;;  %v781_v44 = vpack.c.bf16 %v237_v33, %v236_v25  ;;  %v240_v45 = vmax.f32 %v176_v34, 0.0  ;;  %v179_v47 = vadd.f32 %v965_v5, %v108_v36  ;;  %v53_v33 = vld [vmem:[%s1375_s0 + $0x138] sm:$0xff] }
  0x17   :  { %v241_v46 = vmax.f32 %v177_v35, 0.0  ;;  %v786_v50 = vpack.c.bf16 %v239_v39, %v238_v38  ;;  %v110_v52 = vmul.f32 %v958_v2, %v39_v37  ;;  %v180_v53 = vadd.f32 %v965_v5, %v109_v41  ;;  %v54_v38 = vld [vmem:[%s1375_s0 + $0x140] sm:$0xff] }
  0x18   :  { %v242_v51 = vmax.f32 %v178_v40, 0.0  ;;  %905 = vst [vmem:[%s1378_s3 + $0x40] sm:$0xff] %v781_v44   ;;  %v243_v56 = vmax.f32 %v179_v47, 0.0  ;;  %v111_v57 = vmul.f32 %v958_v2, %v40_v42  ;;  %v112_v58 = vmul.f32 %v958_v2, %v41_v43  ;;  %v55_v47 = vld [vmem:[%s1375_s0 + $0x148] sm:$0xff] }
  0x19   :  { %v791_v55 = vpack.c.bf16 %v241_v46, %v240_v45  ;;  %906 = vst [vmem:[%s1378_s3 + $0x48] sm:$0xff] %v786_v50   ;;  %v181_v60 = vadd.f32 %v965_v5, %v110_v52  ;;  %v244_v61 = vmax.f32 %v180_v53, 0.0  ;;  %v113_v62 = vmul.f32 %v958_v2, %v42_v48  ;;  %v56_v52 = vld [vmem:[%s1375_s0 + $0x150] sm:$0xff]  ;;  %v57_v53 = vld [vmem:[%s1375_s0 + $0x158] sm:$0xff] }
  0x1a   :  { %v114_v63 = vmul.f32 %v958_v2, %v43_v49  ;;  %v796_v1 = vpack.c.bf16 %v243_v56, %v242_v51  ;;  %v182_v3 = vadd.f32 %v965_v5, %v111_v57  ;;  %v183_v4 = vadd.f32 %v965_v5, %v112_v58  ;;  %v58_v58 = vld [vmem:[%s1375_s0 + $0x160] sm:$0xff] }
  0x1b   :  { %907 = vst [vmem:[%s1378_s3 + $0x50] sm:$0xff] %v791_v55   ;;  %v115_v6 = vmul.f32 %v958_v2, %v44_v54  ;;  %v245_v7 = vmax.f32 %v181_v60, 0.0  ;;  %v184_v8 = vadd.f32 %v965_v5, %v113_v62  ;;  %v116_v10 = vmul.f32 %v958_v2, %v45_v59  ;;  %v59_v59 = vld [vmem:[%s1375_s0 + $0x168] sm:$0xff] }
  0x1c   :  { %v185_v9 = vadd.f32 %v965_v5, %v114_v63  ;;  %908 = vst [vmem:[%s1378_s3 + $0x58] sm:$0xff] %v796_v1   ;;  %v246_v12 = vmax.f32 %v182_v3, 0.0  ;;  %v247_v13 = vmax.f32 %v183_v4, 0.0  ;;  %v117_v15 = vmul.f32 %v958_v2, %v46_v0  ;;  %v60_v0 = vld [vmem:[%s1375_s0 + $0x170] sm:$0xff] }
  0x1d   :  { %v186_v14 = vadd.f32 %v965_v5, %v115_v6  ;;  %v801_v18 = vpack.c.bf16 %v245_v7, %v244_v61  ;;  %v248_v19 = vmax.f32 %v184_v8, 0.0  ;;  %v187_v21 = vadd.f32 %v965_v5, %v116_v10  ;;  %v61_v7 = vld [vmem:[%s1375_s0 + $0x178] sm:$0xff] }
  0x1e   :  { %v249_v20 = vmax.f32 %v185_v9, 0.0  ;;  %v806_v24 = vpack.c.bf16 %v247_v13, %v246_v12  ;;  %v118_v26 = vmul.f32 %v958_v2, %v47_v11  ;;  %v188_v27 = vadd.f32 %v965_v5, %v117_v15  ;;  %v62_v12 = vld [vmem:[%s1375_s0 + $0x180] sm:$0xff] }
  0x1f   :  { %v250_v25 = vmax.f32 %v186_v14, 0.0  ;;  %909 = vst [vmem:[%s1378_s3 + $0x60] sm:$0xff] %v801_v18   ;;  %v251_v30 = vmax.f32 %v187_v21, 0.0  ;;  %v119_v31 = vmul.f32 %v958_v2, %v48_v16  ;;  %v120_v32 = vmul.f32 %v958_v2, %v49_v17  ;;  %v63_v21 = vld [vmem:[%s1375_s0 + $0x188] sm:$0xff] }
  0x20   :  { %v811_v29 = vpack.c.bf16 %v249_v20, %v248_v19  ;;  %910 = vst [vmem:[%s1378_s3 + $0x68] sm:$0xff] %v806_v24   ;;  %v189_v34 = vadd.f32 %v965_v5, %v118_v26  ;;  %v252_v35 = vmax.f32 %v188_v27, 0.0  ;;  %v121_v36 = vmul.f32 %v958_v2, %v50_v22  ;;  %v64_v26 = vld [vmem:[%s1375_s0 + $0x190] sm:$0xff]  ;;  %v65_v27 = vld [vmem:[%s1375_s0 + $0x198] sm:$0xff] }
  0x21   :  { %v122_v37 = vmul.f32 %v958_v2, %v51_v23  ;;  %v816_v39 = vpack.c.bf16 %v251_v30, %v250_v25  ;;  %v190_v40 = vadd.f32 %v965_v5, %v119_v31  ;;  %v191_v41 = vadd.f32 %v965_v5, %v120_v32  ;;  %v66_v32 = vld [vmem:[%s1375_s0 + $0x1a0] sm:$0xff] }
  0x22   :  { %911 = vst [vmem:[%s1378_s3 + $0x70] sm:$0xff] %v811_v29   ;;  %v123_v42 = vmul.f32 %v958_v2, %v52_v28  ;;  %v253_v43 = vmax.f32 %v189_v34, 0.0  ;;  %v192_v44 = vadd.f32 %v965_v5, %v121_v36  ;;  %v124_v46 = vmul.f32 %v958_v2, %v53_v33  ;;  %v67_v33 = vld [vmem:[%s1375_s0 + $0x1a8] sm:$0xff] }
  0x23   :  { %v193_v45 = vadd.f32 %v965_v5, %v122_v37  ;;  %912 = vst [vmem:[%s1378_s3 + $0x78] sm:$0xff] %v816_v39   ;;  %v254_v48 = vmax.f32 %v190_v40, 0.0  ;;  %v255_v49 = vmax.f32 %v191_v41, 0.0  ;;  %v125_v51 = vmul.f32 %v958_v2, %v54_v38  ;;  %v68_v38 = vld [vmem:[%s1375_s0 + $0x1b0] sm:$0xff] }
  0x24   :  { %v194_v50 = vadd.f32 %v965_v5, %v123_v42  ;;  %v821_v54 = vpack.c.bf16 %v253_v43, %v252_v35  ;;  %v256_v55 = vmax.f32 %v192_v44, 0.0  ;;  %v195_v57 = vadd.f32 %v965_v5, %v124_v46  ;;  %v69_v43 = vld [vmem:[%s1375_s0 + $0x1b8] sm:$0xff] }
  0x25   :  { %v257_v56 = vmax.f32 %v193_v45, 0.0  ;;  %v826_v60 = vpack.c.bf16 %v255_v49, %v254_v48  ;;  %v126_v62 = vmul.f32 %v958_v2, %v55_v47  ;;  %v196_v63 = vadd.f32 %v965_v5, %v125_v51  ;;  %v70_v48 = vld [vmem:[%s1375_s0 + $0x1c0] sm:$0xff] }
  0x26   :  { %v258_v61 = vmax.f32 %v194_v50, 0.0  ;;  %913 = vst [vmem:[%s1378_s3 + $0x80] sm:$0xff] %v821_v54   ;;  %v259_v3 = vmax.f32 %v195_v57, 0.0  ;;  %v127_v4 = vmul.f32 %v958_v2, %v56_v52  ;;  %v128_v6 = vmul.f32 %v958_v2, %v57_v53  ;;  %v71_v57 = vld [vmem:[%s1375_s0 + $0x1c8] sm:$0xff] }
  0x27   :  { %v831_v1 = vpack.c.bf16 %v257_v56, %v256_v55  ;;  %914 = vst [vmem:[%s1378_s3 + $0x88] sm:$0xff] %v826_v60   ;;  %v197_v8 = vadd.f32 %v965_v5, %v126_v62  ;;  %v260_v9 = vmax.f32 %v196_v63, 0.0  ;;  %v129_v10 = vmul.f32 %v958_v2, %v58_v58  ;;  %v72_v62 = vld [vmem:[%s1375_s0 + $0x1d0] sm:$0xff]  ;;  %v73_v63 = vld [vmem:[%s1375_s0 + $0x1d8] sm:$0xff] }
  0x28   :  { %v130_v11 = vmul.f32 %v958_v2, %v59_v59  ;;  %v836_v13 = vpack.c.bf16 %v259_v3, %v258_v61  ;;  %v198_v14 = vadd.f32 %v965_v5, %v127_v4  ;;  %v199_v15 = vadd.f32 %v965_v5, %v128_v6  ;;  %v74_v6 = vld [vmem:[%s1375_s0 + $0x1e0] sm:$0xff] }
  0x29   :  { %915 = vst [vmem:[%s1378_s3 + $0x90] sm:$0xff] %v831_v1   ;;  %v131_v16 = vmul.f32 %v958_v2, %v60_v0  ;;  %v261_v17 = vmax.f32 %v197_v8, 0.0  ;;  %v200_v18 = vadd.f32 %v965_v5, %v129_v10  ;;  %v132_v20 = vmul.f32 %v958_v2, %v61_v7  ;;  %v75_v7 = vld [vmem:[%s1375_s0 + $0x1e8] sm:$0xff] }
  0x2a   :  { %v201_v19 = vadd.f32 %v965_v5, %v130_v11  ;;  %916 = vst [vmem:[%s1378_s3 + $0x98] sm:$0xff] %v836_v13   ;;  %v262_v22 = vmax.f32 %v198_v14, 0.0  ;;  %v263_v23 = vmax.f32 %v199_v15, 0.0  ;;  %v133_v25 = vmul.f32 %v958_v2, %v62_v12  ;;  %v76_v12 = vld [vmem:[%s1375_s0 + $0x1f0] sm:$0xff] }
  0x2b   :  { %v202_v24 = vadd.f32 %v965_v5, %v131_v16  ;;  %v841_v28 = vpack.c.bf16 %v261_v17, %v260_v9  ;;  %v264_v29 = vmax.f32 %v200_v18, 0.0  ;;  %v203_v31 = vadd.f32 %v965_v5, %v132_v20  ;;  %v77_v17 = vld [vmem:[%s1375_s0 + $0x1f8] sm:$0xff] }
  0x2c   :  { %v265_v30 = vmax.f32 %v201_v19, 0.0  ;;  %v846_v34 = vpack.c.bf16 %v263_v23, %v262_v22  ;;  %v134_v36 = vmul.f32 %v958_v2, %v63_v21  ;;  %v204_v37 = vadd.f32 %v965_v5, %v133_v25 }
  0x2d   :  { %v266_v35 = vmax.f32 %v202_v24, 0.0  ;;  %917 = vst [vmem:[%s1378_s3 + $0xa0] sm:$0xff] %v841_v28   ;;  %v267_v40 = vmax.f32 %v203_v31, 0.0  ;;  %v135_v41 = vmul.f32 %v958_v2, %v64_v26  ;;  %v136_v42 = vmul.f32 %v958_v2, %v65_v27 }
  0x2e   :  { %v851_v39 = vpack.c.bf16 %v265_v30, %v264_v29  ;;  %918 = vst [vmem:[%s1378_s3 + $0xa8] sm:$0xff] %v846_v34   ;;  %v205_v44 = vadd.f32 %v965_v5, %v134_v36  ;;  %v268_v45 = vmax.f32 %v204_v37, 0.0  ;;  %v137_v46 = vmul.f32 %v958_v2, %v66_v32 }
  0x2f   :  { %v138_v47 = vmul.f32 %v958_v2, %v67_v33  ;;  %v856_v49 = vpack.c.bf16 %v267_v40, %v266_v35  ;;  %v206_v50 = vadd.f32 %v965_v5, %v135_v41  ;;  %v207_v51 = vadd.f32 %v965_v5, %v136_v42 }
  0x30   :  { %919 = vst [vmem:[%s1378_s3 + $0xb0] sm:$0xff] %v851_v39   ;;  %v139_v52 = vmul.f32 %v958_v2, %v68_v38  ;;  %v269_v53 = vmax.f32 %v205_v44, 0.0  ;;  %v208_v54 = vadd.f32 %v965_v5, %v137_v46  ;;  %v140_v56 = vmul.f32 %v958_v2, %v69_v43 }
  0x31   :  { %v209_v55 = vadd.f32 %v965_v5, %v138_v47  ;;  %920 = vst [vmem:[%s1378_s3 + $0xb8] sm:$0xff] %v856_v49   ;;  %v270_v58 = vmax.f32 %v206_v50, 0.0  ;;  %v271_v59 = vmax.f32 %v207_v51, 0.0  ;;  %v141_v61 = vmul.f32 %v958_v2, %v70_v48 }
  0x32   :  { %v210_v60 = vadd.f32 %v965_v5, %v139_v52  ;;  %v861_v0 = vpack.c.bf16 %v269_v53, %v268_v45  ;;  %v272_v1 = vmax.f32 %v208_v54, 0.0  ;;  %v211_v4 = vadd.f32 %v965_v5, %v140_v56 }
  0x33   :  { %v273_v3 = vmax.f32 %v209_v55, 0.0  ;;  %v866_v8 = vpack.c.bf16 %v271_v59, %v270_v58  ;;  %v142_v10 = vmul.f32 %v958_v2, %v71_v57  ;;  %v212_v11 = vadd.f32 %v965_v5, %v141_v61 }
  0x34   :  { %v274_v9 = vmax.f32 %v210_v60, 0.0  ;;  %921 = vst [vmem:[%s1378_s3 + $0xc0] sm:$0xff] %v861_v0   ;;  %v275_v14 = vmax.f32 %v211_v4, 0.0  ;;  %v143_v15 = vmul.f32 %v958_v2, %v72_v62  ;;  %v144_v16 = vmul.f32 %v958_v2, %v73_v63 }
  0x35   :  { %v871_v13 = vpack.c.bf16 %v273_v3, %v272_v1  ;;  %922 = vst [vmem:[%s1378_s3 + $0xc8] sm:$0xff] %v866_v8   ;;  %v213_v18 = vadd.f32 %v965_v5, %v142_v10  ;;  %v276_v19 = vmax.f32 %v212_v11, 0.0  ;;  %v145_v20 = vmul.f32 %v958_v2, %v74_v6 }
  0x36   :  { %v146_v21 = vmul.f32 %v958_v2, %v75_v7  ;;  %v876_v22 = vpack.c.bf16 %v275_v14, %v274_v9  ;;  %v214_v23 = vadd.f32 %v965_v5, %v143_v15  ;;  %v215_v24 = vadd.f32 %v965_v5, %v144_v16 }
  0x37   :  { %923 = vst [vmem:[%s1378_s3 + $0xd0] sm:$0xff] %v871_v13   ;;  %v147_v25 = vmul.f32 %v958_v2, %v76_v12  ;;  %v277_v26 = vmax.f32 %v213_v18, 0.0  ;;  %v216_v27 = vadd.f32 %v965_v5, %v145_v20  ;;  %v148_v29 = vmul.f32 %v958_v2, %v77_v17 }
  0x38   :  { %v217_v28 = vadd.f32 %v965_v5, %v146_v21  ;;  %924 = vst [vmem:[%s1378_s3 + $0xd8] sm:$0xff] %v876_v22   ;;  %v278_v30 = vmax.f32 %v214_v23, 0.0  ;;  %v279_v31 = vmax.f32 %v215_v24, 0.0 }
  0x39   :  { %v218_v32 = vadd.f32 %v965_v5, %v147_v25  ;;  %v881_v33 = vpack.c.bf16 %v277_v26, %v276_v19  ;;  %v280_v34 = vmax.f32 %v216_v27, 0.0  ;;  %v219_v36 = vadd.f32 %v965_v5, %v148_v29 }
  0x3a   :  { %v281_v35 = vmax.f32 %v217_v28, 0.0  ;;  %v886_v37 = vpack.c.bf16 %v279_v31, %v278_v30 }
  0x3b   :  { %v282_v38 = vmax.f32 %v218_v32, 0.0  ;;  %925 = vst [vmem:[%s1378_s3 + $0xe0] sm:$0xff] %v881_v33   ;;  %v283_v39 = vmax.f32 %v219_v36, 0.0 }
  0x3c   :  { %v891_v2 = vpack.c.bf16 %v281_v35, %v280_v34  ;;  %926 = vst [vmem:[%s1378_s3 + $0xe8] sm:$0xff] %v886_v37  }
  0x3d   :  { %v896_v40 = vpack.c.bf16 %v283_v39, %v282_v38 }
  0x3e   :  { %927 = vst [vmem:[%s1378_s3 + $0xf0] sm:$0xff] %v891_v2  }
  0x3f   :  { %928 = vst [vmem:[%s1378_s3 + $0xf8] sm:$0xff] %v896_v40  }

// kernel: double_conv.4
= control target key start
LH: loop header
LB: loop body
LE: loop exit
PB: predicated region body
PF: predicated region fallthrough
CT: control target
= control target key end

     0   :  { %s3680_s15 = smov 0   ;;  %s3682_s16 = smov 0   ;;  %s5142_s0 = inlined_call_operand.vmem [shape: bf16[2,1,18,18,128], index: 0, kind: input, shape index: {}]   ;;  %s5143_s1 = inlined_call_operand.vmem [shape: bf16[1152,128], index: 1, kind: input, shape index: {}]   ;;  %s5144_s2 = inlined_call_operand.vmem [shape: f32[1,128], index: 2, kind: input, shape index: {}]   ;;  %s5145_s3 = inlined_call_operand.vmem [shape: f32[2,16,16,128], index: 3, kind: output, shape index: {0}]   ;;  %s5146_s4 = inlined_call_operand.vmem [shape: f32[2,1,2,128], index: 4, kind: output, shape index: {1}]  }
   0x1   :  { %s3684_s17 = smov 0  }
   0x2 LB: > { %s27_s18 = sadd.s32 1, %s3649_s16  ;;  %p2815_p0 = scmp.ge.s32.totalorder %s3653_s17, 1  ;;  %s3653_s17 = sphi %s3684_s17, %s15_s17   ;;  %s3649_s16 = sphi %s3682_s16, %s5197_s16   ;;  %s3645_s15 = sphi %s3680_s15, %s5196_s15  }
   0x3   : > { %p29_p1 = scmp.ge.s32.totalorder %s27_s18, 2  ;;  %p187_p2 = scmp.lt.s32.totalorder %s3653_s17, 3 }
   0x5   : > { %s5199_s18 = smov (%p29_p1, %s27_s18), 0  ;;  %p188_p3 = pnand %p2815_p0, %p187_p2 }
   0x7   : > { %191 = sbr.rel (%p188_p3) target bundleno = 554 (0x22a), region = 32 }
   0xc   : > { %v3529_v0 = vld [vmem:[%s5143_s1 + $0x78] sm:$0xff]   ;;  %p229_p4 = scmp.lt.s32.totalorder %s3645_s15, 1  ;;  %v3531_v2 = vld [vmem:[%s5143_s1 + $0x70] sm:$0xff]   ;;  %v3533_v4 = vld [vmem:[%s5143_s1 + $0x68] sm:$0xff]   ;;  %vm311_vm0 = vsmask.f32 3328 }
   0xd   : > { %v3530_v1 = vld [vmem:[%s5143_s1 + $0x38] sm:$0xff]   ;;  %2968 = vmatprep.subr.bf16.mxu0 %v3529_v0  ;;  %3488 = vmatprep.subr.bf16.mxu1 %v3529_v0  ;;  %v3532_v3 = vld [vmem:[%s5143_s1 + $0x30] sm:$0xff]   ;;  %v3534_v5 = vld [vmem:[%s5143_s1 + $0x28] sm:$0xff]   ;;  %vm312_vm1 = vsmask.f32 7440  ;;  %vm746_vm3 = vcmask 1042432  }
   0xe   : > { %2969 = vmatpush3.bf16.msra.mxu0 %v3530_v1  ;;  %3496 = vmatpush3.bf16.msra.mxu1 %v3530_v1  ;;  %s5201_s15 = smov (!%p229_p4, %s3645_s15), 1  ;;  %v3535_v6 = vld [vmem:[%s5143_s1 + $0x60] sm:$0xff]   ;;  %v3537_v8 = vld [vmem:[%s5143_s1 + $0x58] sm:$0xff]   ;;  %v3539_v10 = vld [vmem:[%s5143_s1 + $0x50] sm:$0xff]   ;;  %vm747_vm4 = vcmask 1046532   ;;  %vm2671_vm6 = vcmask 1040384  }
   0xf   : > { %2970 = vmatprep.subr.bf16.mxu0 %v3531_v2  ;;  %3489 = vmatprep.subr.bf16.mxu1 %v3531_v2  ;;  %s3504_s7 = smul.u32 216, %s5201_s15  ;;  %v3536_v7 = vld [vmem:[%s5143_s1 + $0x20] sm:$0xff]   ;;  %v3538_v9 = vld [vmem:[%s5143_s1 + $0x18] sm:$0xff]   ;;  %v3540_v16 = vld [vmem:[%s5143_s1 + $0x10] sm:$0xff]   ;;  %s2819_s24 = sshll.u32 %s5201_s15, 1 }
  0x10   : > { %v3541_v21 = vld [vmem:[%s5143_s1 + $0x48] sm:$0xff]   ;;  %v3543_v36 = vld [vmem:[%s5143_s1 + $0x40] sm:$0xff]   ;;  %vm3776_vm2 = vmor %vm311_vm0, %vm312_vm1  ;;  %s255_s27 = scalar_lea.vmem %s5146_s4, %s2819_s24 }
  0x11   : > { %s3731_s14 = scalar_lea.vmem %s5142_s0, %s3504_s7  ;;  %v3542_v31 = vld [vmem:[%s5143_s1 + $0x8] sm:$0xff]   ;;  %v3544_v50 = vld [vmem:[%s5143_s1] sm:$0xff]   ;;  %v3547_v57 = vld [vmem:[%s5143_s1 + $0xf8] sm:$0xff]  }
  0x12   : > { %2971 = vmatpush3.bf16.msra.mxu0 %v3532_v3  ;;  %3497 = vmatpush3.bf16.msra.mxu1 %v3532_v3  ;;  %v3740_v11 = vld [vmem:[%s3731_s14] sm:$0xf]  ;;  %v3743_v12 = vld [vmem:[%s3731_s14 + $0x4] sm:$0xf]  ;;  %v3746_v13 = vld [vmem:[%s3731_s14 + $0x8] sm:$0x1] }
  0x13   : > { %2972 = vmatprep.subr.bf16.mxu0 %v3533_v4  ;;  %3490 = vmatprep.subr.bf16.mxu1 %v3533_v4  ;;  %v315_v14 = vshrl.u32 %v3740_v11, 16  ;;  %v318_v15 = vshll.u32 %v3740_v11, 16  ;;  %v324_v17 = vshll.u32 %v3743_v12, 16  ;;  %v328_v18 = vshrl.u32 %v3743_v12, 16  ;;  %v3757_v20 = vld [vmem:[%s3731_s14 + $0x90] sm:$0xf]  ;;  %vm3969_vm5 = vmor %vm746_vm3, %vm747_vm4 }
  0x14   : > { %v334_v19 = vshll.u32 %v3746_v13, 16  ;;  %v2820_v24 = vrot.slane %v3740_v11, 9  ;;  %v294_v25 = vld [vmem:[%s3731_s14 + $0x94] sm:$0xf]  ;;  %v751_v28 = vrot.slane %v3743_v12, 5  ;;  %v603_v30 = vshrl.u32 %v3757_v20, 16 }
  0x15   : > { %v317_v22 = vrot.slane %v315_v14, 4  ;;  %v320_v23 = vrot.slane %v318_v15, 5  ;;  %v326_v26 = vrot.slane %v324_v17, 5  ;;  %v330_v27 = vrot.slane %v328_v18, 4  ;;  %v295_v29 = vld [vmem:[%s3731_s14 + $0x98] sm:$0x1] }
  0x16   : > { %2973 = vmatpush3.bf16.msra.mxu0 %v3534_v5  ;;  %3498 = vmatpush3.bf16.msra.mxu1 %v3534_v5  ;;  %v336_v33 = vrot.slane %v334_v19, 5  ;;  %v606_v34 = vshll.u32 %v3757_v20, 16  ;;  %v612_v35 = vshll.u32 %v294_v25, 16  ;;  %v605_v39 = vrot.slane %v603_v30, 4  ;;  %v3548_v60 = vld [vmem:[%s5143_s1 + $0x178] sm:$0xff]  }
  0x17   : > { %2974 = vmatprep.subr.bf16.mxu0 %v3535_v6  ;;  %3491 = vmatprep.subr.bf16.mxu1 %v3535_v6  ;;  %v321_v32 = vor.u32 %v320_v23, %v317_v22  ;;  %v331_v38 = vor.u32 %v330_v27, %v326_v26  ;;  %v616_v40 = vshrl.u32 %v294_v25, 16  ;;  %v622_v41 = vshll.u32 %v295_v29, 16  ;;  %v3801_v61 = vld [vmem:[%s3731_s14 + $0xc] sm:$0xf]  ;;  %v3804_v62 = vld [vmem:[%s3731_s14 + $0x10] sm:$0xf] }
  0x18   : > { %v754_v43 = vrot.slane %v3746_v13, 5  ;;  %v608_v44 = vrot.slane %v606_v34, 5  ;;  %v614_v45 = vrot.slane %v612_v35, 5  ;;  %v3783_v47 = vrot.slane %v751_v28, 4  ;;  %v3549_v0 = vld [vmem:[%s5143_s1 + $0xb8] sm:$0xff]   ;;  %v3555_v35 = vld [vmem:[%s5143_s1 + $0xe8] sm:$0xff]  }
  0x19   : > { %v322_v42 = vrot.slane %v321_v32, 4  ;;  %v332_v46 = vrot.slane %v331_v38, 4  ;;  %v618_v48 = vrot.slane %v616_v40, 4  ;;  %v624_v49 = vrot.slane %v622_v41, 5  ;;  %v3550_v1 = vld [vmem:[%s5143_s1 + $0x138] sm:$0xff]   ;;  %v3579_v13 = vld [vmem:[%s5143_s1 + $0x120] sm:$0xff]  }
  0x1a   : > { %2975 = vmatpush3.bf16.msra.mxu0 %v3536_v7  ;;  %3499 = vmatpush3.bf16.msra.mxu1 %v3536_v7  ;;  %v609_v52 = vor.u32 %v608_v44, %v605_v39  ;;  %v2838_v59 = vcombine.low %v3740_v11, %v3743_v12  ;;  %v3815_v2 = vld [vmem:[%s3731_s14 + $0x14] sm:$0x1]  ;;  %v339_v3 = vshrl.u32 %v3801_v61, 16  ;;  %v342_v4 = vshll.u32 %v3801_v61, 16  ;;  %v297_v14 = vld [vmem:[%s3731_s14 + $0xa0] sm:$0xf] }
  0x1b   : > { %2976 = vmatprep.subr.bf16.mxu0 %v3537_v8  ;;  %3492 = vmatprep.subr.bf16.mxu1 %v3537_v8  ;;  %v327_v51 = vsel %vm3776_vm2, %v322_v42, %v326_v26  ;;  %v337_v53 = vsel %vm3776_vm2, %v332_v46, %v336_v33  ;;  %v619_v54 = vor.u32 %v618_v48, %v614_v45  ;;  %v348_v5 = vshll.u32 %v3804_v62, 16  ;;  %v3552_v26 = vld [vmem:[%s5143_s1 + $0xb0] sm:$0xff]  }
  0x1c   : > { %v2854_v55 = vcombine.low %v327_v51, %v337_v53  ;;  %v610_v56 = vrot.slane %v609_v52, 4  ;;  %v3823_v7 = vcombine.low %v3757_v20, %v294_v25  ;;  %v352_v8 = vshrl.u32 %v3804_v62, 16  ;;  %v3558_v44 = vld [vmem:[%s5143_s1 + $0x170] sm:$0xff]   ;;  %v3556_v51 = vld [vmem:[%s5143_s1 + $0xa8] sm:$0xff]  }
  0x1d   : > { %v620_v58 = vrot.slane %v619_v54, 4  ;;  %v341_v17 = vrot.slane %v339_v3, 4  ;;  %v344_v18 = vrot.slane %v342_v4, 5  ;;  %v350_v19 = vrot.slane %v348_v5, 5  ;;  %v3560_v54 = vld [vmem:[%s5143_s1 + $0x130] sm:$0xff]  }
  0x1e   : > { %2977 = vmatpush3.bf16.msra.mxu0 %v3538_v9  ;;  %3500 = vmatpush3.bf16.msra.mxu1 %v3538_v9  ;;  %v615_v63 = vsel %vm3776_vm2, %v610_v56, %v614_v45  ;;  %v358_v9 = vshll.u32 %v3815_v2, 16  ;;  %v354_v20 = vrot.slane %v352_v8, 4  ;;  %v636_v29 = vshll.u32 %v297_v14, 16  ;;  %v3866_v56 = vld [vmem:[%s3731_s14 + $0x1c] sm:$0xf] }
  0x1f   : > { %2978 = vmatprep.subr.bf16.mxu0 %v3539_v10  ;;  %3493 = vmatprep.subr.bf16.mxu1 %v3539_v10  ;;  %v625_v6 = vsel %vm3776_vm2, %v620_v58, %v624_v49  ;;  %v296_v10 = vld [vmem:[%s3731_s14 + $0x9c] sm:$0xf]  ;;  %v345_v27 = vor.u32 %v344_v18, %v341_v17  ;;  %v640_v30 = vshrl.u32 %v297_v14, 16  ;;  %v3557_v58 = vld [vmem:[%s5143_s1 + $0xe0] sm:$0xff]   ;;  %v376_v4 = vshrl.u32 %v3866_v56, 16 }
  0x20   : > { %1760 = vmatprep.mubr.bf16.mxu0 %v2854_v55  ;;  %v3829_v15 = vcombine.low %v615_v63, %v625_v6  ;;  %v360_v22 = vrot.slane %v358_v9, 5  ;;  %v627_v23 = vshrl.u32 %v296_v10, 16  ;;  %v630_v25 = vshll.u32 %v296_v10, 16  ;;  %v3863_v55 = vld [vmem:[%s3731_s14 + $0x18] sm:$0xf] }
  0x21   : > { %v355_v32 = vor.u32 %v354_v20, %v350_v19  ;;  %v638_v38 = vrot.slane %v636_v29, 5  ;;  %v642_v39 = vrot.slane %v640_v30, 4  ;;  %v366_v63 = vshll.u32 %v3863_v55, 16  ;;  %v299_v6 = vld [vmem:[%s3731_s14 + $0xa8] sm:$0xf]  ;;  %v3563_v29 = vld [vmem:[%s5143_s1 + $0xd8] sm:$0xff]  }
  0x22   : > { %2979 = vmatpush3.bf16.msra.mxu0 %v3540_v16  ;;  %3501 = vmatpush3.bf16.msra.mxu1 %v3540_v16  ;;  %5160 = vst [vmem:[#allocation2_spill] sm:$0xff] %v3829_v15  ;;  %v3551_v16 = vld [vmem:[%s5143_s1 + $0xf0] sm:$0xff]   ;;  %v629_v33 = vrot.slane %v627_v23, 4  ;;  %v632_v34 = vrot.slane %v630_v25, 5  ;;  %v3882_v3 = vcombine.low %v296_v10, %v297_v14  ;;  %v300_v8 = vld [vmem:[%s3731_s14 + $0xac] sm:$0xf] }
  0x23   : > { %2980 = vmatprep.subr.bf16.mxu0 %v3541_v21  ;;  %3494 = vmatprep.subr.bf16.mxu1 %v3541_v21  ;;  %v298_v21 = vld [vmem:[%s3731_s14 + $0xa4] sm:$0x1]  ;;  %v356_v41 = vrot.slane %v355_v32, 4  ;;  %v643_v46 = vor.u32 %v642_v39, %v638_v38  ;;  %v368_v18 = vrot.slane %v366_v63, 5  ;;  %v301_v10 = vld [vmem:[%s3731_s14 + $0xb0] sm:$0x1] }
  0x24   : > { %1856 = vmatprep.mubr.bf16.mxu1 %v3829_v15  ;;  %v633_v42 = vor.u32 %v632_v34, %v629_v33  ;;  %v378_v14 = vrot.slane %v376_v4, 4  ;;  %v651_v20 = vshrl.u32 %v299_v6, 16  ;;  %v660_v25 = vshll.u32 %v300_v8, 16  ;;  %v3564_v33 = vld [vmem:[%s5143_s1 + $0x98] sm:$0xff]   ;;  %v4310_v15 = vld [vmem:[%s3731_s14 + $0x8c] sm:$0x1] }
  0x25   : > { %v361_v48 = vsel %vm3776_vm2, %v356_v41, %v360_v22  ;;  %v644_v53 = vrot.slane %v643_v46, 4  ;;  %v654_v22 = vshll.u32 %v299_v6, 16  ;;  %v3912_v46 = vcombine.low %v299_v6, %v300_v8  ;;  %v3570_v6 = vld [vmem:[%s5143_s1 + $0x168] sm:$0xff]  }
  0x26   : > { %2981 = vmatpush3.bf16.msra.mxu0 %v3542_v31  ;;  %3502 = vmatpush3.bf16.msra.mxu1 %v3542_v31  ;;  %v646_v31 = vshll.u32 %v298_v21, 16  ;;  %v634_v49 = vrot.slane %v633_v42, 4 }
  0x27   : > { %2982 = vmatprep.subr.bf16.mxu0 %v3543_v36  ;;  %3495 = vmatprep.subr.bf16.mxu1 %v3543_v36  ;;  %v346_v36 = vrot.slane %v345_v27, 4  ;;  %v670_v27 = vshll.u32 %v301_v10, 16  ;;  %v656_v32 = vrot.slane %v654_v22, 5  ;;  %v3569_v10 = vld [vmem:[%s5143_s1 + $0xc8] sm:$0xff]   ;;  %v304_v22 = vld [vmem:[%s3731_s14 + $0xbc] sm:$0x1] }
  0x28   : > { %v648_v40 = vrot.slane %v646_v31, 5  ;;  %v653_v31 = vrot.slane %v651_v20, 4 }
  0x29   : > { %v351_v45 = vsel %vm3776_vm2, %v346_v36, %v350_v19  ;;  %v672_v41 = vrot.slane %v670_v27, 5 }
  0x2a   : > { %2983 = vmatpush3.bf16.msra.mxu0 %v3544_v50  ;;  %3503 = vmatpush3.bf16.msra.mxu1 %v3544_v50  ;;  %v3852_v50 = vcombine.low %v3801_v61, %v3804_v62  ;;  %v3857_v52 = vcombine.low %v351_v45, %v361_v48  ;;  %v3910_v45 = vcombine.low %v3863_v55, %v3866_v56  ;;  %v3915_v48 = vld [vmem:[%s3731_s14 + $0x24] sm:$0xf] }
  0x2b   : > { %3080 = vmatprep.subr.bf16.mxu1 %v3547_v57  ;;  %3192 = vmatprep.subr.bf16.mxu0 %v3548_v60  ;;  %v639_v57 = vsel %vm3776_vm2, %v634_v49, %v638_v38  ;;  %v363_v60 = vshrl.u32 %v3863_v55, 16  ;;  %v3565_v38 = vld [vmem:[%s5143_s1 + $0xd0] sm:$0xff]   ;;  %v3918_v49 = vld [vmem:[%s3731_s14 + $0x28] sm:$0xf] }
  0x2c   : > { %v400_v4 = vshrl.u32 %v3918_v49, 16 }
  0x2d   : > { %1761 = vmatmul.mubr.bf16.vlgmr.msra.gmra.mxu0 %v2838_v59  ;;  %1857 = vmatmul.mubr.bf16.vlgmr.msra.gmra.mxu1 %v3823_v7  ;;  %v3874_v59 = vld [vmem:[%s3731_s14 + $0x20] sm:$0x1]  ;;  %v365_v17 = vrot.slane %v363_v60, 4  ;;  %v390_v60 = vshll.u32 %v3915_v48, 16 }
  0x2e   : > { %3081 = vmatpush3.bf16.msra.mxu1 %v3549_v0  ;;  %3193 = vmatpush3.bf16.msra.mxu0 %v3550_v1  ;;  %v372_v0 = vshll.u32 %v3866_v56, 16  ;;  %v649_v1 = vsel %vm3776_vm2, %v644_v53, %v648_v40  ;;  %v382_v5 = vshll.u32 %v3874_v59, 16  ;;  %v657_v40 = vor.u32 %v656_v32, %v653_v31 }
  0x2f   : > { %3082 = vmatprep.subr.bf16.mxu1 %v3551_v16  ;;  %3194 = vmatprep.subr.bf16.mxu0 %v3558_v44  ;;  %v3888_v9 = vcombine.low %v639_v57, %v649_v1  ;;  %v3559_v16 = vld [vmem:[%s5143_s1 + $0xa0] sm:$0xff]   ;;  %v369_v23 = vor.u32 %v368_v18, %v365_v17  ;;  %v3926_v57 = vld [vmem:[%s3731_s14 + $0x2c] sm:$0x1]  ;;  %v396_v1 = vshll.u32 %v3918_v49, 16  ;;  %v392_v17 = vrot.slane %v390_v60, 5 }
  0x30   : > { %1768 = vmatprep.mubr.bf16.mxu0 %v3857_v52  ;;  %v374_v19 = vrot.slane %v372_v0, 5  ;;  %v384_v21 = vrot.slane %v382_v5, 5  ;;  %v658_v53 = vrot.slane %v657_v40, 4  ;;  %v3935_v5 = vld [vmem:[%s3731_s14 + $0xb4] sm:$0xf]  ;;  %v406_v18 = vshll.u32 %v3926_v57, 16 }
  0x31   : > { %5161 = vst [vmem:[#allocation3_spill] sm:$0xff] %v3888_v9  ;;  %1864 = vmatprep.mubr.bf16.mxu1 %v3888_v9  ;;  %v370_v34 = vrot.slane %v369_v23, 4  ;;  %v402_v20 = vrot.slane %v400_v4, 4  ;;  %v675_v23 = vshrl.u32 %v3935_v5, 16  ;;  %v3574_v60 = vld [vmem:[%s5143_s1 + $0x80] sm:$0xff]   ;;  %v3986_v4 = vcombine.low %v3915_v48, %v3918_v49 }
  0x32   : > { %3083 = vmatpush3.bf16.msra.mxu1 %v3552_v26  ;;  %3195 = vmatpush3.bf16.msra.mxu0 %v3560_v54  ;;  %v664_v26 = vshrl.u32 %v300_v8, 16  ;;  %v379_v30 = vor.u32 %v378_v14, %v374_v19  ;;  %v3566_v54 = vld [vmem:[%s5143_s1 + $0x90] sm:$0xff]  }
  0x33   : > { %3084 = vmatprep.subr.bf16.mxu1 %v3555_v35  ;;  %v662_v35 = vrot.slane %v660_v25, 5  ;;  %v375_v42 = vsel %vm3776_vm2, %v370_v34, %v374_v19  ;;  %v3944_v19 = vld [vmem:[%s3731_s14 + $0xb8] sm:$0xf]  ;;  %v3572_v25 = vld [vmem:[%s5143_s1 + $0x128] sm:$0xff]   ;;  %3196 = vmatprep.subr.bf16.mxu0 %v3570_v6  ;;  %v677_v32 = vrot.slane %v675_v23, 4  ;;  %5165 = vst [vmem:[#allocation5_spill] sm:$0xff] %v3986_v4 }
  0x34   : > { %v666_v36 = vrot.slane %v664_v26, 4  ;;  %v380_v39 = vrot.slane %v379_v30, 4  ;;  %v678_v30 = vshll.u32 %v3935_v5, 16  ;;  %v688_v34 = vshrl.u32 %v3944_v19, 16  ;;  %v3576_v6 = vld [vmem:[%s5143_s1 + $0x1f8] sm:$0xff]  }
  0x35   : > { %1769 = vmatmul.mubr.bf16.gmra.mxu0 %v3852_v50  ;;  %1865 = vmatmul.mubr.bf16.gmra.mxu1 %v3882_v3  ;;  %v663_v8 = vsel %vm3776_vm2, %v658_v53, %v662_v35  ;;  %v4037_v23 = vcombine.low %v3935_v5, %v3944_v19 }
  0x36   : > { %3085 = vmatpush3.bf16.msra.mxu1 %v3556_v51  ;;  %v667_v44 = vor.u32 %v666_v36, %v662_v35  ;;  %v385_v51 = vsel %vm3776_vm2, %v380_v39, %v384_v21  ;;  %v398_v21 = vrot.slane %v396_v1, 5  ;;  %3197 = vmatpush3.bf16.msra.mxu0 %v3572_v25  ;;  %v680_v36 = vrot.slane %v678_v30, 5  ;;  %v3571_v39 = vld [vmem:[%s5143_s1 + $0x88] sm:$0xff]  }
  0x37   : > { %3086 = vmatprep.subr.bf16.mxu1 %v3557_v58  ;;  %v387_v58 = vshrl.u32 %v3915_v48, 16  ;;  %v3930_v63 = vcombine.low %v375_v42, %v385_v51  ;;  %v3573_v51 = vld [vmem:[%s5143_s1 + $0xc0] sm:$0xff]  }
  0x38   : > { %v668_v0 = vrot.slane %v667_v44, 4  ;;  %v403_v31 = vor.u32 %v402_v20, %v398_v21  ;;  %v690_v44 = vrot.slane %v688_v34, 4  ;;  %v4015_v20 = vsel %vm3969_vm5, %v2820_v24, %v751_v28  ;;  %v3582_v24 = vld [vmem:[%s5143_s1 + $0x158] sm:$0xff]  }
  0x39   : > { %1776 = vmatprep.mubr.bf16.mxu0 %v3930_v63 }
  0x3a   : > { %3087 = vmatpush3.bf16.msra.mxu1 %v3559_v16  ;;  %v389_v16 = vrot.slane %v387_v58, 4  ;;  %v673_v14 = vsel %vm3776_vm2, %v668_v0, %v672_v41  ;;  %v404_v41 = vrot.slane %v403_v31, 4 }
  0x3b   : > { %3088 = vmatprep.subr.bf16.mxu1 %v3563_v29  ;;  %v3957_v26 = vcombine.low %v663_v8, %v673_v14  ;;  %v408_v29 = vrot.slane %v406_v18, 5  ;;  %v4001_v18 = vsel %vm3969_vm5, %v3783_v47, %v754_v43  ;;  %v4004_v14 = vld [vmem:[%s3731_s14 + $0x30] sm:$0xf]  ;;  %v4024_v47 = vld [vmem:[%s3731_s14 + $0x38] sm:$0x1] }
  0x3c   : > { %v393_v27 = vor.u32 %v392_v17, %v389_v16  ;;  %v3578_v17 = vld [vmem:[%s5143_s1 + $0x160] sm:$0xff]   ;;  %v414_v12 = vshll.u32 %v4004_v14, 16 }
  0x3d   : > { %5162 = vst [vmem:[#allocation4_spill] sm:$0xff] %v3957_v26  ;;  %1777 = vmatmul.mubr.bf16.gmra.mxu0 %v3910_v45  ;;  %1872 = vmatprep.mubr.bf16.mxu1 %v3957_v26  ;;  %v409_v0 = vsel %vm3776_vm2, %v404_v41, %v408_v29 }
  0x3e   : > { %3089 = vmatpush3.bf16.msra.mxu1 %v3564_v33  ;;  %v684_v33 = vshll.u32 %v3944_v19, 16  ;;  %v394_v35 = vrot.slane %v393_v27, 4  ;;  %3198 = vmatprep.subr.bf16.mxu0 %v3578_v17  ;;  %v430_v27 = vshll.u32 %v4024_v47, 16  ;;  %v416_v31 = vrot.slane %v414_v12, 5  ;;  %v4084_v12 = vld [vmem:[%s3731_s14 + $0x50] sm:$0x1] }
  0x3f   : > { %3090 = vmatprep.subr.bf16.mxu1 %v3565_v38  ;;  %v694_v38 = vshll.u32 %v304_v22, 16  ;;  %1873 = vmatmul.mubr.bf16.gmra.mxu1 %v3912_v46  ;;  %v411_v22 = vshrl.u32 %v4004_v14, 16 }
  0x40   : > { %v686_v42 = vrot.slane %v684_v33, 5  ;;  %v399_v53 = vsel %vm3776_vm2, %v394_v35, %v398_v21  ;;  %v4007_v21 = vld [vmem:[%s3731_s14 + $0x34] sm:$0xf]  ;;  %3199 = vmatpush3.bf16.msra.mxu0 %v3579_v13  ;;  %v432_v34 = vrot.slane %v430_v27, 5  ;;  %v2870_v35 = vcombine.low %v4015_v20, %v4001_v18 }
  0x41   : > { %v696_v58 = vrot.slane %v694_v38, 5  ;;  %v3991_v8 = vcombine.low %v399_v53, %v409_v0  ;;  %v420_v11 = vshll.u32 %v4007_v21, 16  ;;  %v424_v25 = vshrl.u32 %v4007_v21, 16  ;;  %3200 = vmatprep.subr.bf16.mxu0 %v3582_v24  ;;  %v4051_v38 = vld [vmem:[%s3731_s14 + $0x40] sm:$0xf] }
  0x42   : > { %3091 = vmatpush3.bf16.msra.mxu1 %v3566_v54  ;;  %v681_v54 = vor.u32 %v680_v36, %v677_v32  ;;  %v691_v1 = vor.u32 %v690_v44, %v686_v42  ;;  %v413_v30 = vrot.slane %v411_v22, 4  ;;  %v4048_v36 = vld [vmem:[%s3731_s14 + $0x3c] sm:$0xf]  ;;  %v4067_v0 = vld [vmem:[%s3731_s14 + $0x48] sm:$0xf]  ;;  %v2821_v22 = vrot.slane %v3801_v61, 9 }
  0x43   : > { %3092 = vmatprep.subr.bf16.mxu1 %v3569_v10  ;;  %1784 = vmatprep.mubr.bf16.mxu0 %v3991_v8  ;;  %v422_v32 = vrot.slane %v420_v11, 5  ;;  %v426_v33 = vrot.slane %v424_v25, 4  ;;  %v438_v44 = vshll.u32 %v4048_v36, 16  ;;  %v3587_v11 = vld [vmem:[%s5143_s1 + $0x150] sm:$0xff]   ;;  %v758_v25 = vrot.slane %v3804_v62, 5 }
  0x44   : > { %v682_v16 = vrot.slane %v681_v54, 4  ;;  %v692_v10 = vrot.slane %v691_v1, 4  ;;  %v417_v5 = vor.u32 %v416_v31, %v413_v30  ;;  %v4062_v54 = vcombine.low %v4004_v14, %v4007_v21 }
  0x45   : > { %1785 = vmatmul.mubr.bf16.gmra.mxu0 %v3986_v4  ;;  %v427_v19 = vor.u32 %v426_v33, %v422_v32  ;;  %v440_v17 = vrot.slane %v438_v44, 5  ;;  %v761_v27 = vrot.slane %v3815_v2, 5  ;;  %v459_v31 = vshrl.u32 %v4067_v0, 16  ;;  %v3583_v33 = vld [vmem:[%s5143_s1 + $0x1f0] sm:$0xff]  }
  0x46   : > { %3093 = vmatpush3.bf16.msra.mxu1 %v3571_v39  ;;  %v687_v43 = vsel %vm3776_vm2, %v682_v16, %v686_v42  ;;  %v697_v28 = vsel %vm3776_vm2, %v692_v10, %v696_v58  ;;  %v4054_v39 = vld [vmem:[%s3731_s14 + $0x44] sm:$0x1]  ;;  %v418_v41 = vrot.slane %v417_v5, 4  ;;  %v435_v42 = vshrl.u32 %v4048_v36, 16  ;;  %5167 = vst [vmem:[#allocation7_spill] sm:$0xff] %v4062_v54 }
  0x47   : > { %3094 = vmatprep.subr.bf16.mxu1 %v3573_v51  ;;  %v4041_v29 = vcombine.low %v687_v43, %v697_v28  ;;  %v444_v51 = vshll.u32 %v4051_v38, 16  ;;  %v428_v53 = vrot.slane %v427_v19, 4  ;;  %v448_v58 = vshrl.u32 %v4051_v38, 16  ;;  %v4078_v10 = vld [vmem:[%s3731_s14 + $0x4c] sm:$0xf]  ;;  %v3585_v19 = vld [vmem:[%s5143_s1 + $0x1b0] sm:$0xff]  }
  0x48   : > { %v423_v1 = vsel %vm3776_vm2, %v418_v41, %v422_v32  ;;  %v437_v16 = vrot.slane %v435_v42, 4  ;;  %v462_v32 = vshll.u32 %v4067_v0, 16  ;;  %v468_v61 = vshll.u32 %v4078_v10, 16  ;;  %v3588_v41 = vld [vmem:[%s5143_s1 + $0x110] sm:$0xff]  }
  0x49   : > { %5166 = vst [vmem:[#allocation6_spill] sm:$0xff] %v4041_v29  ;;  %1880 = vmatprep.mubr.bf16.mxu1 %v4041_v29  ;;  %v446_v18 = vrot.slane %v444_v51, 5  ;;  %v433_v20 = vsel %vm3776_vm2, %v428_v53, %v432_v34  ;;  %v450_v13 = vrot.slane %v448_v58, 4  ;;  %v759_v62 = vsel %vm3969_vm5, %v2821_v22, %v758_v25 }
  0x4a   : > { %3095 = vmatpush3.bf16.msra.mxu1 %v3574_v60  ;;  %v454_v60 = vshll.u32 %v4054_v39, 16  ;;  %v4089_v24 = vcombine.low %v423_v1, %v433_v20  ;;  %v441_v28 = vor.u32 %v440_v17, %v437_v16  ;;  %v760_v5 = vrot.slane %v758_v25, 4  ;;  %v4128_v20 = vld [vmem:[%s3731_s14 + $0x58] sm:$0xf]  ;;  %v4137_v25 = vld [vmem:[%s3731_s14 + $0x5c] sm:$0x1] }
  0x4b   : > { %3304 = vmatprep.subr.bf16.mxu1 %v3576_v6  ;;  %1881 = vmatmul.mubr.bf16.gmra.mxu1 %v4037_v23  ;;  %v3577_v6 = vld [vmem:[%s5143_s1 + $0x1b8] sm:$0xff]   ;;  %v451_v30 = vor.u32 %v450_v13, %v446_v18  ;;  %v472_v2 = vshrl.u32 %v4078_v10, 16  ;;  %v461_v44 = vrot.slane %v459_v31, 4  ;;  %v464_v51 = vrot.slane %v462_v32, 5  ;;  %v3590_v13 = vld [vmem:[%s5143_s1 + $0x1e8] sm:$0xff]  }
  0x4c   : > { %1921 = vmatprep.mubr.bf16.mxu1 %v3852_v50  ;;  %v3584_v50 = vld [vmem:[%s5143_s1 + $0x118] sm:$0xff]   ;;  %v456_v43 = vrot.slane %v454_v60, 5  ;;  %1792 = vmatprep.mubr.bf16.mxu0 %v4089_v24  ;;  %v442_v34 = vrot.slane %v441_v28, 4  ;;  %v470_v53 = vrot.slane %v468_v61, 5  ;;  %v762_v60 = vsel %vm3969_vm5, %v760_v5, %v761_v27 }
  0x4d   : > { %3201 = vmatpush3.bf16.msra.mxu0 %v3584_v50  ;;  %v452_v42 = vrot.slane %v451_v30, 4  ;;  %v474_v50 = vrot.slane %v472_v2, 4  ;;  %v478_v1 = vshll.u32 %v4084_v12, 16  ;;  %v4120_v16 = vcombine.low %v4048_v36, %v4051_v38  ;;  %v4149_v2 = vld [vmem:[%s3731_s14 + $0x60] sm:$0xf] }
  0x4e   : > { %3202 = vmatprep.subr.bf16.mxu0 %v3587_v11  ;;  %1793 = vmatmul.mubr.bf16.gmra.mxu0 %v4062_v54  ;;  %v447_v58 = vsel %vm3776_vm2, %v442_v34, %v446_v18  ;;  %v465_v17 = vor.u32 %v464_v51, %v461_v44  ;;  %v4125_v18 = vld [vmem:[%s3731_s14 + $0x54] sm:$0xf]  ;;  %v2822_v28 = vrot.slane %v3863_v55, 9  ;;  %v765_v30 = vrot.slane %v3866_v56, 5  ;;  %v4154_v44 = vld [vmem:[%s3731_s14 + $0x64] sm:$0xf] }
  0x4f   : > { %5168 = vst [vmem:[#allocation8_spill] sm:$0xff] %v4120_v16  ;;  %v475_v11 = vor.u32 %v474_v50, %v470_v53  ;;  %v768_v31 = vrot.slane %v3874_v59, 5  ;;  %v483_v32 = vshrl.u32 %v4125_v18, 16  ;;  %v492_v55 = vshll.u32 %v4128_v20, 16  ;;  %v3591_v51 = vld [vmem:[%s5143_s1 + $0x1a8] sm:$0xff]  }
  0x50   : > { %v466_v27 = vrot.slane %v465_v17, 4  ;;  %v496_v34 = vshrl.u32 %v4128_v20, 16  ;;  %v767_v5 = vrot.slane %v765_v30, 4  ;;  %v502_v50 = vshll.u32 %v4137_v25, 16 }
  0x51   : > { %3203 = vmatpush3.bf16.msra.mxu0 %v3588_v41  ;;  %v476_v61 = vrot.slane %v475_v11, 4  ;;  %v485_v56 = vrot.slane %v483_v32, 4  ;;  %v2823_v11 = vrot.slane %v3915_v48, 9  ;;  %v4185_v48 = vld [vmem:[%s3731_s14 + $0x68] sm:$0x1] }
  0x53   : > { %1922 = vmatmul.mubr.bf16.vlgmr.msra.gmra.mxu1 %v2870_v35  ;;  %v457_v35 = vsel %vm3776_vm2, %v452_v42, %v456_v43  ;;  %v480_v43 = vrot.slane %v478_v1, 5  ;;  %v494_v42 = vrot.slane %v492_v55, 5  ;;  %v3593_v1 = vld [vmem:[%s5143_s1 + $0x148] sm:$0xff]   ;;  %v516_v55 = vshll.u32 %v4154_v44, 16 }
  0x54   : > { %3305 = vmatpush3.bf16.msra.mxu1 %v3577_v6  ;;  %1929 = vmatprep.mubr.bf16.mxu1 %v3910_v45  ;;  %v4122_v6 = vcombine.low %v759_v62, %v762_v60  ;;  %v4133_v22 = vcombine.low %v447_v58, %v457_v35  ;;  %v471_v62 = vsel %vm3776_vm2, %v466_v27, %v470_v53  ;;  %v772_v27 = vrot.slane %v3918_v49, 5 }
  0x55   : > { %3306 = vmatprep.subr.bf16.mxu1 %v3583_v33  ;;  %v486_v33 = vshll.u32 %v4125_v18, 16  ;;  %v481_v59 = vsel %vm3776_vm2, %v476_v61, %v480_v43  ;;  %v4165_v58 = vcombine.low %v4067_v0, %v4078_v10  ;;  %v766_v60 = vsel %vm3969_vm5, %v2822_v28, %v765_v30  ;;  %v3594_v43 = vld [vmem:[%s5143_s1 + $0x108] sm:$0xff]   ;;  %3204 = vmatprep.subr.bf16.mxu0 %v3593_v1 }
  0x56   : > { %1800 = vmatprep.mubr.bf16.mxu0 %v4133_v22  ;;  %v4161_v53 = vcombine.low %v471_v62, %v481_v59  ;;  %v769_v35 = vsel %vm3969_vm5, %v767_v5, %v768_v31  ;;  %v504_v28 = vrot.slane %v502_v50, 5  ;;  %v775_v30 = vrot.slane %v3926_v57, 5  ;;  %3205 = vmatpush3.bf16.msra.mxu0 %v3594_v43  ;;  %v4196_v57 = vld [vmem:[%s3731_s14 + $0x70] sm:$0xf]  ;;  %v3596_v59 = vld [vmem:[%s5143_s1 + $0x1e0] sm:$0xff]  }
  0x57   : > { %v488_v41 = vrot.slane %v486_v33, 5  ;;  %1801 = vmatmul.mubr.bf16.gmra.mxu0 %v4120_v16  ;;  %v507_v31 = vshrl.u32 %v4149_v2, 16  ;;  %v510_v33 = vshll.u32 %v4149_v2, 16  ;;  %v774_v62 = vrot.slane %v772_v27, 4 }
  0x58   : > { %3307 = vmatpush3.bf16.msra.mxu1 %v3585_v19  ;;  %v498_v19 = vrot.slane %v496_v34, 4  ;;  %1808 = vmatprep.mubr.bf16.mxu0 %v4161_v53  ;;  %v4189_v34 = vcombine.low %v766_v60, %v769_v35  ;;  %v520_v49 = vshrl.u32 %v4154_v44, 16  ;;  %v518_v60 = vrot.slane %v516_v55, 5 }
  0x59   : > { %3308 = vmatprep.subr.bf16.mxu1 %v3590_v13  ;;  %v489_v17 = vor.u32 %v488_v41, %v485_v56  ;;  %v509_v5 = vrot.slane %v507_v31, 4  ;;  %v4193_v56 = vld [vmem:[%s3731_s14 + $0x6c] sm:$0xf]  ;;  %v526_v35 = vshll.u32 %v4185_v48, 16 }
  0x5a   : > { %v499_v13 = vor.u32 %v498_v19, %v494_v42  ;;  %v522_v1 = vrot.slane %v520_v49, 4  ;;  %v534_v55 = vshll.u32 %v4193_v56, 16  ;;  %v544_v49 = vshrl.u32 %v4196_v57, 16 }
  0x5b   : > { %1930 = vmatmul.mubr.bf16.gmra.mxu1 %v4122_v6  ;;  %v490_v32 = vrot.slane %v489_v17, 4  ;;  %v773_v17 = vsel %vm3969_vm5, %v2823_v11, %v772_v27  ;;  %v782_v11 = vrot.slane %v4024_v47, 5  ;;  %v4221_v27 = vld [vmem:[%s3731_s14 + $0x74] sm:$0x1]  ;;  %v4233_v47 = vcombine.low %v4125_v18, %v4128_v20 }
  0x5c   : > { %1937 = vmatprep.mubr.bf16.mxu1 %v3986_v4  ;;  %3309 = vmatpush3.bf16.msra.mxu1 %v3591_v51  ;;  %v500_v61 = vrot.slane %v499_v13, 4  ;;  %v512_v51 = vrot.slane %v510_v33, 5  ;;  %v776_v13 = vsel %vm3969_vm5, %v774_v62, %v775_v30  ;;  %v523_v31 = vor.u32 %v522_v1, %v518_v60 }
  0x5d   : > { %v495_v41 = vsel %vm3776_vm2, %v490_v32, %v494_v42  ;;  %3310 = vmatprep.subr.bf16.mxu1 %v3596_v59  ;;  %v2824_v42 = vrot.slane %v4004_v14, 9  ;;  %v528_v32 = vrot.slane %v526_v35, 5  ;;  %v3598_v14 = vld [vmem:[%s5143_s1 + $0x140] sm:$0xff]   ;;  %v531_v33 = vshrl.u32 %v4193_v56, 16  ;;  %v4237_v59 = vld [vmem:[%s3731_s14 + $0x78] sm:$0xf] }
  0x5e   : > { %v505_v19 = vsel %vm3776_vm2, %v500_v61, %v504_v28  ;;  %v513_v43 = vor.u32 %v512_v51, %v509_v5  ;;  %v3597_v28 = vld [vmem:[%s5143_s1 + $0x1a0] sm:$0xff]   ;;  %v779_v61 = vrot.slane %v4007_v21, 5  ;;  %v540_v21 = vshll.u32 %v4196_v57, 16  ;;  %3206 = vmatprep.subr.bf16.mxu0 %v3598_v14 }
  0x5f   : > { %v4205_v50 = vcombine.low %v495_v41, %v505_v19  ;;  %1809 = vmatmul.mubr.bf16.gmra.mxu0 %v4165_v58  ;;  %v524_v62 = vrot.slane %v523_v31, 4  ;;  %v3599_v41 = vld [vmem:[%s5143_s1 + $0x100] sm:$0xff]   ;;  %v533_v51 = vrot.slane %v531_v33, 4  ;;  %v536_v1 = vrot.slane %v534_v55, 5  ;;  %v3601_v31 = vld [vmem:[%s5143_s1 + $0x1d8] sm:$0xff]  }
  0x60   : > { %v514_v30 = vrot.slane %v513_v43, 4  ;;  %v781_v5 = vrot.slane %v779_v61, 4  ;;  %3311 = vmatpush3.bf16.msra.mxu1 %v3597_v28  ;;  %v542_v35 = vrot.slane %v540_v21, 5  ;;  %v4245_v43 = vld [vmem:[%s3731_s14 + $0x7c] sm:$0xf]  ;;  %v4250_v29 = vcombine.low %v773_v17, %v776_v13  ;;  %3207 = vmatpush3.bf16.msra.mxu0 %v3599_v41 }
  0x61   : > { %1816 = vmatprep.mubr.bf16.mxu0 %v4205_v50  ;;  %v529_v28 = vsel %vm3776_vm2, %v524_v62, %v528_v32  ;;  %v546_v14 = vrot.slane %v544_v49, 4  ;;  %v550_v26 = vshll.u32 %v4221_v27, 16  ;;  %3312 = vmatprep.subr.bf16.mxu1 %v3601_v31  ;;  %v4260_v21 = vld [vmem:[%s5143_s1 + $0x238] sm:$0xff]   ;;  %v4263_v13 = vld [vmem:[%s3731_s14 + $0x80] sm:$0x1]  ;;  %v555_v32 = vshrl.u32 %v4237_v59, 16 }
  0x62   : > { %v519_v19 = vsel %vm3776_vm2, %v514_v30, %v518_v60  ;;  %v537_v30 = vor.u32 %v536_v1, %v533_v51  ;;  %v558_v62 = vshll.u32 %v4237_v59, 16  ;;  %v786_v41 = vrot.slane %v4051_v38, 5  ;;  %v4274_v51 = vld [vmem:[%s3731_s14 + $0x84] sm:$0xf]  ;;  %v3603_v1 = vld [vmem:[%s5143_s1 + $0x198] sm:$0xff]   ;;  %3440 = vmatprep.subr.bf16.mxu0 %v4260_v21 }
  0x63   : > { %1938 = vmatmul.mubr.bf16.gmra.mxu1 %v4189_v34  ;;  %v4255_v60 = vcombine.low %v519_v19, %v529_v28  ;;  %v547_v33 = vor.u32 %v546_v14, %v542_v35  ;;  %v552_v55 = vrot.slane %v550_v26, 5  ;;  %v780_v26 = vsel %vm3969_vm5, %v2824_v42, %v779_v61  ;;  %v4285_v38 = vld [vmem:[%s3731_s14 + $0x88] sm:$0xf]  ;;  %v3604_v14 = vld [vmem:[%s5143_s1 + $0x1d0] sm:$0xff]  }
  0x64   : > { %1945 = vmatprep.mubr.bf16.mxu1 %v4062_v54  ;;  %v538_v17 = vrot.slane %v537_v30, 4  ;;  %v564_v19 = vshll.u32 %v4245_v43, 16  ;;  %v783_v31 = vsel %vm3969_vm5, %v781_v5, %v782_v11  ;;  %v557_v28 = vrot.slane %v555_v32, 4  ;;  %3313 = vmatpush3.bf16.msra.mxu1 %v3603_v1 }
  0x65   : > { %v548_v49 = vrot.slane %v547_v33, 4  ;;  %v560_v42 = vrot.slane %v558_v62, 5  ;;  %v568_v61 = vshrl.u32 %v4245_v43, 16  ;;  %v574_v11 = vshll.u32 %v4263_v13, 16  ;;  %3314 = vmatprep.subr.bf16.mxu1 %v3604_v14 }
  0x66   : > { %v543_v30 = vsel %vm3776_vm2, %v538_v17, %v542_v35  ;;  %v566_v9 = vrot.slane %v564_v19, 5  ;;  %v4298_v5 = vcombine.low %v4149_v2, %v4154_v44  ;;  %v2825_v35 = vrot.slane %v4048_v36, 9 }
  0x67   : > { %1817 = vmatmul.mubr.bf16.gmra.mxu0 %v4233_v47  ;;  %v553_v33 = vsel %vm3776_vm2, %v548_v49, %v552_v55  ;;  %v561_v32 = vor.u32 %v560_v42, %v557_v28  ;;  %v570_v62 = vrot.slane %v568_v61, 4  ;;  %v788_v17 = vrot.slane %v786_v41, 4  ;;  %v3606_v49 = vld [vmem:[%s5143_s1 + $0x190] sm:$0xff]  }
  0x68   : > { %1824 = vmatprep.mubr.bf16.mxu0 %v4255_v60  ;;  %v789_v55 = vrot.slane %v4054_v39, 5  ;;  %v4307_v19 = vcombine.low %v543_v30, %v553_v33  ;;  %v579_v28 = vshrl.u32 %v4274_v51, 16  ;;  %v576_v36 = vrot.slane %v574_v11, 5  ;;  %3315 = vmatpush3.bf16.msra.mxu1 %v3606_v49  ;;  %v3609_v33 = vld [vmem:[%s5143_s1 + $0x188] sm:$0xff]   ;;  %v3610_v49 = vld [vmem:[%s5143_s1 + $0x1c0] sm:$0xff]  }
  0x69   : > { %v571_v1 = vor.u32 %v570_v62, %v566_v9  ;;  %v582_v42 = vshll.u32 %v4274_v51, 16  ;;  %v588_v39 = vshll.u32 %v4285_v38, 16  ;;  %v592_v30 = vshrl.u32 %v4285_v38, 16 }
  0x6a   : > { %v581_v14 = vrot.slane %v579_v28, 4  ;;  %v793_v11 = vrot.slane %v4078_v10, 5  ;;  %v790_v28 = vsel %vm3969_vm5, %v788_v17, %v789_v55  ;;  %v598_v54 = vshll.u32 %v4310_v15, 16 }
  0x6b   : > { %1946 = vmatmul.mubr.bf16.gmra.mxu1 %v4250_v29  ;;  %v572_v61 = vrot.slane %v571_v1, 4  ;;  %v590_v62 = vrot.slane %v588_v39, 5  ;;  %v787_v1 = vsel %vm3969_vm5, %v2825_v35, %v786_v41  ;;  %v3612_v41 = vld [vmem:[%s5143_s1 + $0x180] sm:$0xff]   ;;  %v4344_v35 = vcombine.low %v4193_v56, %v4196_v57 }
  0x6c   : > { %1953 = vmatprep.mubr.bf16.mxu1 %v4120_v16  ;;  %v4300_v16 = vcombine.low %v780_v26, %v783_v31  ;;  %v3607_v26 = vld [vmem:[%s5143_s1 + $0x1c8] sm:$0xff]   ;;  %v562_v31 = vrot.slane %v561_v32, 4  ;;  %v584_v32 = vrot.slane %v582_v42, 5  ;;  %v4346_v17 = vcombine.low %v787_v1, %v790_v28 }
  0x6d   : > { %3316 = vmatprep.subr.bf16.mxu1 %v3607_v26  ;;  %v594_v26 = vrot.slane %v592_v30, 4  ;;  %v577_v42 = vsel %vm3776_vm2, %v572_v61, %v576_v36  ;;  %v2826_v55 = vrot.slane %v4067_v0, 9  ;;  %v796_v36 = vrot.slane %v4084_v12, 5 }
  0x6e   : > { %v567_v10 = vsel %vm3776_vm2, %v562_v31, %v566_v9  ;;  %v585_v39 = vor.u32 %v584_v32, %v581_v14  ;;  %3317 = vmatpush3.bf16.msra.mxu1 %v3609_v33  ;;  %v795_v31 = vrot.slane %v793_v11, 4  ;;  %v600_v61 = vrot.slane %v598_v54, 5 }
  0x6f   : > { %1825 = vmatmul.mubr.bf16.gmra.mxu0 %v4298_v5  ;;  %v595_v4 = vor.u32 %v594_v26, %v590_v62  ;;  %3318 = vmatprep.subr.bf16.mxu1 %v3610_v49  ;;  %v4349_v9 = vcombine.low %v567_v10, %v577_v42  ;;  %v794_v0 = vsel %vm3969_vm5, %v2826_v55, %v793_v11  ;;  %v800_v12 = vrot.slane %v4128_v20, 5 }
  0x70   : > { %1832 = vmatprep.mubr.bf16.mxu0 %v4307_v19  ;;  %v586_v14 = vrot.slane %v585_v39, 4  ;;  %v797_v33 = vsel %vm3969_vm5, %v795_v31, %v796_v36  ;;  %v4367_v32 = vcombine.low %v4237_v59, %v4245_v43  ;;  %v2827_v1 = vrot.slane %v4125_v18, 9 }
  0x71   : > { %v596_v30 = vrot.slane %v595_v4, 4  ;;  %v4369_v49 = vcombine.low %v794_v0, %v797_v33  ;;  %v802_v28 = vrot.slane %v800_v12, 4  ;;  %v803_v26 = vrot.slane %v4137_v25, 5 }
  0x72   : > { %3319 = vmatpush3.bf16.msra.mxu1 %v3612_v41  ;;  %v591_v4 = vsel %vm3776_vm2, %v586_v14, %v590_v62  ;;  %v801_v20 = vsel %vm3969_vm5, %v2827_v1, %v800_v12  ;;  %v807_v18 = vrot.slane %v4154_v44, 5  ;;  %v4386_v10 = vcombine.low %v4274_v51, %v4285_v38  ;;  %v3605_v14 = vld [vmem:[%s5143_s1 + $0x230] sm:$0xff]   ;;  %v3614_v12 = vld [vmem:[%s5143_s1 + $0x218] sm:$0xff]  }
  0x73   : > { %1954 = vmatmul.mubr.bf16.gmra.mxu1 %v4300_v16  ;;  %v601_v54 = vsel %vm3776_vm2, %v596_v30, %v600_v61  ;;  %v804_v62 = vsel %vm3969_vm5, %v802_v28, %v803_v26  ;;  %v2828_v42 = vrot.slane %v4149_v2, 9  ;;  %v810_v41 = vrot.slane %v4185_v48, 5  ;;  %v3619_v26 = vld [vmem:[%s3731_s14 + $0x94] sm:$0xf] }
  0x74   : > { %1961 = vmatprep.mubr.bf16.mxu1 %v4165_v58  ;;  %v4372_v11 = vcombine.low %v591_v4, %v601_v54  ;;  %v4388_v25 = vcombine.low %v801_v20, %v804_v62  ;;  %v809_v39 = vrot.slane %v807_v18, 4  ;;  %v814_v31 = vrot.slane %v4196_v57, 5  ;;  %v3616_v62 = vld [vmem:[%s5143_s1 + $0x208] sm:$0xff]  }
  0x75   : > { %v808_v44 = vsel %vm3969_vm5, %v2828_v42, %v807_v18  ;;  %v2829_v48 = vrot.slane %v4193_v56, 9  ;;  %v817_v61 = vrot.slane %v4221_v27, 5  ;;  %v821_v57 = vrot.slane %v4245_v43, 5  ;;  %v3608_v27 = vld [vmem:[%s5143_s1 + $0x228] sm:$0xff]   ;;  %v3611_v43 = vld [vmem:[%s5143_s1 + $0x220] sm:$0xff]  }
  0x76   : > { %v811_v55 = vsel %vm3969_vm5, %v809_v39, %v810_v41  ;;  %v816_v36 = vrot.slane %v814_v31, 4  ;;  %v824_v0 = vrot.slane %v4263_v13, 5  ;;  %v828_v33 = vrot.slane %v4285_v38, 5  ;;  %v3615_v38 = vld [vmem:[%s5143_s1 + $0x210] sm:$0xff]  }
  0x77   : > { %1833 = vmatmul.mubr.bf16.gmra.mxu0 %v4344_v35  ;;  %v4401_v2 = vcombine.low %v808_v44, %v811_v55  ;;  %v823_v30 = vrot.slane %v821_v57, 4  ;;  %v2831_v54 = vrot.slane %v4274_v51, 9  ;;  %v831_v28 = vrot.slane %v4310_v15, 5  ;;  %v3620_v42 = vld [vmem:[%s3731_s14 + $0x90] sm:$0xf] }
  0x78   : > { %1840 = vmatprep.mubr.bf16.mxu0 %v4349_v9  ;;  %v818_v56 = vsel %vm3969_vm5, %v816_v36, %v817_v61  ;;  %v830_v1 = vrot.slane %v828_v33, 4  ;;  %v835_v20 = vrot.slane %v3619_v26, 5  ;;  %v2832_v39 = vrot.slane %v3620_v42, 9  ;;  %v3621_v44 = vld [vmem:[%s3731_s14 + $0x98] sm:$0x1] }
  0x79   : > { %v825_v13 = vsel %vm3969_vm5, %v823_v30, %v824_v0  ;;  %v829_v51 = vsel %vm3969_vm5, %v2831_v54, %v828_v33  ;;  %v838_v55 = vrot.slane %v3621_v44, 5  ;;  %v3622_v61 = vld [vmem:[%s3731_s14 + $0xa0] sm:$0xf]  ;;  %v3628_v26 = vld [vmem:[%s3731_s14 + $0xb8] sm:$0xf] }
  0x7a   : > { %v832_v15 = vsel %vm3969_vm5, %v830_v1, %v831_v28  ;;  %v837_v41 = vrot.slane %v835_v20, 4  ;;  %v3627_v28 = vld [vmem:[%s3731_s14 + $0xb0] sm:$0x1]  ;;  %v4505_v42 = vld [vmem:[%s3731_s14 + $0xc4] sm:$0xf] }
  0x7b   : > { %1962 = vmatmul.mubr.bf16.gmra.mxu1 %v4346_v17  ;;  %v4459_v18 = vcombine.low %v829_v51, %v832_v15  ;;  %v3629_v44 = vld [vmem:[%s3731_s14 + $0xb4] sm:$0xf] }
  0x7c   : > { %1969 = vmatprep.mubr.bf16.mxu1 %v4233_v47  ;;  %v839_v36 = vsel %vm3969_vm5, %v837_v41, %v838_v55  ;;  %v2835_v55 = vrot.slane %v3629_v44, 9  ;;  %v890_v44 = vrot.slane %v4505_v42, 5 }
  0x7f   : > { %1841 = vmatmul.mubr.bf16.gmra.mxu0 %v4367_v32 }
  0x80   : > { %1848 = vmatprep.mubr.bf16.mxu0 %v4372_v11 }
  0x83   : > { %1970 = vmatmul.mubr.bf16.gmra.mxu1 %v4369_v49 }
  0x84   : > { %1977 = vmatprep.mubr.bf16.mxu1 %v4298_v5 }
  0x87   : > { %1849 = vmatmul.mubr.bf16.gmra.mxu0 %v4386_v10 }
  0x88   : > { %2082 = vmatprep.mubr.bf16.mxu0 %v4122_v6  ;;  %v815_v6 = vsel %vm3969_vm5, %v2829_v48, %v814_v31  ;;  %v3617_v31 = vld [vmem:[%s5143_s1 + $0x200] sm:$0xff]   ;;  %v836_v48 = vsel %vm3969_vm5, %v2832_v39, %v835_v20  ;;  %v856_v20 = vrot.slane %v3628_v26, 5  ;;  %v871_v26 = vshll.u32 %v4505_v42, 16 }
  0x8b   : > { %1978 = vmatmul.mubr.bf16.gmra.mxu1 %v4388_v25 }
  0x8c   : > { %1985 = vmatprep.mubr.bf16.mxu1 %v4344_v35 }
  0x8f   : > { %2083 = vmatmul.mubr.bf16.vlgmr.msra.gmra.mxu0 %v3857_v52  ;;  %v4421_v52 = vcombine.low %v815_v6, %v818_v56  ;;  %v4475_v6 = vcombine.low %v836_v48, %v839_v36  ;;  %v3623_v56 = vld [vmem:[%s3731_s14 + $0x9c] sm:$0xf] }
  0x90   : > { %3441 = vmatpush3.bf16.msra.mxu0 %v4260_v21  ;;  %2090 = vmatprep.mubr.bf16.mxu0 %v4189_v34  ;;  %v2830_v21 = vrot.slane %v4237_v59, 9  ;;  %v3630_v48 = vld [vmem:[%s3731_s14 + $0xbc] sm:$0x1] }
  0x91   : > { %3442 = vmatprep.subr.bf16.mxu0 %v3605_v14  ;;  %v859_v36 = vrot.slane %v3630_v48, 5 }
  0x92   : > { %v822_v59 = vsel %vm3969_vm5, %v2830_v21, %v821_v57  ;;  %v2833_v57 = vrot.slane %v3623_v56, 9  ;;  %v3624_v21 = vld [vmem:[%s3731_s14 + $0xa4] sm:$0x1] }
  0x93   : > { %1986 = vmatmul.mubr.bf16.gmra.mxu1 %v4401_v2  ;;  %v4440_v4 = vcombine.low %v822_v59, %v825_v13  ;;  %v845_v30 = vrot.slane %v3624_v21, 5  ;;  %v3625_v59 = vld [vmem:[%s3731_s14 + $0xac] sm:$0xf] }
  0x94   : > { %1993 = vmatprep.mubr.bf16.mxu1 %v4367_v32  ;;  %3443 = vmatpush3.bf16.msra.mxu0 %v3605_v14  ;;  %v842_v14 = vrot.slane %v3622_v61, 5  ;;  %v849_v13 = vrot.slane %v3625_v59, 5  ;;  %v857_v61 = vsel %vm3969_vm5, %v2835_v55, %v856_v20 }
  0x95   : > { %3444 = vmatprep.subr.bf16.mxu0 %v3608_v27 }
  0x96   : > { %v843_v0 = vsel %vm3969_vm5, %v2833_v57, %v842_v14  ;;  %v851_v1 = vrot.slane %v849_v13, 4  ;;  %v5169_v57 = vld [vmem:[#allocation5_spill] sm:$0xff] }
  0x97   : > { %2091 = vmatmul.mubr.bf16.gmra.mxu0 %v3930_v63 }
  0x98   : > { %2098 = vmatprep.mubr.bf16.mxu0 %v4250_v29  ;;  %3445 = vmatpush3.bf16.msra.mxu0 %v3608_v27  ;;  %v844_v27 = vrot.slane %v842_v14, 4 }
  0x99   : > { %3446 = vmatprep.subr.bf16.mxu0 %v3611_v43 }
  0x9b   : > { %1994 = vmatmul.mubr.bf16.gmra.mxu1 %v4421_v52 }
  0x9c   : > { %2001 = vmatprep.mubr.bf16.mxu1 %v4386_v10  ;;  %3447 = vmatpush3.bf16.msra.mxu0 %v3611_v43  ;;  %v846_v43 = vsel %vm3969_vm5, %v844_v27, %v845_v30  ;;  %v5170_v27 = vld [vmem:[#allocation7_spill] sm:$0xff] }
  0x9d   : > { %3448 = vmatprep.subr.bf16.mxu0 %v3614_v12  ;;  %v4488_v33 = vcombine.low %v843_v0, %v846_v43 }
  0x9f   : > { %2099 = vmatmul.mubr.bf16.gmra.mxu0 %v3991_v8 }
  0xa0   : > { %2106 = vmatprep.mubr.bf16.mxu0 %v4300_v16  ;;  %3449 = vmatpush3.bf16.msra.mxu0 %v3614_v12  ;;  %v3626_v12 = vld [vmem:[%s3731_s14 + $0xa8] sm:$0xf] }
  0xa1   : > { %3450 = vmatprep.subr.bf16.mxu0 %v3615_v38  ;;  %v2834_v54 = vrot.slane %v3626_v12, 9 }
  0xa3   : > { %2002 = vmatmul.mubr.bf16.gmra.mxu1 %v4440_v4  ;;  %v850_v51 = vsel %vm3969_vm5, %v2834_v54, %v849_v13 }
  0xa4   : > { %2009 = vmatprep.mubr.bf16.mxu1 %v3823_v7  ;;  %3451 = vmatpush3.bf16.msra.mxu0 %v3615_v38  ;;  %v852_v38 = vrot.slane %v3627_v28, 5  ;;  %v5173_v28 = vld [vmem:[#allocation3_spill] sm:$0xff] }
  0xa5   : > { %3452 = vmatprep.subr.bf16.mxu0 %v3616_v62 }
  0xa6   : > { %v853_v15 = vsel %vm3969_vm5, %v851_v1, %v852_v38 }
  0xa7   : > { %2107 = vmatmul.mubr.bf16.gmra.mxu0 %v4089_v24  ;;  %v4507_v39 = vcombine.low %v850_v51, %v853_v15  ;;  %v875_v15 = vshrl.u32 %v4505_v42, 16 }
  0xa8   : > { %2114 = vmatprep.mubr.bf16.mxu0 %v4346_v17  ;;  %3453 = vmatpush3.bf16.msra.mxu0 %v3616_v62  ;;  %v4502_v62 = vld [vmem:[%s3731_s14 + $0xc0] sm:$0xf] }
  0xa9   : > { %3454 = vmatprep.subr.bf16.mxu0 %v3617_v31  ;;  %v4511_v41 = vcombine.low %v4502_v62, %v4505_v42  ;;  %v862_v38 = vshrl.u32 %v4502_v62, 16  ;;  %v865_v51 = vshll.u32 %v4502_v62, 16  ;;  %v5174_v42 = vld [vmem:[#allocation4_spill] sm:$0xff] }
  0xab   : > { %2010 = vmatmul.mubr.bf16.gmra.mxu1 %v4459_v18 }
  0xac   : > { %2017 = vmatprep.mubr.bf16.mxu1 %v3882_v3  ;;  %3455 = vmatpush3.bf16.msra.mxu0 %v3617_v31  ;;  %v858_v31 = vrot.slane %v856_v20, 4 }
  0xae   : > { %v860_v14 = vsel %vm3969_vm5, %v858_v31, %v859_v36 }
  0xaf   : > { %2115 = vmatmul.mubr.bf16.gmra.mxu0 %v4133_v22  ;;  %v4523_v56 = vcombine.low %v857_v61, %v860_v14  ;;  %v864_v61 = vrot.slane %v862_v38, 4  ;;  %v867_v14 = vrot.slane %v865_v51, 5 }
  0xb0   : > { %2122 = vmatprep.mubr.bf16.mxu0 %v4369_v49 }
  0xb3   : > { %2018 = vmatmul.mubr.bf16.gmra.mxu1 %v4475_v6 }
  0xb4   : > { %2025 = vmatprep.mubr.bf16.mxu1 %v3912_v46 }
  0xb7   : > { %2123 = vmatmul.mubr.bf16.gmra.mxu0 %v4161_v53 }
  0xb8   : > { %2130 = vmatprep.mubr.bf16.mxu0 %v4388_v25 }
  0xbb   : > { %2026 = vmatmul.mubr.bf16.gmra.mxu1 %v4488_v33 }
  0xbc   : > { %2033 = vmatprep.mubr.bf16.mxu1 %v4037_v23 }
  0xbf   : > { %2131 = vmatmul.mubr.bf16.gmra.mxu0 %v4205_v50 }
  0xc0   : > { %2138 = vmatprep.mubr.bf16.mxu0 %v4401_v2 }
  0xc3   : > { %2034 = vmatmul.mubr.bf16.gmra.mxu1 %v4507_v39 }
  0xc4   : > { %2041 = vmatprep.mubr.bf16.mxu1 %v4511_v41 }
  0xc7   : > { %2139 = vmatmul.mubr.bf16.gmra.mxu0 %v4255_v60 }
  0xc8   : > { %2146 = vmatprep.mubr.bf16.mxu0 %v4421_v52 }
  0xcb   : > { %2042 = vmatmul.mubr.bf16.gmra.mxu1 %v4523_v56 }
  0xcc   : > { %2243 = vmatprep.mubr.bf16.mxu1 %v3930_v63  ;;  %v5172_v63 = vld [vmem:[#allocation8_spill] sm:$0xff] }
  0xcf   : > { %2147 = vmatmul.mubr.bf16.gmra.mxu0 %v4307_v19 }
  0xd0   : > { %2154 = vmatprep.mubr.bf16.mxu0 %v4440_v4 }
  0xd3   : > { %2244 = vmatmul.mubr.bf16.vlgmr.msra.gmra.mxu1 %v3910_v45  ;;  %v5171_v45 = vld [vmem:[#allocation2_spill] sm:$0xff] }
  0xd4   : > { %2251 = vmatprep.mubr.bf16.mxu1 %v3991_v8 }
  0xd7   : > { %2155 = vmatmul.mubr.bf16.gmra.mxu0 %v4349_v9 }
  0xd8   : > { %2162 = vmatprep.mubr.bf16.mxu0 %v4459_v18 }
  0xdb   : > { %2252 = vmatmul.mubr.bf16.gmra.mxu1 %v5169_v57  ;;  %v873_v57 = vrot.slane %v871_v26, 5 }
  0xdc   : > { %2259 = vmatprep.mubr.bf16.mxu1 %v4089_v24 }
  0xdf   : > { %2163 = vmatmul.mubr.bf16.gmra.mxu0 %v4372_v11 }
  0xe0   : > { %2170 = vmatprep.mubr.bf16.mxu0 %v4475_v6 }
  0xe3   : > { %2260 = vmatmul.mubr.bf16.gmra.mxu1 %v5170_v27  ;;  %v877_v27 = vrot.slane %v875_v15, 4 }
  0xe4   : > { %2267 = vmatprep.mubr.bf16.mxu1 %v4133_v22 }
  0xe7   : > { %2171 = vmatmul.mubr.bf16.gmra.mxu0 %v5171_v45 }
  0xe8   : > { %2178 = vmatprep.mubr.bf16.mxu0 %v4488_v33 }
  0xeb   : > { %2268 = vmatmul.mubr.bf16.gmra.mxu1 %v5172_v63 }
  0xec   : > { %2275 = vmatprep.mubr.bf16.mxu1 %v4161_v53 }
  0xed   : > { %v2984_v8 = vpop.f32.mrf.mxu0  ;;  %v3056_v21 = vpop.f32.mrf.mxu1 }
  0xef   : > { %v2985_v30 = vpop.f32.mrf.mxu0  ;;  %v3057_v24 = vpop.f32.mrf.mxu1  ;;  %2179 = vmatmul.mubr.bf16.gmra.mxu0 %v5173_v28 }
  0xf0   : > { %v4545_v0 = vadd.f32 %v2985_v30, %v2984_v8  ;;  %v4547_v43 = vadd.f32 %v3057_v24, %v3056_v21  ;;  %2186 = vmatprep.mubr.bf16.mxu0 %v4507_v39  ;;  %v892_v21 = vrot.slane %v890_v44, 4 }
  0xf1   : > { %v2987_v59 = vpop.f32.mrf.mxu0  ;;  %v3059_v13 = vpop.f32.mrf.mxu1 }
  0xf3   : > { %v2988_v12 = vpop.f32.mrf.mxu0  ;;  %v3060_v22 = vpop.f32.mrf.mxu1  ;;  %2276 = vmatmul.mubr.bf16.gmra.mxu1 %v4165_v58  ;;  %v307_v58 = vld [vmem:[%s3731_s14 + $0xc8] sm:$0x1] }
  0xf4   : > { %v4549_v54 = vadd.f32 %v2988_v12, %v2987_v59  ;;  %v4551_v1 = vadd.f32 %v3060_v22, %v3059_v13  ;;  %2283 = vmatprep.mubr.bf16.mxu1 %v4205_v50  ;;  %v2836_v50 = vrot.slane %v4502_v62, 9  ;;  %v893_v30 = vrot.slane %v307_v58, 5 }
  0xf5   : > { %v2990_v53 = vpop.f32.mrf.mxu0  ;;  %v3062_v55 = vpop.f32.mrf.mxu1  ;;  %v868_v12 = vor.u32 %v867_v14, %v864_v61  ;;  %v878_v22 = vor.u32 %v877_v27, %v873_v57 }
  0xf6   : > { %v891_v62 = vsel %vm3969_vm5, %v2836_v50, %v890_v44  ;;  %v894_v51 = vsel %vm3969_vm5, %v892_v21, %v893_v30 }
  0xf7   : > { %v2991_v20 = vpop.f32.mrf.mxu0  ;;  %v3063_v36 = vpop.f32.mrf.mxu1  ;;  %2187 = vmatmul.mubr.bf16.gmra.mxu0 %v5174_v42 }
  0xf8   : > { %v4562_v31 = vadd.f32 %v2991_v20, %v2990_v53  ;;  %v4565_v63 = vadd.f32 %v3063_v36, %v3062_v55  ;;  %2194 = vmatprep.mubr.bf16.mxu0 %v4523_v56  ;;  %v881_v53 = vshll.u32 %v307_v58, 16  ;;  %v4580_v20 = vcombine.low %v891_v62, %v894_v51  ;;  %v5175_v58 = vld [vmem:[#allocation6_spill] sm:$0xff] }
  0xf9   : > { %v2993_v48 = vpop.f32.mrf.mxu0  ;;  %v3065_v24 = vpop.f32.mrf.mxu1  ;;  %v879_v55 = vrot.slane %v878_v22, 4 }
  0xfb   : > { %v2994_v8 = vpop.f32.mrf.mxu0  ;;  %2284 = vmatmul.mubr.bf16.gmra.mxu1 %v4233_v47  ;;  %v3066_v13 = vpop.f32.mrf.mxu1  ;;  %v869_v47 = vrot.slane %v868_v12, 4 }
  0xfc   : > { %v4568_v59 = vadd.f32 %v2994_v8, %v2993_v48  ;;  %2291 = vmatprep.mubr.bf16.mxu1 %v4255_v60  ;;  %v4574_v38 = vadd.f32 %v3066_v13, %v3065_v24  ;;  %v883_v48 = vrot.slane %v881_v53, 5 }
  0xfd   : > { %v2996_v15 = vpop.f32.mrf.mxu0  ;;  %v874_v8 = vsel %vm3776_vm2, %v869_v47, %v873_v57 }
  0xfe   : > { %v884_v50 = vsel %vm3776_vm2, %v879_v55, %v883_v48 }
  0xff   : > { %v2997_v26 = vpop.f32.mrf.mxu0  ;;  %v3068_v36 = vpop.f32.mrf.mxu1  ;;  %2195 = vmatmul.mubr.bf16.gmra.mxu0 %v5175_v58 }
 0x100   : > { %v4582_v60 = vadd.f32 %v2997_v26, %v2996_v15  ;;  %2202 = vmatprep.mubr.bf16.mxu0 %v4580_v20 }
 0x101   : > { %v2999_v61 = vpop.f32.mrf.mxu0  ;;  %v3069_v14 = vpop.f32.mrf.mxu1 }
 0x102   : > { %v4586_v44 = vadd.f32 %v3069_v14, %v3068_v36  ;;  %v4615_v36 = vld [vmem:[%s5144_s2] ss:$0 sm:$0xff] }
 0x103   : > { %2292 = vmatmul.mubr.bf16.gmra.mxu1 %v4298_v5  ;;  %v3000_v27 = vpop.f32.mrf.mxu0  ;;  %v3071_v21 = vpop.f32.mrf.mxu1  ;;  %v4596_v5 = vcombine.low %v874_v8, %v884_v50  ;;  %v1763_v14 = vadd.f32 %v4545_v0, %v4615_v36 }
 0x104   : > { %2299 = vmatprep.mubr.bf16.mxu1 %v4307_v19  ;;  %v4594_v30 = vadd.f32 %v3000_v27, %v2999_v61 }
 0x105   : > { %v3072_v24 = vpop.f32.mrf.mxu1  ;;  %v3002_v13 = vpop.f32.mrf.mxu0 }
 0x106   : > { %v4598_v12 = vadd.f32 %v3072_v24, %v3071_v21 }
 0x107   : > { %v3003_v22 = vpop.f32.mrf.mxu0  ;;  %2203 = vmatmul.mubr.bf16.gmra.mxu0 %v4596_v5 }
 0x108   : > { %v4600_v53 = vadd.f32 %v3003_v22, %v3002_v13  ;;  %3456 = vmatprep.mubr.bf16.mxu0 %v4189_v34 }
 0x109   : > { %v3005_v19 = vpop.f32.mrf.mxu0 }
 0x10b   : > { %v3074_v62 = vpop.f32.mrf.mxu1  ;;  %2300 = vmatmul.mubr.bf16.gmra.mxu1 %v4344_v35  ;;  %v3006_v51 = vpop.f32.mrf.mxu0 }
 0x10c   : > { %2307 = vmatprep.mubr.bf16.mxu1 %v4349_v9  ;;  %v4608_v26 = vadd.f32 %v3006_v51, %v3005_v19 }
 0x10d   : > { %v3075_v57 = vpop.f32.mrf.mxu1 }
 0x10e   : > { %v4606_v15 = vadd.f32 %v3075_v57, %v3074_v62  ;;  %v3008_v35 = vpop.f32.mrf.mxu0 }
 0x10f   : > { %v3077_v47 = vpop.f32.mrf.mxu1  ;;  %3457 = vmatmul.mubr.bf16.vlgmr.msra.gmra.mxu0 %v4250_v29  ;;  %v1766_v29 = vadd.f32 %v4549_v54, %v4615_v36  ;;  %v1771_v54 = vadd.f32 %v4562_v31, %v4615_v36 }
 0x110   : > { %3460 = vmatprep.mubr.bf16.mxu0 %v4300_v16  ;;  %v3009_v34 = vpop.f32.mrf.mxu0 }
 0x111   : > { %v3078_v55 = vpop.f32.mrf.mxu1  ;;  %v4623_v27 = vadd.f32 %v3009_v34, %v3008_v35  ;;  %v1774_v34 = vadd.f32 %v4568_v59, %v4615_v36  ;;  %v1779_v59 = vadd.f32 %v4582_v60, %v4615_v36 }
 0x112   : > { %v4610_v48 = vadd.f32 %v3078_v55, %v3077_v47  ;;  %v3011_v50 = vpop.f32.mrf.mxu0 }
 0x113   : > { %v3096_v61 = vpop.f32.mrf.mxu1  ;;  %2308 = vmatmul.mubr.bf16.gmra.mxu1 %v4367_v32 }
 0x114   : > { %2315 = vmatprep.mubr.bf16.mxu1 %v4372_v11  ;;  %v3012_v13 = vpop.f32.mrf.mxu0 }
 0x115   : > { %v3097_v9 = vpop.f32.mrf.mxu1  ;;  %v4629_v11 = vadd.f32 %v3012_v13, %v3011_v50 }
 0x116   : > { %v3098_v8 = vadd.f32 %v3097_v9, %v3096_v61 }
 0x117   : > { %v3099_v21 = vpop.f32.mrf.mxu1  ;;  %v3014_v22 = vpop.f32.mrf.mxu0  ;;  %3461 = vmatmul.mubr.bf16.gmra.mxu0 %v4346_v17 }
 0x118   : > { %v4625_v24 = vadd.f32 %v3098_v8, %v1763_v14  ;;  %3464 = vmatprep.mubr.bf16.mxu0 %v4369_v49 }
 0x119   : > { %v3100_v32 = vpop.f32.mrf.mxu1  ;;  %v3015_v19 = vpop.f32.mrf.mxu0 }
 0x11a   : > { %v3101_v16 = vadd.f32 %v3100_v32, %v3099_v21  ;;  %v4639_v51 = vadd.f32 %v3015_v19, %v3014_v22  ;;  %v4667_v19 = vld [vmem:[%s3731_s14 + $0xd0] sm:$0xf] }
 0x11b   : > { %v3102_v62 = vpop.f32.mrf.mxu1  ;;  %2316 = vmatmul.mubr.bf16.gmra.mxu1 %v4386_v10  ;;  %v3017_v55 = vpop.f32.mrf.mxu0 }
 0x11c   : > { %v4633_v0 = vadd.f32 %v3101_v16, %v1766_v29  ;;  %2323 = vmatprep.mubr.bf16.mxu1 %v5171_v45 }
 0x11d   : > { %v3103_v57 = vpop.f32.mrf.mxu1  ;;  %v3018_v10 = vpop.f32.mrf.mxu0 }
 0x11e   : > { %v3104_v47 = vadd.f32 %v3103_v57, %v3102_v62  ;;  %v4645_v45 = vadd.f32 %v3018_v10, %v3017_v55  ;;  %v4664_v62 = vld [vmem:[%s3731_s14 + $0xcc] sm:$0xf]  ;;  %v905_v10 = vshll.u32 %v4667_v19, 16 }
 0x11f   : > { %v3105_v35 = vpop.f32.mrf.mxu1  ;;  %v3020_v9 = vpop.f32.mrf.mxu0  ;;  %3465 = vmatmul.mubr.bf16.gmra.mxu0 %v4388_v25  ;;  %v896_v55 = vshrl.u32 %v4664_v62, 16 }
 0x120   : > { %v4641_v61 = vadd.f32 %v3104_v47, %v1771_v54  ;;  %3468 = vmatprep.mubr.bf16.mxu0 %v4401_v2  ;;  %v1806_v37 = vadd.f32 %v4645_v45, %v4615_v36 }
 0x121   : > { %v3106_v17 = vpop.f32.mrf.mxu1  ;;  %v3021_v8 = vpop.f32.mrf.mxu0 }
 0x122   : > { %v3107_v49 = vadd.f32 %v3106_v17, %v3105_v35  ;;  %v4655_v21 = vadd.f32 %v3021_v8, %v3020_v9  ;;  %v899_v35 = vshll.u32 %v4664_v62, 16  ;;  %v909_v17 = vshrl.u32 %v4667_v19, 16 }
 0x123   : > { %v3108_v14 = vpop.f32.mrf.mxu1  ;;  %2324 = vmatmul.mubr.bf16.gmra.mxu1 %v3823_v7  ;;  %v3023_v32 = vpop.f32.mrf.mxu0  ;;  %v898_v8 = vrot.slane %v896_v55, 4  ;;  %v1795_v55 = vadd.f32 %v4623_v27, %v4615_v36 }
 0x124   : > { %v4649_v31 = vadd.f32 %v3107_v49, %v1774_v34  ;;  %2331 = vmatprep.mubr.bf16.mxu1 %v5173_v28  ;;  %v1782_v28 = vadd.f32 %v4594_v30, %v4615_v36 }
 0x125   : > { %v3109_v50 = vpop.f32.mrf.mxu1  ;;  %v3024_v25 = vpop.f32.mrf.mxu0 }
 0x126   : > { %v3110_v13 = vadd.f32 %v3109_v50, %v3108_v14  ;;  %v4661_v22 = vadd.f32 %v3024_v25, %v3023_v32  ;;  %v901_v50 = vrot.slane %v899_v35, 5  ;;  %v1790_v32 = vadd.f32 %v4608_v26, %v4615_v36 }
 0x127   : > { %v3111_v7 = vpop.f32.mrf.mxu1  ;;  %v3026_v60 = vpop.f32.mrf.mxu0  ;;  %3469 = vmatmul.mubr.bf16.gmra.mxu0 %v4421_v52 }
 0x128   : > { %v4657_v29 = vadd.f32 %v3110_v13, %v1779_v59  ;;  %3472 = vmatprep.mubr.bf16.mxu0 %v4440_v4  ;;  %v907_v59 = vrot.slane %v905_v10, 5  ;;  %v911_v13 = vrot.slane %v909_v17, 4  ;;  %v902_v26 = vor.u32 %v901_v50, %v898_v8 }
 0x129   : > { %v3112_v16 = vpop.f32.mrf.mxu1  ;;  %v3027_v30 = vpop.f32.mrf.mxu0  ;;  %v1814_v40 = vadd.f32 %v4661_v22, %v4615_v36 }
 0x12a   : > { %v3113_v2 = vadd.f32 %v3112_v16, %v3111_v7  ;;  %v4681_v52 = vadd.f32 %v3027_v30, %v3026_v60  ;;  %v912_v30 = vor.u32 %v911_v13, %v907_v59  ;;  %v924_v13 = vrot.slane %v4667_v19, 5 }
 0x12b   : > { %v3114_v57 = vpop.f32.mrf.mxu1  ;;  %2332 = vmatmul.mubr.bf16.gmra.mxu1 %v3882_v3  ;;  %v1787_v3 = vadd.f32 %v4600_v53, %v4615_v36  ;;  %v4690_v53 = vld [vmem:[%s3731_s14 + $0xd4] sm:$0x1]  ;;  %s2967_s14 = sshll.u32 %s5201_s15, 8 }
 0x12c   : > { %v4671_v54 = vadd.f32 %v3113_v2, %v1782_v28  ;;  %2339 = vmatprep.mubr.bf16.mxu1 %v5174_v42  ;;  %v3029_v42 = vpop.f32.mrf.mxu0  ;;  %s5001_s23 = scalar_lea.vmem %s5145_s3, %s2967_s14 }
 0x12d   : > { %v3115_v47 = vpop.f32.mrf.mxu1 }
 0x12e   : > { %v3116_v34 = vadd.f32 %v3115_v47, %v3114_v57  ;;  %v3030_v9 = vpop.f32.mrf.mxu0  ;;  %v915_v47 = vshll.u32 %v4690_v53, 16 }
 0x12f   : > { %v3117_v49 = vpop.f32.mrf.mxu1  ;;  %v4687_v7 = vadd.f32 %v3030_v9, %v3029_v42  ;;  %3473 = vmatmul.mubr.bf16.gmra.mxu0 %v4459_v18 }
 0x130   : > { %v4683_v4 = vadd.f32 %v3116_v34, %v1787_v3  ;;  %v3032_v16 = vpop.f32.mrf.mxu0  ;;  %3476 = vmatprep.mubr.bf16.mxu0 %v4475_v6  ;;  %v903_v34 = vrot.slane %v902_v26, 4  ;;  %v913_v6 = vrot.slane %v912_v30, 4  ;;  %v917_v42 = vrot.slane %v915_v47, 5 }
 0x131   : > { %v3118_v14 = vpop.f32.mrf.mxu1  ;;  %v2837_v30 = vrot.slane %v4664_v62, 9  ;;  %v926_v47 = vrot.slane %v924_v13, 4 }
 0x132   : > { %v3119_v25 = vadd.f32 %v3118_v14, %v3117_v49  ;;  %v3033_v60 = vpop.f32.mrf.mxu0  ;;  %v1798_v49 = vadd.f32 %v4629_v11, %v4615_v36  ;;  %v908_v11 = vsel %vm3776_vm2, %v903_v34, %v907_v59 }
 0x133   : > { %v3120_v28 = vpop.f32.mrf.mxu1  ;;  %2340 = vmatmul.mubr.bf16.gmra.mxu1 %v3912_v46  ;;  %v4701_v35 = vadd.f32 %v3033_v60, %v3032_v16  ;;  %v918_v16 = vsel %vm3776_vm2, %v913_v6, %v917_v42  ;;  %v1811_v6 = vadd.f32 %v4655_v21, %v4615_v36 }
 0x134   : > { %v4694_v2 = vadd.f32 %v3119_v25, %v1790_v32  ;;  %2347 = vmatprep.mubr.bf16.mxu1 %v5175_v58  ;;  %v3035_v10 = vpop.f32.mrf.mxu0  ;;  %v2890_v26 = vcombine.low %v908_v11, %v918_v16 }
 0x135   : > { %v3121_v57 = vpop.f32.mrf.mxu1 }
 0x136   : > { %v3122_v46 = vadd.f32 %v3121_v57, %v3120_v28  ;;  %v3036_v3 = vpop.f32.mrf.mxu0 }
 0x137   : > { %v3123_v18 = vpop.f32.mrf.mxu1  ;;  %v4707_v9 = vadd.f32 %v3036_v3, %v3035_v10  ;;  %3477 = vmatmul.mubr.bf16.gmra.mxu0 %v4488_v33  ;;  %v925_v3 = vsel %vm3969_vm5, %v2837_v30, %v924_v13 }
 0x138   : > { %v4703_v17 = vadd.f32 %v3122_v46, %v1795_v55  ;;  %v3038_v8 = vpop.f32.mrf.mxu0  ;;  %3480 = vmatprep.mubr.bf16.mxu0 %v4507_v39  ;;  %v927_v39 = vrot.slane %v4690_v53, 5 }
 0x139   : > { %v3124_v58 = vpop.f32.mrf.mxu1 }
 0x13a   : > { %v3125_v14 = vadd.f32 %v3124_v58, %v3123_v18  ;;  %v3039_v32 = vpop.f32.mrf.mxu0  ;;  %v928_v45 = vsel %vm3969_vm5, %v926_v47, %v927_v39  ;;  %v1822_v47 = vadd.f32 %v4687_v7, %v4615_v36 }
 0x13b   : > { %v3126_v27 = vpop.f32.mrf.mxu1  ;;  %2348 = vmatmul.mubr.bf16.gmra.mxu1 %v4037_v23  ;;  %v1803_v23 = vadd.f32 %v4639_v51, %v4615_v36  ;;  %v4722_v33 = vadd.f32 %v3039_v32, %v3038_v8 }
 0x13c   : > { %v4711_v50 = vadd.f32 %v3125_v14, %v1798_v49  ;;  %2355 = vmatprep.mubr.bf16.mxu1 %v4596_v5  ;;  %v3041_v60 = vpop.f32.mrf.mxu0  ;;  %v2889_v14 = vcombine.low %v4664_v62, %v4667_v19  ;;  %v1819_v62 = vadd.f32 %v4681_v52, %v4615_v36 }
 0x13d   : > { %v3127_v25 = vpop.f32.mrf.mxu1 }
 0x13e   : > { %v3128_v28 = vadd.f32 %v3127_v25, %v3126_v27  ;;  %v3042_v59 = vpop.f32.mrf.mxu0 }
 0x13f   : > { %v3129_v5 = vpop.f32.mrf.mxu1  ;;  %v4730_v46 = vadd.f32 %v3042_v59, %v3041_v60  ;;  %3481 = vmatmul.mubr.bf16.gmra.mxu0 %v4523_v56 }
 0x140   : > { %v4725_v57 = vadd.f32 %v3128_v28, %v1803_v23  ;;  %v3044_v10 = vpop.f32.mrf.mxu0  ;;  %3484 = vmatprep.mubr.bf16.mxu0 %v4580_v20  ;;  %v2891_v20 = vcombine.low %v925_v3, %v928_v45  ;;  %v1827_v3 = vadd.f32 %v4701_v35, %v4615_v36 }
 0x141   : > { %v3130_v55 = vpop.f32.mrf.mxu1 }
 0x142   : > { %v3131_v51 = vadd.f32 %v3130_v55, %v3129_v5  ;;  %v3045_v58 = vpop.f32.mrf.mxu0 }
 0x143   : > { %v3132_v18 = vpop.f32.mrf.mxu1  ;;  %2356 = vmatmul.mubr.bf16.gmra.mxu1 %v4511_v41  ;;  %v4743_v42 = vadd.f32 %v3045_v58, %v3044_v10 }
 0x144   : > { %v4734_v53 = vadd.f32 %v3131_v51, %v1806_v37  ;;  %2363 = vmatprep.mubr.bf16.mxu1 %v2890_v26  ;;  %v3047_v56 = vpop.f32.mrf.mxu0 }
 0x145   : > { %v3133_v34 = vpop.f32.mrf.mxu1 }
 0x146   : > { %v3134_v41 = vadd.f32 %v3133_v34, %v3132_v18  ;;  %v3048_v27 = vpop.f32.mrf.mxu0 }
 0x147   : > { %v3135_v49 = vpop.f32.mrf.mxu1  ;;  %v4751_v32 = vadd.f32 %v3048_v27, %v3047_v56  ;;  %3485 = vmatmul.mubr.bf16.gmra.mxu0 %v2891_v20 }
 0x148   : > { %v4747_v8 = vadd.f32 %v3134_v41, %v1811_v6  ;;  %v3050_v21 = vpop.f32.mrf.mxu0 }
 0x149   : > { %v3136_v13 = vpop.f32.mrf.mxu1 }
 0x14a   : > { %v3137_v25 = vadd.f32 %v3136_v13, %v3135_v49  ;;  %v3051_v23 = vpop.f32.mrf.mxu0 }
 0x14b   : > { %v3138_v11 = vpop.f32.mrf.mxu1  ;;  %2364 = vmatmul.mubr.bf16.gmra.mxu1 %v2889_v14  ;;  %v4757_v19 = vadd.f32 %v3051_v23, %v3050_v21  ;;  %v1830_v14 = vadd.f32 %v4707_v9, %v4615_v36 }
 0x14c   : > { %v4753_v16 = vadd.f32 %v3137_v25, %v1814_v40  ;;  %v3053_v5 = vpop.f32.mrf.mxu0 }
 0x14d   : > { %v3139_v28 = vpop.f32.mrf.mxu1 }
 0x14e   : > { %v3140_v60 = vadd.f32 %v3139_v28, %v3138_v11  ;;  %v3054_v26 = vpop.f32.mrf.mxu0 }
 0x14f   : > { %v3141_v39 = vpop.f32.mrf.mxu1  ;;  %v4763_v59 = vadd.f32 %v3054_v26, %v3053_v5 }
 0x150   : > { %v4759_v22 = vadd.f32 %v3140_v60, %v1819_v62  ;;  %v3208_v51 = vpop.f32.mrf.mxu0 }
 0x151   : > { %v3142_v30 = vpop.f32.mrf.mxu1 }
 0x152   : > { %v3143_v55 = vadd.f32 %v3142_v30, %v3141_v39  ;;  %v3209_v18 = vpop.f32.mrf.mxu0 }
 0x153   : > { %v3144_v37 = vpop.f32.mrf.mxu1  ;;  %v3210_v58 = vadd.f32 %v3209_v18, %v3208_v51 }
 0x154   : > { %v4765_v10 = vadd.f32 %v3143_v55, %v1822_v47  ;;  %v3211_v6 = vpop.f32.mrf.mxu0 }
 0x155   : > { %v3145_v52 = vpop.f32.mrf.mxu1  ;;  %v4772_v7 = vadd.f32 %v3210_v58, %v4625_v24  ;;  %v1835_v24 = vadd.f32 %v4722_v33, %v4615_v36 }
 0x156   : > { %v3146_v45 = vadd.f32 %v3145_v52, %v3144_v37  ;;  %v3212_v49 = vpop.f32.mrf.mxu0 }
 0x157   : > { %v3147_v34 = vpop.f32.mrf.mxu1  ;;  %v3213_v27 = vadd.f32 %v3212_v49, %v3211_v6 }
 0x158   : > { %v4769_v41 = vadd.f32 %v3146_v45, %v1827_v3  ;;  %v3214_v40 = vpop.f32.mrf.mxu0 }
 0x159   : > { %v3148_v56 = vpop.f32.mrf.mxu1  ;;  %v4779_v35 = vadd.f32 %v3213_v27, %v4633_v0  ;;  %v1838_v0 = vadd.f32 %v4730_v46, %v4615_v36 }
 0x15a   : > { %v3149_v20 = vadd.f32 %v3148_v56, %v3147_v34  ;;  %v3215_v11 = vpop.f32.mrf.mxu0 }
 0x15b   : > { %v3150_v13 = vpop.f32.mrf.mxu1  ;;  %v3216_v28 = vadd.f32 %v3215_v11, %v3214_v40 }
 0x15c   : > { %v4776_v25 = vadd.f32 %v3149_v20, %v1830_v14  ;;  %v3217_v60 = vpop.f32.mrf.mxu0 }
 0x15d   : > { %v3151_v21 = vpop.f32.mrf.mxu1  ;;  %v4786_v9 = vadd.f32 %v3216_v28, %v4641_v61  ;;  %v1843_v61 = vadd.f32 %v4743_v42, %v4615_v36 }
 0x15e   : > { %v3152_v23 = vadd.f32 %v3151_v21, %v3150_v13  ;;  %v3218_v26 = vpop.f32.mrf.mxu0 }
 0x15f   : > { %v3153_v62 = vpop.f32.mrf.mxu1  ;;  %v3219_v47 = vadd.f32 %v3218_v26, %v3217_v60 }
 0x160   : > { %v4783_v5 = vadd.f32 %v3152_v23, %v1835_v24  ;;  %v3220_v37 = vpop.f32.mrf.mxu0 }
 0x161   : > { %v3154_v39 = vpop.f32.mrf.mxu1  ;;  %v4793_v33 = vadd.f32 %v3219_v47, %v4649_v31  ;;  %v1846_v31 = vadd.f32 %v4751_v32, %v4615_v36 }
 0x162   : > { %v3155_v30 = vadd.f32 %v3154_v39, %v3153_v62  ;;  %v3221_v18 = vpop.f32.mrf.mxu0 }
 0x163   : > { %v3156_v55 = vpop.f32.mrf.mxu1  ;;  %v3222_v45 = vadd.f32 %v3221_v18, %v3220_v37 }
 0x164   : > { %v4790_v51 = vadd.f32 %v3155_v30, %v1838_v0  ;;  %v3223_v34 = vpop.f32.mrf.mxu0 }
 0x165   : > { %v3157_v52 = vpop.f32.mrf.mxu1  ;;  %v4800_v46 = vadd.f32 %v3222_v45, %v4657_v29  ;;  %v1851_v29 = vadd.f32 %v4757_v19, %v4615_v36 }
 0x166   : > { %v3158_v3 = vadd.f32 %v3157_v52, %v3156_v55  ;;  %v3224_v49 = vpop.f32.mrf.mxu0 }
 0x167   : > { %v3159_v58 = vpop.f32.mrf.mxu1  ;;  %v3225_v20 = vadd.f32 %v3224_v49, %v3223_v34 }
 0x168   : > { %v4797_v6 = vadd.f32 %v3158_v3, %v1843_v61  ;;  %v3226_v13 = vpop.f32.mrf.mxu0 }
 0x169   : > { %v3160_v56 = vpop.f32.mrf.mxu1  ;;  %v4807_v42 = vadd.f32 %v3225_v20, %v4671_v54  ;;  %v1854_v54 = vadd.f32 %v4763_v59, %v4615_v36 }
 0x16a   : > { %v3161_v14 = vadd.f32 %v3160_v56, %v3159_v58  ;;  %v3227_v11 = vpop.f32.mrf.mxu0 }
 0x16b   : > { %v3162_v27 = vpop.f32.mrf.mxu1  ;;  %v3228_v23 = vadd.f32 %v3227_v11, %v3226_v13 }
 0x16c   : > { %v4804_v40 = vadd.f32 %v3161_v14, %v1846_v31  ;;  %v3229_v62 = vpop.f32.mrf.mxu0 }
 0x16d   : > { %v3163_v21 = vpop.f32.mrf.mxu1  ;;  %v4814_v32 = vadd.f32 %v3228_v23, %v4683_v4  ;;  %v1859_v4 = vadd.f32 %v4547_v43, %v4615_v36 }
 0x16e   : > { %v3164_v24 = vadd.f32 %v3163_v21, %v3162_v27  ;;  %v3230_v26 = vpop.f32.mrf.mxu0 }
 0x16f   : > { %v3165_v28 = vpop.f32.mrf.mxu1  ;;  %v3231_v30 = vadd.f32 %v3230_v26, %v3229_v62 }
 0x170   : > { %v4811_v60 = vadd.f32 %v3164_v24, %v1851_v29  ;;  %v3232_v55 = vpop.f32.mrf.mxu0 }
 0x171   : > { %v3166_v39 = vpop.f32.mrf.mxu1  ;;  %v4821_v19 = vadd.f32 %v3231_v30, %v4694_v2  ;;  %v1862_v2 = vadd.f32 %v4551_v1, %v4615_v36 }
 0x172   : > { %v3167_v0 = vadd.f32 %v3166_v39, %v3165_v28  ;;  %v3233_v18 = vpop.f32.mrf.mxu0 }
 0x173   : > { %v3168_v47 = vpop.f32.mrf.mxu1  ;;  %v3234_v3 = vadd.f32 %v3233_v18, %v3232_v55 }
 0x174   : > { %v4818_v37 = vadd.f32 %v3167_v0, %v1854_v54  ;;  %v3235_v58 = vpop.f32.mrf.mxu0 }
 0x175   : > { %v3169_v52 = vpop.f32.mrf.mxu1  ;;  %v4828_v59 = vadd.f32 %v3234_v3, %v4703_v17  ;;  %v1867_v17 = vadd.f32 %v4565_v63, %v4615_v36 }
 0x176   : > { %v3170_v61 = vadd.f32 %v3169_v52, %v3168_v47  ;;  %v3236_v49 = vpop.f32.mrf.mxu0 }
 0x177   : > { %v3171_v45 = vpop.f32.mrf.mxu1  ;;  %v3237_v14 = vadd.f32 %v3236_v49, %v3235_v58 }
 0x178   : > { %v4825_v34 = vadd.f32 %v3170_v61, %v1859_v4  ;;  %v3238_v27 = vpop.f32.mrf.mxu0 }
 0x179   : > { %v3172_v56 = vpop.f32.mrf.mxu1  ;;  %v4835_v43 = vadd.f32 %v3237_v14, %v4711_v50  ;;  %v1870_v50 = vadd.f32 %v4574_v38, %v4615_v36 }
 0x17a   : > { %v3173_v31 = vadd.f32 %v3172_v56, %v3171_v45  ;;  %v3239_v11 = vpop.f32.mrf.mxu0 }
 0x17b   : > { %v3174_v20 = vpop.f32.mrf.mxu1  ;;  %v3240_v24 = vadd.f32 %v3239_v11, %v3238_v27 }
 0x17c   : > { %v4832_v13 = vadd.f32 %v3173_v31, %v1862_v2  ;;  %v3241_v28 = vpop.f32.mrf.mxu0 }
 0x17d   : > { %v3175_v21 = vpop.f32.mrf.mxu1  ;;  %v4842_v1 = vadd.f32 %v3240_v24, %v4725_v57  ;;  %v1875_v57 = vadd.f32 %v4586_v44, %v4615_v36 }
 0x17e   : > { %v3176_v29 = vadd.f32 %v3175_v21, %v3174_v20  ;;  %v3242_v26 = vpop.f32.mrf.mxu0 }
 0x17f   : > { %v3177_v23 = vpop.f32.mrf.mxu1  ;;  %v3243_v0 = vadd.f32 %v3242_v26, %v3241_v28 }
 0x180   : > { %v4839_v62 = vadd.f32 %v3176_v29, %v1867_v17  ;;  %v3244_v47 = vpop.f32.mrf.mxu0 }
 0x181   : > { %v3178_v39 = vpop.f32.mrf.mxu1  ;;  %v4849_v63 = vadd.f32 %v3243_v0, %v4734_v53  ;;  %v1878_v53 = vadd.f32 %v4598_v12, %v4615_v36 }
 0x182   : > { %v3179_v54 = vadd.f32 %v3178_v39, %v3177_v23  ;;  %v3245_v18 = vpop.f32.mrf.mxu0 }
 0x183   : > { %v3180_v30 = vpop.f32.mrf.mxu1  ;;  %v3246_v61 = vadd.f32 %v3245_v18, %v3244_v47 }
 0x184   : > { %v4846_v55 = vadd.f32 %v3179_v54, %v1870_v50  ;;  %v3247_v45 = vpop.f32.mrf.mxu0 }
 0x185   : > { %v3181_v52 = vpop.f32.mrf.mxu1  ;;  %v4856_v38 = vadd.f32 %v3246_v61, %v4747_v8  ;;  %v1883_v8 = vadd.f32 %v4606_v15, %v4615_v36 }
 0x186   : > { %v3182_v4 = vadd.f32 %v3181_v52, %v3180_v30  ;;  %v3248_v49 = vpop.f32.mrf.mxu0 }
 0x187   : > { %v3183_v3 = vpop.f32.mrf.mxu1  ;;  %v3249_v31 = vadd.f32 %v3248_v49, %v3247_v45 }
 0x188   : > { %v4853_v58 = vadd.f32 %v3182_v4, %v1875_v57  ;;  %v3250_v20 = vpop.f32.mrf.mxu0 }
 0x189   : > { %v3184_v56 = vpop.f32.mrf.mxu1  ;;  %v4863_v44 = vadd.f32 %v3249_v31, %v4753_v16  ;;  %v1886_v16 = vadd.f32 %v4610_v48, %v4615_v36 }
 0x18a   : > { %v3185_v2 = vadd.f32 %v3184_v56, %v3183_v3  ;;  %v3251_v11 = vpop.f32.mrf.mxu0 }
 0x18b   : > { %v3186_v14 = vpop.f32.mrf.mxu1  ;;  %v3252_v29 = vadd.f32 %v3251_v11, %v3250_v20 }
 0x18c   : > { %v4860_v27 = vadd.f32 %v3185_v2, %v1878_v53  ;;  %v3253_v23 = vpop.f32.mrf.mxu0 }
 0x18d   : > { %v3187_v21 = vpop.f32.mrf.mxu1  ;;  %v4870_v12 = vadd.f32 %v3252_v29, %v4759_v22 }
 0x18e   : > { %v3188_v17 = vadd.f32 %v3187_v21, %v3186_v14  ;;  %v3254_v26 = vpop.f32.mrf.mxu0 }
 0x18f   : > { %v3189_v24 = vpop.f32.mrf.mxu1  ;;  %v3255_v54 = vadd.f32 %v3254_v26, %v3253_v23 }
 0x190   : > { %v4867_v28 = vadd.f32 %v3188_v17, %v1883_v8  ;;  %v3256_v0 = vpop.f32.mrf.mxu0 }
 0x191   : > { %v3190_v39 = vpop.f32.mrf.mxu1  ;;  %v4879_v47 = vadd.f32 %v3255_v54, %v4765_v10 }
 0x192   : > { %v3191_v50 = vadd.f32 %v3190_v39, %v3189_v24  ;;  %v3257_v52 = vpop.f32.mrf.mxu0 }
 0x193   : > { %v4874_v30 = vpop.f32.mrf.mxu1  ;;  %v3258_v22 = vadd.f32 %v3257_v52, %v3256_v0 }
 0x194   : > { %v4876_v15 = vadd.f32 %v3191_v50, %v1886_v16  ;;  %v3259_v57 = vpop.f32.mrf.mxu0 }
 0x195   : > { %v4881_v18 = vpop.f32.mrf.mxu1  ;;  %v4886_v61 = vadd.f32 %v3258_v22, %v4769_v41 }
 0x196   : > { %v3260_v48 = vpop.f32.mrf.mxu0 }
 0x197   : > { %v4883_v4 = vpop.f32.mrf.mxu1  ;;  %v3261_v3 = vadd.f32 %v3260_v48, %v3259_v57 }
 0x198   : > { %v3262_v45 = vpop.f32.mrf.mxu0 }
 0x199   : > { %v4888_v36 = vpop.f32.mrf.mxu1  ;;  %v4893_v10 = vadd.f32 %v3261_v3, %v4776_v25 }
 0x19a   : > { %v3263_v49 = vpop.f32.mrf.mxu0 }
 0x19b   : > { %v4890_v56 = vpop.f32.mrf.mxu1  ;;  %5176 = vst [vmem:[#allocation5_spill] sm:$0xff] %v4893_v10  ;;  %v3264_v2 = vadd.f32 %v3263_v49, %v3262_v45 }
 0x19c   : > { %v3265_v31 = vpop.f32.mrf.mxu0 }
 0x19d   : > { %v4895_v53 = vpop.f32.mrf.mxu1  ;;  %v4900_v41 = vadd.f32 %v3264_v2, %v4783_v5 }
 0x19e   : > { %v3266_v20 = vpop.f32.mrf.mxu0 }
 0x19f   : > { %v4897_v14 = vpop.f32.mrf.mxu1  ;;  %v3267_v11 = vadd.f32 %v3266_v20, %v3265_v31 }
 0x1a0   : > { %v3268_v8 = vpop.f32.mrf.mxu0 }
 0x1a1   : > { %v4902_v21 = vpop.f32.mrf.mxu1  ;;  %v4907_v25 = vadd.f32 %v3267_v11, %v4790_v51 }
 0x1a2   : > { %v3269_v29 = vpop.f32.mrf.mxu0 }
 0x1a3   : > { %v4904_v17 = vpop.f32.mrf.mxu1  ;;  %v3270_v23 = vadd.f32 %v3269_v29, %v3268_v8 }
 0x1a4   : > { %v3271_v39 = vpop.f32.mrf.mxu0 }
 0x1a5   : > { %v4909_v24 = vpop.f32.mrf.mxu1  ;;  %v4914_v5 = vadd.f32 %v3270_v23, %v4797_v6 }
 0x1a6   : > { %v3272_v16 = vpop.f32.mrf.mxu0 }
 0x1a7   : > { %v4911_v26 = vpop.f32.mrf.mxu1  ;;  %5177 = vst [vmem:[#allocation7_spill] sm:$0xff] %v4914_v5  ;;  %v3273_v54 = vadd.f32 %v3272_v16, %v3271_v39 }
 0x1a8   : > { %v3274_v0 = vpop.f32.mrf.mxu0 }
 0x1a9   : > { %v4916_v50 = vpop.f32.mrf.mxu1  ;;  %v4921_v51 = vadd.f32 %v3273_v54, %v4804_v40 }
 0x1aa   : > { %v3275_v22 = vpop.f32.mrf.mxu0 }
 0x1ab   : > { %v4918_v52 = vpop.f32.mrf.mxu1  ;;  %5178 = vst [vmem:[#allocation2_spill] sm:$0xff] %v4921_v51  ;;  %v3276_v48 = vadd.f32 %v3275_v22, %v3274_v0 }
 0x1ac   : > { %v3277_v3 = vpop.f32.mrf.mxu0 }
 0x1ad   : > { %v4923_v57 = vpop.f32.mrf.mxu1  ;;  %v4928_v6 = vadd.f32 %v3276_v48, %v4811_v60 }
 0x1ae   : > { %v3278_v49 = vpop.f32.mrf.mxu0 }
 0x1af   : > { %v4925_v45 = vpop.f32.mrf.mxu1  ;;  %5179 = vst [vmem:[#allocation8_spill] sm:$0xff] %v4928_v6  ;;  %v3279_v31 = vadd.f32 %v3278_v49, %v3277_v3 }
 0x1b0   : > { %v3280_v20 = vpop.f32.mrf.mxu0 }
 0x1b1   : > { %v4930_v2 = vpop.f32.mrf.mxu1  ;;  %v4935_v40 = vadd.f32 %v3279_v31, %v4818_v37 }
 0x1b2   : > { %v3281_v8 = vpop.f32.mrf.mxu0 }
 0x1b3   : > { %v4932_v11 = vpop.f32.mrf.mxu1  ;;  %5180 = vst [vmem:[#allocation3_spill] sm:$0xff] %v4935_v40  ;;  %v3282_v23 = vadd.f32 %v3281_v8, %v3280_v20 }
 0x1b4   : > { %v3283_v39 = vpop.f32.mrf.mxu0 }
 0x1b5   : > { %v4937_v29 = vpop.f32.mrf.mxu1  ;;  %v4942_v60 = vadd.f32 %v3282_v23, %v4825_v34 }
 0x1b6   : > { %v3284_v54 = vpop.f32.mrf.mxu0 }
 0x1b7   : > { %v4939_v16 = vpop.f32.mrf.mxu1  ;;  %5181 = vst [vmem:[#allocation4_spill] sm:$0xff] %v4942_v60  ;;  %v3285_v22 = vadd.f32 %v3284_v54, %v3283_v39 }
 0x1b8   : > { %v3286_v48 = vpop.f32.mrf.mxu0 }
 0x1b9   : > { %v4944_v0 = vpop.f32.mrf.mxu1  ;;  %v4949_v37 = vadd.f32 %v3285_v22, %v4832_v13 }
 0x1ba   : > { %v3287_v49 = vpop.f32.mrf.mxu0 }
 0x1bb   : > { %v4946_v3 = vpop.f32.mrf.mxu1  ;;  %5182 = vst [vmem:[#allocation6_spill] sm:$0xff] %v4949_v37  ;;  %v3288_v20 = vadd.f32 %v3287_v49, %v3286_v48 }
 0x1bc   : > { %v3289_v8 = vpop.f32.mrf.mxu0 }
 0x1bd   : > { %v4951_v31 = vpop.f32.mrf.mxu1  ;;  %v4956_v34 = vadd.f32 %v3288_v20, %v4839_v62 }
 0x1be   : > { %v3290_v23 = vpop.f32.mrf.mxu0 }
 0x1bf   : > { %v4953_v51 = vpop.f32.mrf.mxu1  ;;  %5183 = vst [vmem:[#allocation9_spill] sm:$0xff] %v4956_v34  ;;  %v3291_v39 = vadd.f32 %v3290_v23, %v3289_v8 }
 0x1c0   : > { %v3292_v54 = vpop.f32.mrf.mxu0 }
 0x1c1   : > { %v4958_v60 = vpop.f32.mrf.mxu1  ;;  %v4963_v13 = vadd.f32 %v3291_v39, %v4846_v55 }
 0x1c2   : > { %v3293_v22 = vpop.f32.mrf.mxu0 }
 0x1c3   : > { %v4960_v40 = vpop.f32.mrf.mxu1  ;;  %5184 = vst [vmem:[#allocation10_spill] sm:$0xff] %v4963_v13  ;;  %v3294_v48 = vadd.f32 %v3293_v22, %v3292_v54  ;;  %v3328_v54 = vadd.f32 %v4895_v53, %v4890_v56 }
 0x1c4   : > { %v3295_v49 = vpop.f32.mrf.mxu0 }
 0x1c5   : > { %v4965_v37 = vpop.f32.mrf.mxu1  ;;  %v4970_v62 = vadd.f32 %v3294_v48, %v4853_v58  ;;  %v3322_v48 = vadd.f32 %v4881_v18, %v4874_v30  ;;  %v2254_v56 = vadd.f32 %v3328_v54, %v4786_v9  ;;  %v3325_v30 = vadd.f32 %v4888_v36, %v4883_v4 }
 0x1c6   : > { %v3296_v20 = vpop.f32.mrf.mxu0 }
 0x1c7   : > { %v4967_v5 = vpop.f32.mrf.mxu1  ;;  %v3297_v8 = vadd.f32 %v3296_v20, %v3295_v49  ;;  %v2249_v36 = vadd.f32 %v3325_v30, %v4779_v35 }
 0x1c8   : > { %v3298_v23 = vpop.f32.mrf.mxu0 }
 0x1c9   : > { %v4972_v34 = vpop.f32.mrf.mxu1  ;;  %v4977_v55 = vadd.f32 %v3297_v8, %v4860_v27  ;;  %v3331_v8 = vadd.f32 %v4902_v21, %v4897_v14 }
 0x1ca   : > { %v3299_v39 = vpop.f32.mrf.mxu0 }
 0x1cb   : > { %v4974_v6 = vpop.f32.mrf.mxu1  ;;  %5185 = vst [vmem:[#allocation11_spill] sm:$0xff] %v4977_v55  ;;  %v3300_v22 = vadd.f32 %v3299_v39, %v3298_v23  ;;  %v3340_v23 = vadd.f32 %v4923_v57, %v4918_v52  ;;  %v2257_v54 = vadd.f32 %v3331_v8, %v4793_v33  ;;  %v3343_v52 = vadd.f32 %v4930_v2, %v4925_v45 }
 0x1cc   : > { %v3301_v10 = vpop.f32.mrf.mxu0 }
 0x1cd   : > { %v4979_v13 = vpop.f32.mrf.mxu1  ;;  %v4988_v49 = vadd.f32 %v3300_v22, %v4867_v28  ;;  %v2270_v33 = vadd.f32 %v3340_v23, %v4814_v32 }
 0x1ce   : > { %v3302_v20 = vpop.f32.mrf.mxu0 }
 0x1cf   : > { %v4983_v58 = vpop.f32.mrf.mxu1  ;;  %v3303_v55 = vadd.f32 %v3302_v20, %v3301_v10  ;;  %v2246_v10 = vadd.f32 %v3322_v48, %v4772_v7  ;;  %v3334_v7 = vadd.f32 %v4909_v24, %v4904_v17  ;;  %v3337_v17 = vadd.f32 %v4916_v50, %v4911_v26 }
 0x1d0   : > { %v3458_v28 = vpop.f32.mrf.mxu0  ;;  %v3352_v24 = vadd.f32 %v4951_v31, %v4946_v3 }
 0x1d1   : > { %v4991_v27 = vpop.f32.mrf.mxu1  ;;  %v5006_v18 = vadd.f32 %v3303_v55, %v4876_v15  ;;  %v2415_v14 = vadd.f32 %v3458_v28, %v2254_v56  ;;  %v2262_v32 = vadd.f32 %v3334_v7, %v4800_v46 }
 0x1d2   : > { %v2406_v21 = vpop.f32.mrf.mxu0 }
 0x1d3   : > { %v4996_v53 = vpop.f32.mrf.mxu1  ;;  %2535 = vst [vmem:[%s5001_s23 + $0x10] sm:$0xff] %v2415_v14  ;;  %v2407_v39 = vadd.f32 %v2406_v21, %v2246_v10  ;;  %v2604_v10 = vmul.f32 %v2415_v14, %v2415_v14 }
 0x1d4   : > { %v3459_v4 = vpop.f32.mrf.mxu0 }
 0x1d5   : > { %v5009_v9 = vpop.f32.mrf.mxu1  ;;  %2533 = vst [vmem:[%s5001_s23] sm:$0xff] %v2407_v39  ;;  %v2418_v15 = vadd.f32 %v3459_v4, %v2257_v54  ;;  %v2602_v56 = vmul.f32 %v2407_v39, %v2407_v39  ;;  %v3346_v54 = vadd.f32 %v4937_v29, %v4932_v11  ;;  %v3355_v11 = vadd.f32 %v4958_v60, %v4953_v51 }
 0x1d6   : > { %v2409_v48 = vpop.f32.mrf.mxu0 }
 0x1d7   : > { %v5015_v22 = vpop.f32.mrf.mxu1  ;;  %2536 = vst [vmem:[%s5001_s23 + $0x18] sm:$0xff] %v2418_v15  ;;  %v2410_v57 = vadd.f32 %v2409_v48, %v2249_v36  ;;  %v2605_v3 = vmul.f32 %v2418_v15, %v2418_v15 }
 0x1d8   : > { %v3462_v8 = vpop.f32.mrf.mxu0 }
 0x1d9   : > { %v5021_v55 = vpop.f32.mrf.mxu1  ;;  %2534 = vst [vmem:[%s5001_s23 + $0x8] sm:$0xff] %v2410_v57  ;;  %v2565_v35 = vadd.f32 %v2410_v57, %v2407_v39  ;;  %v2603_v28 = vmul.f32 %v2410_v57, %v2410_v57  ;;  %v2431_v30 = vadd.f32 %v3462_v8, %v2270_v33  ;;  %v2273_v39 = vadd.f32 %v3343_v52, %v4821_v19 }
 0x1da   : > { %v2422_v2 = vpop.f32.mrf.mxu0  ;;  %v2286_v19 = vadd.f32 %v3352_v24, %v4842_v1  ;;  %v3364_v24 = vadd.f32 %v4979_v13, %v4974_v6 }
 0x1db   : > { %v5027_v20 = vpop.f32.mrf.mxu1  ;;  %v2566_v21 = vadd.f32 %v2565_v35, %v2415_v14  ;;  %v2634_v23 = vadd.f32 %v2603_v28, %v2602_v56  ;;  %2539 = vst [vmem:[%s5001_s23 + $0x30] sm:$0xff] %v2431_v30  ;;  %v2423_v4 = vadd.f32 %v2422_v2, %v2262_v32  ;;  %v2265_v14 = vadd.f32 %v3337_v17, %v4807_v42 }
 0x1dc   : > { %v3463_v50 = vpop.f32.mrf.mxu0  ;;  %v3349_v56 = vadd.f32 %v4944_v0, %v4939_v16  ;;  %v2278_v28 = vadd.f32 %v3346_v54, %v4828_v59  ;;  %v2289_v2 = vadd.f32 %v3355_v11, %v4849_v63  ;;  %v2608_v16 = vmul.f32 %v2431_v30, %v2431_v30 }
 0x1dd   : > { %v5034_v45 = vpop.f32.mrf.mxu1  ;;  %v2635_v31 = vadd.f32 %v2634_v23, %v2604_v10  ;;  %v2567_v36 = vadd.f32 %v2566_v21, %v2418_v15  ;;  %v2434_v48 = vadd.f32 %v3463_v50, %v2273_v39  ;;  %2537 = vst [vmem:[%s5001_s23 + $0x20] sm:$0xff] %v2423_v4  ;;  %v2606_v52 = vmul.f32 %v2423_v4, %v2423_v4 }
 0x1de   : > { %v2425_v7 = vpop.f32.mrf.mxu0  ;;  %v3358_v23 = vadd.f32 %v4965_v37, %v4960_v40  ;;  %v2281_v54 = vadd.f32 %v3349_v56, %v4835_v43 }
 0x1df   : > { %v5041_v26 = vpop.f32.mrf.mxu1  ;;  %v2568_v29 = vadd.f32 %v2567_v36, %v2423_v4  ;;  %v2636_v57 = vadd.f32 %v2635_v31, %v2605_v3  ;;  %2540 = vst [vmem:[%s5001_s23 + $0x38] sm:$0xff] %v2434_v48  ;;  %v2426_v33 = vadd.f32 %v2425_v7, %v2265_v14  ;;  %v2609_v6 = vmul.f32 %v2434_v48, %v2434_v48 }
 0x1e0   : > { %v3466_v8 = vpop.f32.mrf.mxu0  ;;  %v2302_v31 = vadd.f32 %v3364_v24, %v4870_v12  ;;  %v3361_v7 = vadd.f32 %v4972_v34, %v4967_v5  ;;  %v2294_v11 = vadd.f32 %v3358_v23, %v4856_v38  ;;  %v3376_v12 = vadd.f32 %v5034_v45, %v5027_v20 }
 0x1e1   : > { %v5044_v46 = vpop.f32.mrf.mxu1  ;;  %v2637_v35 = vadd.f32 %v2636_v57, %v2606_v52  ;;  %v2447_v42 = vadd.f32 %v3466_v8, %v2286_v19  ;;  %2538 = vst [vmem:[%s5001_s23 + $0x28] sm:$0xff] %v2426_v33  ;;  %v2569_v1 = vadd.f32 %v2568_v29, %v2426_v33  ;;  %v2607_v51 = vmul.f32 %v2426_v33, %v2426_v33 }
 0x1e2   : > { %v2438_v17 = vpop.f32.mrf.mxu0  ;;  %v3370_v38 = vadd.f32 %v5009_v9, %v4996_v53 }
 0x1e3   : > { %v5051_v15 = vpop.f32.mrf.mxu1  ;;  %2543 = vst [vmem:[%s5001_s23 + $0x50] sm:$0xff] %v2447_v42  ;;  %v2439_v32 = vadd.f32 %v2438_v17, %v2278_v28  ;;  %v2570_v0 = vadd.f32 %v2569_v1, %v2431_v30  ;;  %v2638_v10 = vadd.f32 %v2637_v35, %v2607_v51  ;;  %v3367_v30 = vadd.f32 %v4991_v27, %v4983_v58 }
 0x1e4   : > { %v3467_v59 = vpop.f32.mrf.mxu0  ;;  %v2612_v8 = vmul.f32 %v2447_v42, %v2447_v42  ;;  %v2297_v1 = vadd.f32 %v3361_v7, %v4863_v44  ;;  %v3373_v44 = vadd.f32 %v5021_v55, %v5015_v22  ;;  %v2310_v23 = vadd.f32 %v3370_v38, %v4886_v61 }
 0x1e5   : > { %v5057_v60 = vpop.f32.mrf.mxu1  ;;  %2541 = vst [vmem:[%s5001_s23 + $0x40] sm:$0xff] %v2439_v32  ;;  %v2450_v39 = vadd.f32 %v3467_v59, %v2289_v2  ;;  %v2639_v13 = vadd.f32 %v2638_v10, %v2608_v16  ;;  %v2571_v4 = vadd.f32 %v2570_v0, %v2434_v48  ;;  %v2610_v37 = vmul.f32 %v2439_v32, %v2439_v32 }
 0x1e6   : > { %v2441_v63 = vpop.f32.mrf.mxu0  ;;  %v2305_v33 = vadd.f32 %v3367_v30, %v4879_v47  ;;  %v3379_v47 = vadd.f32 %v5044_v46, %v5041_v26 }
 0x1e7   : > { %v5063_v21 = vpop.f32.mrf.mxu1  ;;  %2544 = vst [vmem:[%s5001_s23 + $0x58] sm:$0xff] %v2450_v39  ;;  %v2442_v3 = vadd.f32 %v2441_v63, %v2281_v54  ;;  %v2572_v40 = vadd.f32 %v2571_v4, %v2439_v32  ;;  %v2640_v36 = vadd.f32 %v2639_v13, %v2609_v6  ;;  %v2613_v51 = vmul.f32 %v2450_v39, %v2450_v39 }
 0x1e8   : > { %v3470_v43 = vpop.f32.mrf.mxu0  ;;  %v2318_v32 = vadd.f32 %v3376_v12, %v4900_v41  ;;  %v2321_v13 = vadd.f32 %v3379_v47, %v4907_v25 }
 0x1e9   : > { %v5069_v50 = vpop.f32.mrf.mxu1  ;;  %2542 = vst [vmem:[%s5001_s23 + $0x48] sm:$0xff] %v2442_v3  ;;  %v2611_v48 = vmul.f32 %v2442_v3, %v2442_v3  ;;  %v2463_v19 = vadd.f32 %v3470_v43, %v2302_v31  ;;  %v2641_v58 = vadd.f32 %v2640_v36, %v2610_v37  ;;  %v2573_v27 = vadd.f32 %v2572_v40, %v2442_v3  ;;  %v5186_v31 = vld [vmem:[#allocation5_spill] sm:$0xff] }
 0x1ea   : > { %v2454_v52 = vpop.f32.mrf.mxu0  ;;  %v3382_v3 = vadd.f32 %v5057_v60, %v5051_v15  ;;  %v2313_v40 = vadd.f32 %v3373_v44, %v5186_v31 }
 0x1eb   : > { %v3386_v14 = vpop.f32.mrf.mxu1  ;;  %2547 = vst [vmem:[%s5001_s23 + $0x70] sm:$0xff] %v2463_v19  ;;  %v2455_v57 = vadd.f32 %v2454_v52, %v2294_v11  ;;  %v2574_v5 = vadd.f32 %v2573_v27, %v2447_v42  ;;  %v2642_v34 = vadd.f32 %v2641_v58, %v2611_v48  ;;  %v2616_v4 = vmul.f32 %v2463_v19, %v2463_v19 }
 0x1ec   : > { %v3471_v35 = vpop.f32.mrf.mxu0  ;;  %v3385_v52 = vadd.f32 %v5069_v50, %v5063_v21 }
 0x1ed   : > { %v3387_v29 = vpop.f32.mrf.mxu1  ;;  %2545 = vst [vmem:[%s5001_s23 + $0x60] sm:$0xff] %v2455_v57  ;;  %v2466_v28 = vadd.f32 %v3471_v35, %v2305_v33  ;;  %v2643_v20 = vadd.f32 %v2642_v34, %v2612_v8  ;;  %v2575_v45 = vadd.f32 %v2574_v5, %v2450_v39  ;;  %v2614_v53 = vmul.f32 %v2455_v57, %v2455_v57  ;;  %v5188_v33 = vld [vmem:[#allocation7_spill] sm:$0xff] }
 0x1ee   : > { %v2457_v24 = vpop.f32.mrf.mxu0  ;;  %v3388_v41 = vadd.f32 %v3387_v29, %v3386_v14  ;;  %v2326_v8 = vadd.f32 %v3382_v3, %v5188_v33 }
 0x1ef   : > { %v3389_v56 = vpop.f32.mrf.mxu1  ;;  %2548 = vst [vmem:[%s5001_s23 + $0x78] sm:$0xff] %v2466_v28  ;;  %v2458_v42 = vadd.f32 %v2457_v24, %v2297_v1  ;;  %v2576_v2 = vadd.f32 %v2575_v45, %v2455_v57  ;;  %v2644_v9 = vadd.f32 %v2643_v20, %v2613_v51  ;;  %v2617_v37 = vmul.f32 %v2466_v28, %v2466_v28  ;;  %v5189_v1 = vld [vmem:[#allocation3_spill] sm:$0xff] }
 0x1f0   : > { %v3474_v0 = vpop.f32.mrf.mxu0 }
 0x1f1   : > { %v3390_v17 = vpop.f32.mrf.mxu1  ;;  %2546 = vst [vmem:[%s5001_s23 + $0x68] sm:$0xff] %v2458_v42  ;;  %v2615_v10 = vmul.f32 %v2458_v42, %v2458_v42  ;;  %v2479_v59 = vadd.f32 %v3474_v0, %v2318_v32  ;;  %v2645_v26 = vadd.f32 %v2644_v9, %v2614_v53  ;;  %v2577_v46 = vadd.f32 %v2576_v2, %v2458_v42  ;;  %v5190_v42 = vld [vmem:[#allocation2_spill] sm:$0xff] }
 0x1f2   : > { %v2470_v54 = vpop.f32.mrf.mxu0  ;;  %v3391_v25 = vadd.f32 %v3390_v17, %v3389_v56  ;;  %v2329_v32 = vadd.f32 %v3385_v52, %v5190_v42 }
 0x1f3   : > { %v3392_v16 = vpop.f32.mrf.mxu1  ;;  %2551 = vst [vmem:[%s5001_s23 + $0x90] sm:$0xff] %v2479_v59  ;;  %v2471_v6 = vadd.f32 %v2470_v54, %v2310_v23  ;;  %v2578_v63 = vadd.f32 %v2577_v46, %v2463_v19  ;;  %v2646_v30 = vadd.f32 %v2645_v26, %v2615_v10  ;;  %v5187_v19 = vld [vmem:[#allocation8_spill] sm:$0xff]  ;;  %v2620_v20 = vmul.f32 %v2479_v59, %v2479_v59  ;;  %v5191_v26 = vld [vmem:[#allocation9_spill] sm:$0xff] }
 0x1f4   : > { %v3475_v55 = vpop.f32.mrf.mxu0  ;;  %v2334_v11 = vadd.f32 %v3388_v41, %v5187_v19  ;;  %v2337_v51 = vadd.f32 %v3391_v25, %v5189_v1 }
 0x1f5   : > { %v3393_v39 = vpop.f32.mrf.mxu1  ;;  %2549 = vst [vmem:[%s5001_s23 + $0x80] sm:$0xff] %v2471_v6  ;;  %v2482_v61 = vadd.f32 %v3475_v55, %v2321_v13  ;;  %v2647_v36 = vadd.f32 %v2646_v30, %v2616_v4  ;;  %v2579_v14 = vadd.f32 %v2578_v63, %v2466_v28  ;;  %v2618_v27 = vmul.f32 %v2471_v6, %v2471_v6  ;;  %v5192_v63 = vld [vmem:[#allocation4_spill] sm:$0xff] }
 0x1f6   : > { %v2473_v7 = vpop.f32.mrf.mxu0  ;;  %v3394_v24 = vadd.f32 %v3393_v39, %v3392_v16 }
 0x1f7   : > { %v3395_v22 = vpop.f32.mrf.mxu1  ;;  %2552 = vst [vmem:[%s5001_s23 + $0x98] sm:$0xff] %v2482_v61  ;;  %v2474_v48 = vadd.f32 %v2473_v7, %v2313_v40  ;;  %v2580_v58 = vadd.f32 %v2579_v14, %v2471_v6  ;;  %v2648_v29 = vadd.f32 %v2647_v36, %v2617_v37  ;;  %v2621_v2 = vmul.f32 %v2482_v61, %v2482_v61  ;;  %v5193_v37 = vld [vmem:[#allocation10_spill] sm:$0xff] }
 0x1f8   : > { %v3478_v60 = vpop.f32.mrf.mxu0  ;;  %v2342_v30 = vadd.f32 %v3394_v24, %v5192_v63 }
 0x1f9   : > { %v3396_v43 = vpop.f32.mrf.mxu1  ;;  %2550 = vst [vmem:[%s5001_s23 + $0x88] sm:$0xff] %v2474_v48  ;;  %v2619_v12 = vmul.f32 %v2474_v48, %v2474_v48  ;;  %v2495_v57 = vadd.f32 %v3478_v60, %v2334_v11  ;;  %v2649_v5 = vadd.f32 %v2648_v29, %v2618_v27  ;;  %v2581_v34 = vadd.f32 %v2580_v58, %v2474_v48  ;;  %v5194_v11 = vld [vmem:[#allocation6_spill] sm:$0xff] }
 0x1fa   : > { %v2486_v35 = vpop.f32.mrf.mxu0  ;;  %v3397_v6 = vadd.f32 %v3396_v43, %v3395_v22 }
 0x1fb   : > { %v3398_v15 = vpop.f32.mrf.mxu1  ;;  %2555 = vst [vmem:[%s5001_s23 + $0xb0] sm:$0xff] %v2495_v57  ;;  %v2487_v28 = vadd.f32 %v2486_v35, %v2326_v8  ;;  %v2582_v45 = vadd.f32 %v2581_v34, %v2479_v59  ;;  %v2650_v17 = vadd.f32 %v2649_v5, %v2619_v12  ;;  %v2624_v14 = vmul.f32 %v2495_v57, %v2495_v57 }
 0x1fc   : > { %v3479_v50 = vpop.f32.mrf.mxu0  ;;  %v2345_v58 = vadd.f32 %v3397_v6, %v5194_v11 }
 0x1fd   : > { %v3399_v56 = vpop.f32.mrf.mxu1  ;;  %2553 = vst [vmem:[%s5001_s23 + $0xa0] sm:$0xff] %v2487_v28  ;;  %v2498_v47 = vadd.f32 %v3479_v50, %v2337_v51  ;;  %v2651_v53 = vadd.f32 %v2650_v17, %v2620_v20  ;;  %v2583_v9 = vadd.f32 %v2582_v45, %v2482_v61  ;;  %v2622_v54 = vmul.f32 %v2487_v28, %v2487_v28 }
 0x1fe   : > { %v3400_v38 = vadd.f32 %v3399_v56, %v3398_v15  ;;  %v2489_v44 = vpop.f32.mrf.mxu0 }
 0x1ff   : > { %v3401_v21 = vpop.f32.mrf.mxu1  ;;  %2556 = vst [vmem:[%s5001_s23 + $0xb8] sm:$0xff] %v2498_v47  ;;  %v2490_v23 = vadd.f32 %v2489_v44, %v2329_v32  ;;  %v2584_v46 = vadd.f32 %v2583_v9, %v2487_v28  ;;  %v2652_v41 = vadd.f32 %v2651_v53, %v2621_v2  ;;  %v2625_v27 = vmul.f32 %v2498_v47, %v2498_v47  ;;  %v5195_v2 = vld [vmem:[#allocation11_spill] sm:$0xff] }
 0x200   : > { %v2350_v59 = vadd.f32 %v3400_v38, %v5191_v26  ;;  %v3482_v39 = vpop.f32.mrf.mxu0 }
 0x201   : > { %v3402_v0 = vpop.f32.mrf.mxu1  ;;  %2554 = vst [vmem:[%s5001_s23 + $0xa8] sm:$0xff] %v2490_v23  ;;  %v2623_v13 = vmul.f32 %v2490_v23, %v2490_v23  ;;  %v2653_v55 = vadd.f32 %v2652_v41, %v2622_v54  ;;  %v2585_v3 = vadd.f32 %v2584_v46, %v2490_v23 }
 0x202   : > { %v3403_v10 = vadd.f32 %v3402_v0, %v3401_v21  ;;  %v2511_v4 = vadd.f32 %v3482_v39, %v2350_v59  ;;  %v2502_v31 = vpop.f32.mrf.mxu0 }
 0x203   : > { %v3404_v16 = vpop.f32.mrf.mxu1  ;;  %v2503_v40 = vadd.f32 %v2502_v31, %v2342_v30  ;;  %v2586_v7 = vadd.f32 %v2585_v3, %v2495_v57  ;;  %v2654_v25 = vadd.f32 %v2653_v55, %v2623_v13 }
 0x204   : > { %2559 = vst [vmem:[%s5001_s23 + $0xd0] sm:$0xff] %v2511_v4  ;;  %v2353_v36 = vadd.f32 %v3403_v10, %v5193_v37  ;;  %v3483_v22 = vpop.f32.mrf.mxu0  ;;  %v2628_v21 = vmul.f32 %v2511_v4, %v2511_v4 }
 0x205   : > { %v3405_v61 = vpop.f32.mrf.mxu1  ;;  %2557 = vst [vmem:[%s5001_s23 + $0xc0] sm:$0xff] %v2503_v40  ;;  %v2655_v29 = vadd.f32 %v2654_v25, %v2624_v14  ;;  %v2587_v15 = vadd.f32 %v2586_v7, %v2498_v47  ;;  %v2626_v8 = vmul.f32 %v2503_v40, %v2503_v40 }
 0x206   : > { %v3406_v43 = vadd.f32 %v3405_v61, %v3404_v16  ;;  %v2514_v19 = vadd.f32 %v3483_v22, %v2353_v36  ;;  %v2505_v52 = vpop.f32.mrf.mxu0 }
 0x207   : > { %v3407_v48 = vpop.f32.mrf.mxu1  ;;  %v2506_v12 = vadd.f32 %v2505_v52, %v2345_v58  ;;  %v2588_v33 = vadd.f32 %v2587_v15, %v2503_v40  ;;  %v2656_v5 = vadd.f32 %v2655_v29, %v2625_v27 }
 0x208   : > { %2560 = vst [vmem:[%s5001_s23 + $0xd8] sm:$0xff] %v2514_v19  ;;  %v3486_v34 = vpop.f32.mrf.mxu0  ;;  %v2358_v38 = vadd.f32 %v3406_v43, %v4970_v62  ;;  %v2629_v9 = vmul.f32 %v2514_v19, %v2514_v19 }
 0x209   : > { %v3408_v60 = vpop.f32.mrf.mxu1  ;;  %2558 = vst [vmem:[%s5001_s23 + $0xc8] sm:$0xff] %v2506_v12  ;;  %v2627_v35 = vmul.f32 %v2506_v12, %v2506_v12  ;;  %v2657_v28 = vadd.f32 %v2656_v5, %v2626_v8  ;;  %v2589_v1 = vadd.f32 %v2588_v33, %v2506_v12 }
 0x20a   : > { %v3409_v56 = vadd.f32 %v3408_v60, %v3407_v48  ;;  %v2518_v20 = vpop.f32.mrf.mxu0 }
 0x20b   : > { %v3410_v57 = vpop.f32.mrf.mxu1  ;;  %v2519_v17 = vadd.f32 %v2518_v20, %v2358_v38  ;;  %v2590_v50 = vadd.f32 %v2589_v1, %v2511_v4  ;;  %v2658_v24 = vadd.f32 %v2657_v28, %v2627_v35 }
 0x20c   : > { %v3487_v42 = vpop.f32.mrf.mxu0  ;;  %v2361_v53 = vadd.f32 %v3409_v56, %v5195_v2 }
 0x20d   : > { %v3411_v51 = vpop.f32.mrf.mxu1  ;;  %2561 = vst [vmem:[%s5001_s23 + $0xe0] sm:$0xff] %v2519_v17  ;;  %v2659_v62 = vadd.f32 %v2658_v24, %v2628_v21  ;;  %v2591_v0 = vadd.f32 %v2590_v50, %v2514_v19  ;;  %v2630_v54 = vmul.f32 %v2519_v17, %v2519_v17 }
 0x20e   : > { %v3412_v45 = vadd.f32 %v3411_v51, %v3410_v57  ;;  %v2521_v10 = vpop.f32.mrf.mxu0 }
 0x20f   : > { %v3413_v47 = vpop.f32.mrf.mxu1  ;;  %v2522_v59 = vadd.f32 %v2521_v10, %v2361_v53  ;;  %v2592_v46 = vadd.f32 %v2591_v0, %v2519_v17  ;;  %v2660_v41 = vadd.f32 %v2659_v62, %v2629_v9 }
 0x210   : > { %v2366_v32 = vadd.f32 %v3412_v45, %v4988_v49 }
 0x211   : > { %v3414_v44 = vpop.f32.mrf.mxu1  ;;  %2562 = vst [vmem:[%s5001_s23 + $0xe8] sm:$0xff] %v2522_v59  ;;  %v2631_v49 = vmul.f32 %v2522_v59, %v2522_v59  ;;  %v2661_v39 = vadd.f32 %v2660_v41, %v2630_v54  ;;  %v2593_v6 = vadd.f32 %v2592_v46, %v2522_v59 }
 0x212   : > { %v2527_v23 = vadd.f32 %v3486_v34, %v2366_v32  ;;  %v3415_v26 = vadd.f32 %v3414_v44, %v3413_v47 }
 0x213   : > { %v2662_v30 = vadd.f32 %v2661_v39, %v2631_v49 }
 0x214   : > { %2563 = vst [vmem:[%s5001_s23 + $0xf0] sm:$0xff] %v2527_v23  ;;  %v2369_v16 = vadd.f32 %v3415_v26, %v5006_v18  ;;  %v2632_v4 = vmul.f32 %v2527_v23, %v2527_v23  ;;  %v2594_v63 = vadd.f32 %v2593_v6, %v2527_v23 }
 0x216   : > { %v2530_v13 = vadd.f32 %v3487_v42, %v2369_v16  ;;  %v2663_v61 = vadd.f32 %v2662_v30, %v2632_v4 }
 0x218   : > { %2564 = vst [vmem:[%s5001_s23 + $0xf8] sm:$0xff] %v2530_v13  ;;  %v2633_v55 = vmul.f32 %v2530_v13, %v2530_v13  ;;  %v2595_v3 = vadd.f32 %v2594_v63, %v2530_v13 }
 0x21a   : > { %v2596_v31 = vrot.slane %v2595_v3, 4  ;;  %v2664_v40 = vadd.f32 %v2663_v61, %v2633_v55 }
 0x21c   : > { %v2597_v37 = vadd.f32 %v2596_v31, %v2595_v3  ;;  %v2665_v36 = vrot.slane %v2664_v40, 4 }
 0x21e   : > { %v2598_v14 = vrot.slane %v2597_v37, 2  ;;  %v2666_v7 = vadd.f32 %v2665_v36, %v2664_v40 }
 0x220   : > { %v2599_v18 = vadd.f32 %v2598_v14, %v2597_v37  ;;  %v2667_v25 = vrot.slane %v2666_v7, 2 }
 0x222   : > { %v2600_v48 = vrot.slane %v2599_v18, 1  ;;  %v2668_v22 = vadd.f32 %v2667_v25, %v2666_v7 }
 0x224   : > { %v2669_v43 = vrot.slane %v2668_v22, 1  ;;  %v2601_v19 = vadd.f32 %v2600_v48, %v2599_v18 }
 0x226   : > { %v2670_v11 = vadd.f32 %v2669_v43, %v2668_v22 }
 0x228   : > { %v2672_v58 = vsel %vm2671_vm6, %v2601_v19, %v2670_v11 }
 0x229   : > { %2673 = vst [vmem:[%s255_s27] sm:$0x3] %v2672_v58 }
 0x22a PF: > { %s15_s17 = sadd.s32 1, %s3653_s17   ;;  %s5196_s15 = smov %s3649_s16 }
 0x22b   : > { %p12_p5 = scmp.ge.s32.totalorder %s15_s17, 4   ;;  %s5197_s16 = smov %s5199_s18 }
 0x22d   :  { %14 = sbr.rel (!%p12_p5) target bundleno = 2 (0x2), region = 74 }

</bundles_post_ra>
